<compile_context>
chip_gen: v5e
topology: v5e:2x2
jax: 0.10.0
libtpu: 0.0.40
codegen_flags: <defaults>
</compile_context>

<pallas_src>
import jax
import jax.numpy as jnp
import numpy as np
from jax import lax
from jax.experimental import pallas as pl
from jax.experimental.pallas import tpu as pltpu


def _recip(x):
    # EUP approx reciprocal (free slot) + one Newton step -> ~f32 accuracy.
    r = pl.reciprocal(x, approx=True)
    return r * (2.0 - x * r)


def bidaf_kernel(c_ref, q_ref, w_ref, b_ref, out_ref):
    c = c_ref[...]                       # (NB, Lc, D)  f32
    q = q_ref[...]                       # (NB, Lq, D)  f32
    nb, _, D = c.shape

    bc = b_ref[0]                        # scalar biases (SMEM)
    bq = b_ref[1]
    bcq = b_ref[2]

    # --- Linear(D,1) projections on the MXU -------------------------------
    # w_ref rows: 0 = att_weight_c, 1 = att_weight_q, 2 = att_weight_cq
    # (rows 3..7 are zero padding).  One batched matmul per operand.
    w3 = jnp.broadcast_to(w_ref[...], (nb, 8, D))                # (NB, 8, D)
    proj_c = jnp.einsum('bld,bkd->blk', c, w3,
                        preferred_element_type=jnp.float32,
                        precision=lax.Precision.HIGHEST)         # (NB, Lc, 8)
    proj_q = jnp.einsum('bid,bkd->bik', q, w3,
                        preferred_element_type=jnp.float32,
                        precision=lax.Precision.HIGHEST)         # (NB, Lq, 8)
    sc = proj_c[:, :, 0:1] + bc                                  # (NB, Lc, 1)
    sq = proj_q[:, :, 1:2] + bq                                  # (NB, Lq, 1)

    # cq[b,l,i] = sum_d c[b,l,d] * wcq[d] * q[b,i,d] + bcq  -- the per-i loop
    # of the reference collapses into one batched MXU matmul; the wcq scale is
    # applied to q (the smaller operand).
    wcq = w_ref[2:3, :]                                          # (1, D)
    cq = jnp.einsum('bld,bid->bli', c, q * wcq,
                    preferred_element_type=jnp.float32,
                    precision=lax.Precision.HIGHEST) + bcq       # (NB, Lc, Lq)

    # similarity matrix
    s = sc + jnp.swapaxes(sq, -1, -2) + cq                       # (NB, Lc, Lq)

    # ---- context-to-query: softmax over the query axis --------------------
    s_max = jnp.max(s, axis=-1, keepdims=True)                   # (NB, Lc, 1)
    p = jnp.exp(s - s_max)
    p_sum = jnp.sum(p, axis=-1, keepdims=True)                   # (NB, Lc, 1)
    c2q = jnp.einsum('bli,bid->bld', p, q,
                     preferred_element_type=jnp.float32,
                     precision=lax.Precision.HIGHEST) * _recip(p_sum)

    # ---- query-to-context: softmax over Lc of the per-row max -------------
    m = s_max                                                    # (NB, Lc, 1)
    m_max = jnp.max(m, axis=1, keepdims=True)                    # (NB, 1, 1)
    e = jnp.exp(m - m_max)                                       # (NB, Lc, 1)
    e_sum = jnp.sum(e, axis=1, keepdims=True)                    # (NB, 1, 1)
    # numerator as a matmul over Lc -> MXU path (not an XLU sublane reduce)
    e_t = jnp.swapaxes(e, -1, -2)                                # (NB, 1, Lc)
    q2c = jnp.einsum('bol,bld->bod', e_t, c,
                     preferred_element_type=jnp.float32,
                     precision=lax.Precision.HIGHEST) * _recip(e_sum)
                                                                 # (NB, 1, D)

    # ---- x = [c ; c2q ; c*c2q ; c*q2c] as 4 lane-aligned slab stores -------
    out_ref[:, :, 0 * D:1 * D] = c.astype(out_ref.dtype)
    out_ref[:, :, 1 * D:2 * D] = c2q.astype(out_ref.dtype)
    out_ref[:, :, 2 * D:3 * D] = (c * c2q).astype(out_ref.dtype)
    out_ref[:, :, 3 * D:4 * D] = (c * q2c).astype(out_ref.dtype)


def _tensorcores_per_chip():
    """Best-effort TensorCore count for the local chip generation."""
    try:
        kind = jax.devices()[0].device_kind.lower().replace(" ", "")
    except Exception:
        return 1
    # Single-TensorCore generations (the "e"/"lite" chips).
    if any(t in kind for t in ("v5e", "v5lite", "v6e", "v6lite")):
        return 1
    # v7x has 2 TensorCores; v2/v3/v4/v5p are megacore (2 cores behind one
    # device, split across a "parallel" grid axis).
    if any(t in kind for t in ("v7", "7x", "v5p", "v4", "v3", "v2")):
        return 2
    return 1


def bidaf_attn(c, q, wc, bc, wq, bq, wcq, bcq):
    B, Lc, D = c.shape
    _, Lq, _ = q.shape

    # Pack the three (1, D) weight rows into one vreg-aligned (8, D) tile and
    # the three biases into one SMEM vector (2 invariant buffers, not 6).
    w_pack = jnp.zeros((8, D), c.dtype)
    w_pack = w_pack.at[0].set(wc[0]).at[1].set(wq[0]).at[2].set(wcq[0])
    b_pack = jnp.concatenate([bc, bq, bcq]).astype(jnp.float32)   # (3,)

    # Generation-aware batching: one grid step per TensorCore when the batch
    # divides evenly, otherwise a single step with the whole batch.
    ncores = _tensorcores_per_chip()
    nb = B // ncores if (ncores > 1 and B % ncores == 0) else B
    grid = (B // nb,)

    return pl.pallas_call(
        bidaf_kernel,
        out_shape=jax.ShapeDtypeStruct((B, Lc, 4 * D), c.dtype),
        grid=grid,
        in_specs=[
            pl.BlockSpec((nb, Lc, D), lambda b: (b, 0, 0)),
            pl.BlockSpec((nb, Lq, D), lambda b: (b, 0, 0)),
            # constant index map -> the weight tile is not re-DMA'd per step
            pl.BlockSpec((8, D), lambda b: (0, 0)),
            pl.BlockSpec(memory_space=pltpu.MemorySpace.SMEM),
        ],
        out_specs=pl.BlockSpec((nb, Lc, 4 * D), lambda b: (b, 0, 0)),
        compiler_params=pltpu.CompilerParams(
            dimension_semantics=("parallel",),
            vmem_limit_bytes=32 * 1024 * 1024),
    )(c, q, w_pack, b_pack)


def bidaf_ref(c, q, wc, bc, wq, bq, wcq, bcq):
    """Pure-JAX reference mirroring the PyTorch forward exactly."""
    hp = dict(precision=lax.Precision.HIGHEST)
    sc = jnp.einsum('bld,d->bl', c, wc[0], **hp) + bc[0]           # (B, Lc)
    sq = jnp.einsum('bid,d->bi', q, wq[0], **hp) + bq[0]           # (B, Lq)
    cq = jnp.einsum('bld,bid->bli', c * wcq[0], q, **hp) + bcq[0]  # (B, Lc, Lq)
    s = sc[:, :, None] + sq[:, None, :] + cq
    a = jax.nn.softmax(s, axis=2)
    c2q = jnp.einsum('bli,bid->bld', a, q, **hp)
    bw = jax.nn.softmax(jnp.max(s, axis=2), axis=1)                # (B, Lc)
    q2c = jnp.einsum('bl,bld->bd', bw, c, **hp)[:, None, :]        # (B, 1, D)
    return jnp.concatenate([c, c2q, c * c2q, c * q2c], axis=2)


if __name__ == "__main__":
    # Small, deterministic shapes. hidden_size equals the feature dim of c/q
    # (the module applies Linear(hidden_size, 1) directly to them).
    B, Lc, Lq, D = 8, 16, 8, 128

    key = jax.random.PRNGKey(0)
    kc, kq, k0, k1, k2, k3, k4, k5 = jax.random.split(key, 8)

    c = jax.random.normal(kc, (B, Lc, D), jnp.float32)
    q = jax.random.normal(kq, (B, Lq, D), jnp.float32)

    # PyTorch Linear(D,1): weight (1, D), bias (1,)
    wc = jax.random.normal(k0, (1, D), jnp.float32) * 0.05
    bc = jax.random.normal(k1, (1,), jnp.float32) * 0.05
    wq = jax.random.normal(k2, (1, D), jnp.float32) * 0.05
    bq = jax.random.normal(k3, (1,), jnp.float32) * 0.05
    wcq = jax.random.normal(k4, (1, D), jnp.float32) * 0.05
    bcq = jax.random.normal(k5, (1,), jnp.float32) * 0.05

    out = bidaf_attn(c, q, wc, bc, wq, bq, wcq, bcq)
    out = jax.block_until_ready(out)

    ref = jax.block_until_ready(bidaf_ref(c, q, wc, bc, wq, bq, wcq, bcq))
    np.testing.assert_allclose(np.asarray(out), np.asarray(ref),
                               rtol=5e-5, atol=5e-5)

    print("KERNEL_OK")
</pallas_src>

<mosaic_0001>
module attributes {stable_mosaic.version = 11 : i64} {
  func.func @bidaf_kernel(%arg0: i32, %arg1: memref<8x16x128xf32, #tpu.memory_space<vmem>>, %arg2: memref<8x8x128xf32, #tpu.memory_space<vmem>>, %arg3: memref<8x128xf32, #tpu.memory_space<vmem>>, %arg4: memref<3xf32, #tpu.memory_space<smem>>, %arg5: memref<8x16x512xf32, #tpu.memory_space<vmem>>) attributes {dimension_semantics = [#tpu.dimension_semantics<parallel>], iteration_bounds = array<i64: 1>, scalar_prefetch = 0 : i64, scratch_operands = 0 : i64, tpu.core_type = #tpu.core_type<tc>, window_params = [{transform_indices = @transform_0, window_bounds = array<i64: 8, 16, 128>}, {transform_indices = @transform_1, window_bounds = array<i64: 8, 8, 128>}, {pipeline_mode = #tpu.pipeline_mode<synchronous>, transform_indices = @transform_2, window_bounds = array<i64: 8, 128>}, {transform_indices = @transform_3, window_bounds = array<i64: 3>}, {transform_indices = @transform_4, window_bounds = array<i64: 8, 16, 512>}]} {
    %c0 = arith.constant 0 : index
    %c0_0 = arith.constant 0 : index
    %c0_1 = arith.constant 0 : index
    %0 = vector.load %arg1[%c0, %c0_0, %c0_1] : memref<8x16x128xf32, #tpu.memory_space<vmem>>, vector<8x16x128xf32>
    %c0_2 = arith.constant 0 : index
    %c0_3 = arith.constant 0 : index
    %c0_4 = arith.constant 0 : index
    %1 = vector.load %arg2[%c0_2, %c0_3, %c0_4] : memref<8x8x128xf32, #tpu.memory_space<vmem>>, vector<8x8x128xf32>
    %c0_5 = arith.constant 0 : index
    %2 = memref.load %arg4[%c0_5] : memref<3xf32, #tpu.memory_space<smem>>
    %c1 = arith.constant 1 : index
    %3 = memref.load %arg4[%c1] : memref<3xf32, #tpu.memory_space<smem>>
    %c2 = arith.constant 2 : index
    %4 = memref.load %arg4[%c2] : memref<3xf32, #tpu.memory_space<smem>>
    %c0_6 = arith.constant 0 : index
    %c0_7 = arith.constant 0 : index
    %5 = vector.load %arg3[%c0_6, %c0_7] : memref<8x128xf32, #tpu.memory_space<vmem>>, vector<8x128xf32>
    %6 = vector.shape_cast %5 : vector<8x128xf32> to vector<1x8x128xf32>
    %7 = vector.broadcast %6 : vector<1x8x128xf32> to vector<8x8x128xf32>
    "tpu.trace_start"() <{level = 10 : i32, message = "bld,bkd->blk"}> : () -> ()
    %cst = arith.constant dense<0.000000e+00> : vector<8x16x8xf32>
    %8 = tpu.matmul %0, %7, %cst {dimension_numbers = #tpu.dot_dimension_numbers<[2], [2], [1], [1], [0, 0, 0, 1, 1, 1], [0], [0]>, precision = #tpu.contract_precision<fp32>} : vector<8x16x128xf32>, vector<8x8x128xf32>, vector<8x16x8xf32> -> vector<8x16x8xf32>
    "tpu.trace_stop"() : () -> ()
    "tpu.trace_start"() <{level = 10 : i32, message = "bid,bkd->bik"}> : () -> ()
    %cst_8 = arith.constant dense<0.000000e+00> : vector<8x8x8xf32>
    %9 = tpu.matmul %1, %7, %cst_8 {dimension_numbers = #tpu.dot_dimension_numbers<[2], [2], [1], [1], [0, 0, 0, 1, 1, 1], [0], [0]>, precision = #tpu.contract_precision<fp32>} : vector<8x8x128xf32>, vector<8x8x128xf32>, vector<8x8x8xf32> -> vector<8x8x8xf32>
    "tpu.trace_stop"() : () -> ()
    %10 = vector.extract_strided_slice %8 {offsets = [0, 0, 0], sizes = [8, 16, 1], strides = [1, 1, 1]} : vector<8x16x8xf32> to vector<8x16x1xf32>
    %11 = vector.broadcast %2 : f32 to vector<8x16x1xf32>
    %12 = arith.addf %10, %11 : vector<8x16x1xf32>
    %13 = vector.extract_strided_slice %9 {offsets = [0, 0, 1], sizes = [8, 8, 1], strides = [1, 1, 1]} : vector<8x8x8xf32> to vector<8x8x1xf32>
    %14 = vector.broadcast %3 : f32 to vector<8x8x1xf32>
    %15 = arith.addf %13, %14 : vector<8x8x1xf32>
    %c2_9 = arith.constant 2 : index
    %c0_10 = arith.constant 0 : index
    %16 = vector.load %arg3[%c2_9, %c0_10] : memref<8x128xf32, #tpu.memory_space<vmem>>, vector<1x128xf32>
    %17 = vector.shape_cast %16 : vector<1x128xf32> to vector<1x1x128xf32>
    %18 = vector.broadcast %17 : vector<1x1x128xf32> to vector<8x8x128xf32>
    %19 = arith.mulf %1, %18 : vector<8x8x128xf32>
    "tpu.trace_start"() <{level = 10 : i32, message = "bld,bid->bli"}> : () -> ()
    %cst_11 = arith.constant dense<0.000000e+00> : vector<8x16x8xf32>
    %20 = tpu.matmul %0, %19, %cst_11 {dimension_numbers = #tpu.dot_dimension_numbers<[2], [2], [1], [1], [0, 0, 0, 1, 1, 1], [0], [0]>, precision = #tpu.contract_precision<fp32>} : vector<8x16x128xf32>, vector<8x8x128xf32>, vector<8x16x8xf32> -> vector<8x16x8xf32>
    "tpu.trace_stop"() : () -> ()
    %21 = vector.broadcast %4 : f32 to vector<8x16x8xf32>
    %22 = arith.addf %20, %21 : vector<8x16x8xf32>
    %23 = tpu.transpose %15, [0, 2, 1] : vector<8x8x1xf32> -> vector<8x1x8xf32>
    %24 = vector.broadcast %12 : vector<8x16x1xf32> to vector<8x16x8xf32>
    %25 = vector.broadcast %23 : vector<8x1x8xf32> to vector<8x16x8xf32>
    %26 = arith.addf %24, %25 : vector<8x16x8xf32>
    %27 = arith.addf %26, %22 : vector<8x16x8xf32>
    %cst_12 = arith.constant dense<0xFF800000> : vector<8x16xf32>
    %28 = vector.multi_reduction <maximumf>, %27, %cst_12 [2] : vector<8x16x8xf32> to vector<8x16xf32>
    %29 = vector.shape_cast %28 : vector<8x16xf32> to vector<8x16x1xf32>
    %30 = vector.broadcast %29 : vector<8x16x1xf32> to vector<8x16x8xf32>
    %31 = arith.subf %27, %30 : vector<8x16x8xf32>
    %32 = math.exp %31 : vector<8x16x8xf32>
    %cst_13 = arith.constant dense<0.000000e+00> : vector<8x16xf32>
    %33 = vector.multi_reduction <add>, %32, %cst_13 [2] : vector<8x16x8xf32> to vector<8x16xf32>
    %34 = vector.shape_cast %33 : vector<8x16xf32> to vector<8x16x1xf32>
    "tpu.trace_start"() <{level = 10 : i32, message = "bli,bid->bld"}> : () -> ()
    %cst_14 = arith.constant dense<0.000000e+00> : vector<8x16x128xf32>
    %35 = tpu.matmul %32, %1, %cst_14 {dimension_numbers = #tpu.dot_dimension_numbers<[2], [1], [1], [2], [0, 0, 0, 1, 1, 2], [0], [0]>, precision = #tpu.contract_precision<fp32>} : vector<8x16x8xf32>, vector<8x8x128xf32>, vector<8x16x128xf32> -> vector<8x16x128xf32>
    "tpu.trace_stop"() : () -> ()
    %36 = tpu.reciprocal %34 {approx = true} : vector<8x16x1xf32> -> vector<8x16x1xf32>
    %37 = arith.mulf %34, %36 : vector<8x16x1xf32>
    %cst_15 = arith.constant 2.000000e+00 : f32
    %38 = vector.broadcast %cst_15 : f32 to vector<8x16x1xf32>
    %39 = arith.subf %38, %37 : vector<8x16x1xf32>
    %40 = arith.mulf %36, %39 : vector<8x16x1xf32>
    %41 = vector.broadcast %40 : vector<8x16x1xf32> to vector<8x16x128xf32>
    %42 = arith.mulf %35, %41 : vector<8x16x128xf32>
    %cst_16 = arith.constant dense<0xFF800000> : vector<8x1xf32>
    %43 = vector.multi_reduction <maximumf>, %29, %cst_16 [1] : vector<8x16x1xf32> to vector<8x1xf32>
    %44 = vector.shape_cast %43 : vector<8x1xf32> to vector<8x1x1xf32>
    %45 = vector.broadcast %44 : vector<8x1x1xf32> to vector<8x16x1xf32>
    %46 = arith.subf %29, %45 : vector<8x16x1xf32>
    %47 = math.exp %46 : vector<8x16x1xf32>
    %cst_17 = arith.constant dense<0.000000e+00> : vector<8x1xf32>
    %48 = vector.multi_reduction <add>, %47, %cst_17 [1] : vector<8x16x1xf32> to vector<8x1xf32>
    %49 = vector.shape_cast %48 : vector<8x1xf32> to vector<8x1x1xf32>
    %50 = tpu.transpose %47, [0, 2, 1] : vector<8x16x1xf32> -> vector<8x1x16xf32>
    "tpu.trace_start"() <{level = 10 : i32, message = "bol,bld->bod"}> : () -> ()
    %cst_18 = arith.constant dense<0.000000e+00> : vector<8x1x128xf32>
    %51 = tpu.matmul %50, %0, %cst_18 {dimension_numbers = #tpu.dot_dimension_numbers<[2], [1], [1], [2], [0, 0, 0, 1, 1, 2], [0], [0]>, precision = #tpu.contract_precision<fp32>} : vector<8x1x16xf32>, vector<8x16x128xf32>, vector<8x1x128xf32> -> vector<8x1x128xf32>
    "tpu.trace_stop"() : () -> ()
    %52 = tpu.reciprocal %49 {approx = true} : vector<8x1x1xf32> -> vector<8x1x1xf32>
    %53 = arith.mulf %49, %52 : vector<8x1x1xf32>
    %cst_19 = arith.constant 2.000000e+00 : f32
    %54 = vector.broadcast %cst_19 : f32 to vector<8x1x1xf32>
    %55 = arith.subf %54, %53 : vector<8x1x1xf32>
    %56 = arith.mulf %52, %55 : vector<8x1x1xf32>
    %57 = vector.broadcast %56 : vector<8x1x1xf32> to vector<8x1x128xf32>
    %58 = arith.mulf %51, %57 : vector<8x1x128xf32>
    %c0_20 = arith.constant 0 : index
    %c0_21 = arith.constant 0 : index
    %c0_22 = arith.constant 0 : index
    %59 = vector.load %arg5[%c0_20, %c0_21, %c0_22] : memref<8x16x512xf32, #tpu.memory_space<vmem>>, vector<8x16x128xf32>
    tpu.vector_store %arg5[%c0_20, %c0_21, %c0_22], %0 {strides = array<i32>} : memref<8x16x512xf32, #tpu.memory_space<vmem>>, vector<8x16x128xf32>,
    %c0_23 = arith.constant 0 : index
    %c0_24 = arith.constant 0 : index
    %c128 = arith.constant 128 : index
    %60 = vector.load %arg5[%c0_23, %c0_24, %c128] : memref<8x16x512xf32, #tpu.memory_space<vmem>>, vector<8x16x128xf32>
    tpu.vector_store %arg5[%c0_23, %c0_24, %c128], %42 {strides = array<i32>} : memref<8x16x512xf32, #tpu.memory_space<vmem>>, vector<8x16x128xf32>,
    %61 = arith.mulf %0, %42 : vector<8x16x128xf32>
    %c0_25 = arith.constant 0 : index
    %c0_26 = arith.constant 0 : index
    %c256 = arith.constant 256 : index
    %62 = vector.load %arg5[%c0_25, %c0_26, %c256] : memref<8x16x512xf32, #tpu.memory_space<vmem>>, vector<8x16x128xf32>
    tpu.vector_store %arg5[%c0_25, %c0_26, %c256], %61 {strides = array<i32>} : memref<8x16x512xf32, #tpu.memory_space<vmem>>, vector<8x16x128xf32>,
    %63 = vector.broadcast %58 : vector<8x1x128xf32> to vector<8x16x128xf32>
    %64 = arith.mulf %0, %63 : vector<8x16x128xf32>
    %c0_27 = arith.constant 0 : index
    %c0_28 = arith.constant 0 : index
    %c384 = arith.constant 384 : index
    %65 = vector.load %arg5[%c0_27, %c0_28, %c384] : memref<8x16x512xf32, #tpu.memory_space<vmem>>, vector<8x16x128xf32>
    tpu.vector_store %arg5[%c0_27, %c0_28, %c384], %64 {strides = array<i32>} : memref<8x16x512xf32, #tpu.memory_space<vmem>>, vector<8x16x128xf32>,
    return
  }
  func.func @transform_0(%arg0: i32) -> (i32, i32, i32) {
    %c0_i32 = arith.constant 0 : i32
    %c0_i32_0 = arith.constant 0 : i32
    %c0_i32_1 = arith.constant 0 : i32
    return %arg0, %c0_i32, %c0_i32_0 : i32, i32, i32
  }
  func.func @transform_1(%arg0: i32) -> (i32, i32, i32) {
    %c0_i32 = arith.constant 0 : i32
    %c0_i32_0 = arith.constant 0 : i32
    %c0_i32_1 = arith.constant 0 : i32
    return %arg0, %c0_i32, %c0_i32_0 : i32, i32, i32
  }
  func.func @transform_2(%arg0: i32) -> (i32, i32) {
    %c0_i32 = arith.constant 0 : i32
    %c0_i32_0 = arith.constant 0 : i32
    %c0_i32_1 = arith.constant 0 : i32
    return %c0_i32, %c0_i32_0 : i32, i32
  }
  func.func @transform_3(%arg0: i32) -> i32 {
    %c0_i32 = arith.constant 0 : i32
    %c0_i32_0 = arith.constant 0 : i32
    return %c0_i32 : i32
  }
  func.func @transform_4(%arg0: i32) -> (i32, i32, i32) {
    %c0_i32 = arith.constant 0 : i32
    %c0_i32_0 = arith.constant 0 : i32
    %c0_i32_1 = arith.constant 0 : i32
    return %arg0, %c0_i32, %c0_i32_0 : i32, i32, i32
  }
}

</mosaic_0001>

<bundles_post_ra>
// kernel: tpu_custom_call.1
= control target key start
LH: loop header
LB: loop body
LE: loop exit
PB: predicated region body
PF: predicated region fallthrough
CT: control target
= control target key end

     0   :  { %9 = vsyncpa [#allocation3], 0  ;;  %s9931_s0 = inlined_call_operand.hbm [shape: f32[8,16,128], index: 0, kind: input, shape index: {}]   ;;  %s9932_s1 = inlined_call_operand.hbm [shape: f32[8,8,128], index: 1, kind: input, shape index: {}]   ;;  %s9933_s2 = inlined_call_operand.hbm [shape: f32[8,128], index: 2, kind: input, shape index: {}]   ;;  %s9934_s3 = inlined_call_operand.vmem [shape: f32[3], index: 3, kind: input, shape index: {}]   ;;  %s9935_s4 = inlined_call_operand.hbm [shape: f32[8,16,512], index: 4, kind: output, shape index: {}]  }
   0x1   :  { %10 = vsyncpa [#allocation7], 0 }
   0x2   :  { %11 = vsyncpa [#allocation5], 0 }
   0x3   :  { %12 = vsyncpa [#allocation4], 0  ;;  %s30_s17 = sshll.u32 %s9932_s1, 4  ;;  %s8389_s18 = smov [#allocation6]   ;;  %s31_s17 = int_to_ptr.hbm [resolvable:$true] %s30_s17 }
   0x4   :  { %s32_s19 = sshll.u32 %s8389_s18, 4  ;;  %s17_s22 = sshll.u32 %s9931_s0, 4  ;;  %s33_s19 = int_to_ptr.vmem [resolvable:$true] %s32_s19  ;;  %s18_s22 = int_to_ptr.hbm [resolvable:$true] %s17_s22 }
   0x5   :  { %s8390_s23 = smov 128   ;;  %s8391_s24 = smov 8  }
   0x6   :  { %38 = dma.hbm_to_vmem [thread:$0]  %s31_s17, 1024, %s33_s19, [#allocation7], %s8390_s23, %s8390_s23, %s8391_s24  }
   0x7   :  { %s8392_s25 = smov [#allocation2]   ;;  %s44_s29 = sshll.u32 %s9933_s2, 4  ;;  %s45_s29 = int_to_ptr.hbm [resolvable:$true] %s44_s29 }
   0x8   :  { %s19_s26 = sshll.u32 %s8392_s25, 4  ;;  %s55_s5 = sshll.u32 %s9934_s3, 4  ;;  %s20_s26 = int_to_ptr.vmem [resolvable:$true] %s19_s26  ;;  %s56_s5 = int_to_ptr.vmem [resolvable:$true] %s55_s5 }
   0x9   :  { %25 = dma.hbm_to_vmem [thread:$0]  %s18_s22, 2048, %s20_s26, [#allocation3], %s8390_s23, %s8390_s23, %s8391_s24  }
   0xa   :  { %s8393_s6 = smov [#allocation8]   ;;  %s8394_s0 = smov [#allocation9]  }
   0xb   :  { %s46_s7 = sshll.u32 %s8393_s6, 4  ;;  %s47_s7 = int_to_ptr.vmem [resolvable:$true] %s46_s7 }
   0xc   :  { %49 = dma.hbm_to_vmem [thread:$0]  %s45_s29, 128, %s47_s7, [#allocation7]  }
   0xd   :  { %58 = dma.vmem_to_smem %s56_s5, 16, %s8394_s0, [#allocation5]  }
   0xe   :  { %8381 = dma.done.wait [#allocation3], 2048  }
   0xf   :  { %8382 = vsyncadd [#allocation3], 4294965248 }
  0x10   :  { %8383 = dma.done.wait [#allocation7], 1152  }
  0x11   :  { %8384 = vsyncadd [#allocation7], 4294966144 }
  0x12   :  { %8385 = dma.done.wait [#allocation5], 16  }
  0x13   :  { %8386 = vsyncadd [#allocation5], 4294967280 }
  0x14   :  { %75 = sfence }
  0x15   :  { %v103_v0 = vld [vmem:[#allocation8] sm:$0xff]  ;;  %v77_v2 = vld [vmem:[#allocation2 + $0x8] sm:$0xff]  ;;  %v78_v6 = vld [vmem:[#allocation2 + $0x10] sm:$0xff]  ;;  %s100_s2 = sld [smem:[#allocation9]]  ;;  %s8396_s8 = smov 127   ;;  %vm4549_vm0 = vcmask 64512  }
  0x16   :  { %v76_v1 = vld [vmem:[#allocation2] sm:$0xff]  ;;  %v8437_v3 = vand.u32 4294901760, %v103_v0  ;;  %v8441_v5 = vand.u32 4294901760, %v77_v2  ;;  %7992 = vst [vmem:[#allocation10 + $0x20] sm:$0xff] %v77_v2  ;;  %v79_v10 = vld [vmem:[#allocation2 + $0x18] sm:$0xff]  ;;  %v8454_v11 = vand.u32 4294901760, %v78_v6 }
  0x17   :  { %v8439_v4 = vand.u32 4294901760, %v76_v1  ;;  %7991 = vst [vmem:[#allocation10] sm:$0xff] %v76_v1  ;;  %v8491_v22 = vand.u32 4294901760, %v79_v10  ;;  %v80_v26 = vld [vmem:[#allocation2 + $0x20] sm:$0xff]  ;;  %v81_v30 = vld [vmem:[#allocation2 + $0x28] sm:$0xff]  ;;  %v82_v32 = vld [vmem:[#allocation2 + $0x30] sm:$0xff] }
  0x18   :  { %10093 = vst [vmem:[#allocation16_spill] sm:$0xff] %v8441_v5  ;;  %v8444_v7 = vsub.f32 %v103_v0, %v8437_v3  ;;  %213 = vmatpush.xpose.msra.mxu3 %v8437_v3  ;;  %120 = vmatpush.xpose.msra.mxu0 %v8437_v3  ;;  %v8452_v9 = vsub.f32 %v77_v2, %v8441_v5  ;;  %v8530_v33 = vand.u32 4294901760, %v80_v26  ;;  %v83_v34 = vld [vmem:[#allocation2 + $0x38] sm:$0xff]  ;;  %v8546_v37 = vand.u32 4294901760, %v81_v30  ;;  %v84_v50 = vld [vmem:[#allocation2 + $0x40] sm:$0xff]  ;;  %v85_v54 = vld [vmem:[#allocation2 + $0x48] sm:$0xff] }
  0x19   :  { %10092 = vst [vmem:[#allocation15_spill] sm:$0xff] %v8439_v4  ;;  %v8449_v8 = vsub.f32 %v76_v1, %v8439_v4  ;;  %v8475_v17 = vsub.f32 %v78_v6, %v8454_v11  ;;  %v8504_v25 = vsub.f32 %v79_v10, %v8491_v22  ;;  %v8555_v40 = vand.u32 4294901760, %v82_v32  ;;  %v86_v56 = vld [vmem:[#allocation2 + $0x50] sm:$0xff]  ;;  %v87_v58 = vld [vmem:[#allocation2 + $0x58] sm:$0xff]  ;;  %s8116_s3 = sld [smem:[#allocation9 + $0x1]]  ;;  %s8397_s10 = smov [#allocation10]  }
  0x1a   :  { %10095 = vst [vmem:[#allocation18_spill] sm:$0xff] %v8452_v9  ;;  %185 = vmatpush.xpose.msra.mxu2 %v8444_v7  ;;  %v8461_v13 = vand.u32 4294901760, %v8444_v7  ;;  %v8471_v16 = vand.u32 4294901760, %v8452_v9  ;;  %v8537_v35 = vsub.f32 %v80_v26, %v8530_v33  ;;  %v8553_v39 = vsub.f32 %v81_v30, %v8546_v37  ;;  %s8117_s9 = sld [smem:[#allocation9 + $0x2]]  ;;  %s8099_s11 = sshll.u32 %s8397_s10, 4  ;;  %s8100_s11 = int_to_ptr.vmem [resolvable:$true] %s8099_s11 }
  0x1b   :  { %10094 = vst [vmem:[#allocation17_spill] sm:$0xff] %v8449_v8  ;;  %v8458_v12 = vand.u32 4294901760, %v8449_v8  ;;  %v8489_v21 = vand.u32 4294901760, %v8475_v17  ;;  %v8510_v28 = vand.u32 4294901760, %v8504_v25  ;;  %v8566_v43 = vsub.f32 %v82_v32, %v8555_v40  ;;  %s8101_s14 = sshll.u32 %s9935_s4, 4  ;;  %s8398_s15 = smov 512   ;;  %s8102_s14 = int_to_ptr.hbm [resolvable:$true] %s8101_s14 }
  0x1c   :  { %7993 = vst [vmem:[#allocation10 + $0x40] sm:$0xff] %v78_v6  ;;  %v156_v15 = vsub.f32 %v8444_v7, %v8461_v13  ;;  %245 = vmatpush.xpose.msrb.mxu0 %v8461_v13  ;;  %v132_v20 = vsub.f32 %v8452_v9, %v8471_v16  ;;  %v8543_v36 = vand.u32 4294901760, %v8537_v35  ;;  %v8562_v42 = vand.u32 4294901760, %v8553_v39  ;;  %s8399_s16 = smov 32  }
  0x1d   :  { %10096 = vst [vmem:[#allocation19_spill] sm:$0xff] %v8454_v11  ;;  %217 = vmatmul.f32.vlgmr.msra.gmra.mxu3 %v8458_v12  ;;  %v124_v14 = vsub.f32 %v8449_v8, %v8458_v12  ;;  %188 = vmatmul.f32.vlgmr.msra.gmra.mxu2 %v8449_v8  ;;  %v301_v24 = vsub.f32 %v8475_v17, %v8489_v21  ;;  %v8574_v45 = vand.u32 4294901760, %v8566_v43  ;;  %v8577_v46 = vand.u32 4294901760, %v83_v34 }
  0x1e   :  { %7994 = vst [vmem:[#allocation10 + $0x60] sm:$0xff] %v79_v10  ;;  %297 = vmatpush.xpose.msrb.mxu2 %v8437_v3  ;;  %v8479_v19 = vand.u32 4294901760, %v156_v15  ;;  %v8497_v23 = vand.u32 4294901760, %v132_v20  ;;  %v309_v29 = vsub.f32 %v8504_v25, %v8510_v28  ;;  %v478_v38 = vsub.f32 %v8537_v35, %v8543_v36 }
  0x1f   :  { %10097 = vst [vmem:[#allocation20_spill] sm:$0xff] %v8458_v12  ;;  %v8477_v18 = vand.u32 4294901760, %v124_v14  ;;  %v8507_v27 = vand.u32 4294901760, %v301_v24  ;;  %v486_v44 = vsub.f32 %v8553_v39, %v8562_v42  ;;  %v655_v48 = vsub.f32 %v8566_v43, %v8574_v45 }
  0x20   :  { %10098 = vst [vmem:[#allocation21_spill] sm:$0xff] %v8471_v16  ;;  %158 = vmatpush.xpose.msra.mxu1 %v8479_v19  ;;  %335 = vmatpush.xpose.msrb.mxu3 %v8479_v19  ;;  %v8520_v31 = vand.u32 4294901760, %v309_v29  ;;  %v8559_v41 = vand.u32 4294901760, %v478_v38  ;;  %v8588_v49 = vsub.f32 %v83_v34, %v8577_v46  ;;  %v8614_v57 = vand.u32 4294901760, %v84_v50  ;;  %v88_v29 = vld [vmem:[#allocation2 + $0x60] sm:$0xff]  ;;  %v89_v38 = vld [vmem:[#allocation2 + $0x68] sm:$0xff] }
  0x21   :  { %10099 = vst [vmem:[#allocation22_spill] sm:$0xff] %v8475_v17  ;;  %126 = vmatmul.f32.vlgmr.msra.gmra.mxu0 %v8477_v18  ;;  %v8581_v47 = vand.u32 4294901760, %v486_v44  ;;  %v8591_v51 = vand.u32 4294901760, %v655_v48  ;;  %v8630_v61 = vand.u32 4294901760, %v85_v54  ;;  %v8639_v0 = vand.u32 4294901760, %v86_v56  ;;  %v90_v48 = vld [vmem:[#allocation2 + $0x70] sm:$0xff] }
  0x22   :  { %10100 = vst [vmem:[#allocation23_spill] sm:$0xff] %v8477_v18  ;;  %422 = vmatpush.xpose.msra.mxu2 %v8461_v13  ;;  %362 = vmatpush.xpose.msra.mxu0 %v8444_v7  ;;  %v8594_v52 = vand.u32 4294901760, %v8588_v49  ;;  %v8621_v59 = vsub.f32 %v84_v50, %v8614_v57  ;;  %v8661_v15 = vand.u32 4294901760, %v87_v58  ;;  %vm6654_vm1 = vcmask 130048  }
  0x23   :  { %10101 = vst [vmem:[#allocation24_spill] sm:$0xff] %v8489_v21  ;;  %160 = vmatmul.f32.vlgmr.msra.gmra.mxu1 %v8439_v4  ;;  %v8637_v63 = vsub.f32 %v85_v54, %v8630_v61  ;;  %v8650_v6 = vsub.f32 %v86_v56, %v8639_v0 }
  0x24   :  { %271 = vmatpush.xpose.msrb.mxu1 %v8437_v3  ;;  %10102 = vst [vmem:[#allocation25_spill] sm:$0xff] %v8491_v22  ;;  %448 = vmatpush.xpose.msra.mxu3 %v8437_v3  ;;  %v663_v53 = vsub.f32 %v8588_v49, %v8594_v52  ;;  %v8627_v60 = vand.u32 4294901760, %v8621_v59 }
  0x25   :  { %223 = vmatmul.f32.gmra.mxu3 %v8471_v16  ;;  %193 = vmatmul.f32.gmra.mxu2 %v8452_v9  ;;  %10103 = vst [vmem:[#allocation26_spill] sm:$0xff] %v8504_v25  ;;  %v8646_v2 = vand.u32 4294901760, %v8637_v63  ;;  %v8658_v14 = vand.u32 4294901760, %v8650_v6 }
  0x26   :  { %7995 = vst [vmem:[#allocation10 + $0x80] sm:$0xff] %v80_v26  ;;  %v8604_v55 = vand.u32 4294901760, %v663_v53  ;;  %v832_v62 = vsub.f32 %v8621_v59, %v8627_v60  ;;  %v8672_v26 = vsub.f32 %v87_v58, %v8661_v15  ;;  %v8698_v53 = vand.u32 4294901760, %v88_v29 }
  0x27   :  { %10104 = vst [vmem:[#allocation27_spill] sm:$0xff] %v8507_v27  ;;  %v840_v10 = vsub.f32 %v8637_v63, %v8646_v2  ;;  %v1009_v24 = vsub.f32 %v8650_v6, %v8658_v14 }
  0x28   :  { %390 = vmatpush.xpose.msra.mxu1 %v8437_v3  ;;  %10105 = vst [vmem:[#allocation28_spill] sm:$0xff] %v8510_v28  ;;  %v8643_v1 = vand.u32 4294901760, %v832_v62 }
  0x29   :  { %134 = vmatmul.f32.gmra.mxu0 %v8497_v23  ;;  %7996 = vst [vmem:[#allocation10 + $0xa0] sm:$0xff] %v81_v30  ;;  %v8665_v20 = vand.u32 4294901760, %v840_v10  ;;  %v8675_v30 = vand.u32 4294901760, %v1009_v24  ;;  %v8705_v24 = vsub.f32 %v88_v29, %v8698_v53 }
  0x2a   :  { %10106 = vst [vmem:[#allocation29_spill] sm:$0xff] %v8520_v31 }
  0x2b   :  { %164 = vmatmul.f32.gmra.mxu1 %v8441_v5  ;;  %7997 = vst [vmem:[#allocation10 + $0xc0] sm:$0xff] %v82_v32  ;;  %v8678_v32 = vand.u32 4294901760, %v8672_v26 }
  0x2c   :  { %10107 = vst [vmem:[#allocation30_spill] sm:$0xff] %v8530_v33 }
  0x2d   :  { %337 = vmatmul.f32.vlgmr.msrb.gmra.mxu3 %v8454_v11  ;;  %303 = vmatmul.f32.vlgmr.msrb.gmra.mxu2 %v8507_v27  ;;  %7998 = vst [vmem:[#allocation10 + $0xe0] sm:$0xff] %v83_v34  ;;  %v1017_v34 = vsub.f32 %v8672_v26, %v8678_v32 }
  0x2e   :  { %567 = vmatpush.xpose.msrb.mxu3 %v8437_v3  ;;  %539 = vmatpush.xpose.msrb.mxu2 %v8444_v7  ;;  %10108 = vst [vmem:[#allocation31_spill] sm:$0xff] %v8537_v35 }
  0x2f   :  { %10109 = vst [vmem:[#allocation32_spill] sm:$0xff] %v8543_v36  ;;  %v8688_v44 = vand.u32 4294901760, %v1017_v34 }
  0x30   :  { %10110 = vst [vmem:[#allocation33_spill] sm:$0xff] %v8546_v37 }
  0x31   :  { %247 = vmatmul.f32.vlgmr.msrb.gmra.mxu0 %v8439_v4  ;;  %10111 = vst [vmem:[#allocation34_spill] sm:$0xff] %v8553_v39 }
  0x32   :  { %474 = vmatpush.xpose.msrb.mxu0 %v8437_v3  ;;  %10112 = vst [vmem:[#allocation35_spill] sm:$0xff] %v8555_v40 }
  0x33   :  { %273 = vmatmul.f32.vlgmr.msrb.gmra.mxu1 %v8439_v4  ;;  %10113 = vst [vmem:[#allocation36_spill] sm:$0xff] %v8559_v41 }
  0x34   :  { %512 = vmatpush.xpose.msrb.mxu1 %v8479_v19  ;;  %10114 = vst [vmem:[#allocation37_spill] sm:$0xff] %v8562_v42 }
  0x35   :  { %341 = vmatmul.f32.gmra.mxu3 %v8491_v22  ;;  %311 = vmatmul.f32.gmra.mxu2 %v8520_v31  ;;  %10115 = vst [vmem:[#allocation38_spill] sm:$0xff] %v8566_v43 }
  0x36   :  { %10116 = vst [vmem:[#allocation39_spill] sm:$0xff] %v8574_v45 }
  0x37   :  { %10117 = vst [vmem:[#allocation40_spill] sm:$0xff] %v8577_v46 }
  0x38   :  { %10118 = vst [vmem:[#allocation41_spill] sm:$0xff] %v8581_v47 }
  0x39   :  { %251 = vmatmul.f32.gmra.mxu0 %v8441_v5  ;;  %10119 = vst [vmem:[#allocation42_spill] sm:$0xff] %v8588_v49 }
  0x3a   :  { %7999 = vst [vmem:[#allocation10 + $0x100] sm:$0xff] %v84_v50  ;;  %v8395_v50 = vmov 0  }
  0x3b   :  { %277 = vmatmul.f32.gmra.mxu1 %v8441_v5  ;;  %10120 = vst [vmem:[#allocation43_spill] sm:$0xff] %v8591_v51  ;;  %8130 = vset.pattern.permute.xlu1 %v8395_v50 }
  0x3c   :  { %10121 = vst [vmem:[#allocation44_spill] sm:$0xff] %v8594_v52  ;;  %8131 = vset.pattern.permute.xlu2 %v8395_v50  ;;  %8132 = vset.pattern.permute.xlu0 %v8395_v50  ;;  %v8711_v50 = vand.u32 4294901760, %v8705_v24 }
  0x3d   :  { %450 = vmatmul.f32.vlgmr.msra.gmra.mxu3 %v8454_v11  ;;  %424 = vmatmul.f32.vlgmr.msra.gmra.mxu2 %v8454_v11  ;;  %8000 = vst [vmem:[#allocation10 + $0x120] sm:$0xff] %v85_v54  ;;  %v91_v54 = vld [vmem:[#allocation2 + $0x78] sm:$0xff] }
  0x3e   :  { %689 = vmatpush.xpose.msra.mxu3 %v8479_v19  ;;  %651 = vmatpush.xpose.msra.mxu2 %v8437_v3  ;;  %10122 = vst [vmem:[#allocation45_spill] sm:$0xff] %v8604_v55 }
  0x3f   :  { %8001 = vst [vmem:[#allocation10 + $0x140] sm:$0xff] %v86_v56 }
  0x40   :  { %10123 = vst [vmem:[#allocation46_spill] sm:$0xff] %v8614_v57 }
  0x41   :  { %365 = vmatmul.f32.vlgmr.msra.gmra.mxu0 %v8475_v17  ;;  %8002 = vst [vmem:[#allocation10 + $0x160] sm:$0xff] %v87_v58 }
  0x42   :  { %599 = vmatpush.xpose.msra.mxu0 %v8461_v13  ;;  %10124 = vst [vmem:[#allocation47_spill] sm:$0xff] %v8621_v59 }
  0x43   :  { %394 = vmatmul.f32.vlgmr.msra.gmra.mxu1 %v8489_v21  ;;  %10125 = vst [vmem:[#allocation48_spill] sm:$0xff] %v8627_v60 }
  0x44   :  { %625 = vmatpush.xpose.msra.mxu1 %v8437_v3  ;;  %10126 = vst [vmem:[#allocation49_spill] sm:$0xff] %v8630_v61 }
  0x45   :  { %454 = vmatmul.f32.gmra.mxu3 %v8491_v22  ;;  %428 = vmatmul.f32.gmra.mxu2 %v8491_v22  ;;  %10127 = vst [vmem:[#allocation50_spill] sm:$0xff] %v8637_v63 }
  0x46   :  { %10128 = vst [vmem:[#allocation51_spill] sm:$0xff] %v8639_v0 }
  0x47   :  { %10129 = vst [vmem:[#allocation52_spill] sm:$0xff] %v8643_v1 }
  0x48   :  { %10130 = vst [vmem:[#allocation53_spill] sm:$0xff] %v8646_v2 }
  0x49   :  { %370 = vmatmul.f32.gmra.mxu0 %v8504_v25  ;;  %10131 = vst [vmem:[#allocation54_spill] sm:$0xff] %v8650_v6 }
  0x4a   :  { %10132 = vst [vmem:[#allocation55_spill] sm:$0xff] %v8658_v14 }
  0x4b   :  { %400 = vmatmul.f32.gmra.mxu1 %v8510_v28  ;;  %10133 = vst [vmem:[#allocation56_spill] sm:$0xff] %v8661_v15 }
  0x4c   :  { %10134 = vst [vmem:[#allocation57_spill] sm:$0xff] %v8665_v20 }
  0x4d   :  { %571 = vmatmul.f32.vlgmr.msrb.gmra.mxu3 %v8543_v36  ;;  %542 = vmatmul.f32.vlgmr.msrb.gmra.mxu2 %v8537_v35  ;;  %10135 = vst [vmem:[#allocation58_spill] sm:$0xff] %v8672_v26 }
  0x4e   :  { %802 = vmatpush.xpose.msrb.mxu3 %v8437_v3  ;;  %776 = vmatpush.xpose.msrb.mxu2 %v8461_v13  ;;  %8003 = vst [vmem:[#allocation10 + $0x180] sm:$0xff] %v88_v29 }
  0x4f   :  { %10136 = vst [vmem:[#allocation59_spill] sm:$0xff] %v8675_v30 }
  0x50   :  { %10137 = vst [vmem:[#allocation60_spill] sm:$0xff] %v8678_v32 }
  0x51   :  { %480 = vmatmul.f32.vlgmr.msrb.gmra.mxu0 %v8559_v41  ;;  %8004 = vst [vmem:[#allocation10 + $0x1a0] sm:$0xff] %v89_v38 }
  0x52   :  { %716 = vmatpush.xpose.msrb.mxu0 %v8444_v7  ;;  %10138 = vst [vmem:[#allocation61_spill] sm:$0xff] %v8688_v44 }
  0x53   :  { %514 = vmatmul.f32.vlgmr.msrb.gmra.mxu1 %v8530_v33  ;;  %8005 = vst [vmem:[#allocation10 + $0x1c0] sm:$0xff] %v90_v48 }
  0x54   :  { %744 = vmatpush.xpose.msrb.mxu1 %v8437_v3  ;;  %10139 = vst [vmem:[#allocation62_spill] sm:$0xff] %v8698_v53 }
  0x55   :  { %577 = vmatmul.f32.gmra.mxu3 %v8562_v42  ;;  %547 = vmatmul.f32.gmra.mxu2 %v8553_v39  ;;  %8006 = vst [vmem:[#allocation10 + $0x1e0] sm:$0xff] %v91_v54 }
  0x56   :  { %10140 = vst [vmem:[#allocation63_spill] sm:$0xff] %v8705_v24 }
  0x57   :  { %10141 = vst [vmem:[#allocation64_spill] sm:$0xff] %v8711_v50 }
  0x59   :  { %488 = vmatmul.f32.gmra.mxu0 %v8581_v47 }
  0x5b   :  { %518 = vmatmul.f32.gmra.mxu1 %v8546_v37 }
  0x5d   :  { %691 = vmatmul.f32.vlgmr.msra.gmra.mxu3 %v8555_v40  ;;  %657 = vmatmul.f32.vlgmr.msra.gmra.mxu2 %v8591_v51 }
  0x5e   :  { %921 = vmatpush.xpose.msra.mxu3 %v8437_v3  ;;  %893 = vmatpush.xpose.msra.mxu2 %v8444_v7 }
  0x61   :  { %601 = vmatmul.f32.vlgmr.msra.gmra.mxu0 %v8530_v33 }
  0x62   :  { %828 = vmatpush.xpose.msra.mxu0 %v8437_v3 }
  0x63   :  { %627 = vmatmul.f32.vlgmr.msra.gmra.mxu1 %v8530_v33 }
  0x64   :  { %866 = vmatpush.xpose.msra.mxu1 %v8479_v19 }
  0x65   :  { %695 = vmatmul.f32.gmra.mxu3 %v8577_v46  ;;  %665 = vmatmul.f32.gmra.mxu2 %v8604_v55 }
  0x69   :  { %605 = vmatmul.f32.gmra.mxu0 %v8546_v37 }
  0x6b   :  { %631 = vmatmul.f32.gmra.mxu1 %v8546_v37 }
  0x6d   :  { %804 = vmatmul.f32.vlgmr.msrb.gmra.mxu3 %v8555_v40  ;;  %778 = vmatmul.f32.vlgmr.msrb.gmra.mxu2 %v8555_v40 }
  0x6e   :  { %1043 = vmatpush.xpose.msrb.mxu3 %v8479_v19  ;;  %1005 = vmatpush.xpose.msrb.mxu2 %v8437_v3 }
  0x71   :  { %719 = vmatmul.f32.vlgmr.msrb.gmra.mxu0 %v8566_v43 }
  0x72   :  { %953 = vmatpush.xpose.msrb.mxu0 %v8461_v13 }
  0x73   :  { %748 = vmatmul.f32.vlgmr.msrb.gmra.mxu1 %v8574_v45 }
  0x74   :  { %979 = vmatpush.xpose.msrb.mxu1 %v8437_v3 }
  0x75   :  { %808 = vmatmul.f32.gmra.mxu3 %v8577_v46  ;;  %782 = vmatmul.f32.gmra.mxu2 %v8577_v46 }
  0x79   :  { %724 = vmatmul.f32.gmra.mxu0 %v8588_v49 }
  0x7b   :  { %754 = vmatmul.f32.gmra.mxu1 %v8594_v52 }
  0x7d   :  { %925 = vmatmul.f32.vlgmr.msra.gmra.mxu3 %v8627_v60  ;;  %896 = vmatmul.f32.vlgmr.msra.gmra.mxu2 %v8621_v59 }
  0x7e   :  { %1156 = vmatpush.xpose.msra.mxu3 %v8437_v3  ;;  %1130 = vmatpush.xpose.msra.mxu2 %v8461_v13 }
  0x81   :  { %834 = vmatmul.f32.vlgmr.msra.gmra.mxu0 %v8643_v1 }
  0x82   :  { %1070 = vmatpush.xpose.msra.mxu0 %v8444_v7 }
  0x83   :  { %868 = vmatmul.f32.vlgmr.msra.gmra.mxu1 %v8614_v57 }
  0x84   :  { %1098 = vmatpush.xpose.msra.mxu1 %v8437_v3 }
  0x85   :  { %931 = vmatmul.f32.gmra.mxu3 %v8646_v2  ;;  %901 = vmatmul.f32.gmra.mxu2 %v8637_v63 }
  0x89   :  { %842 = vmatmul.f32.gmra.mxu0 %v8665_v20 }
  0x8b   :  { %872 = vmatmul.f32.gmra.mxu1 %v8630_v61 }
  0x8d   :  { %1045 = vmatmul.f32.vlgmr.msrb.gmra.mxu3 %v8639_v0  ;;  %1011 = vmatmul.f32.vlgmr.msrb.gmra.mxu2 %v8675_v30 }
  0x8e   :  { %1275 = vmatpush.xpose.msrb.mxu3 %v8437_v3  ;;  %1247 = vmatpush.xpose.msrb.mxu2 %v8444_v7 }
  0x91   :  { %955 = vmatmul.f32.vlgmr.msrb.gmra.mxu0 %v8614_v57 }
  0x92   :  { %1182 = vmatpush.xpose.msrb.mxu0 %v8437_v3 }
  0x93   :  { %981 = vmatmul.f32.vlgmr.msrb.gmra.mxu1 %v8614_v57 }
  0x94   :  { %1220 = vmatpush.xpose.msrb.mxu1 %v8479_v19 }
  0x95   :  { %1049 = vmatmul.f32.gmra.mxu3 %v8661_v15  ;;  %1019 = vmatmul.f32.gmra.mxu2 %v8688_v44  ;;  %v8714_v44 = vand.u32 4294901760, %v89_v38 }
  0x97   :  { %10142 = vst [vmem:[#allocation65_spill] sm:$0xff] %v8714_v44 }
  0x99   :  { %959 = vmatmul.f32.gmra.mxu0 %v8630_v61 }
  0x9b   :  { %985 = vmatmul.f32.gmra.mxu1 %v8630_v61 }
  0x9d   :  { %1158 = vmatmul.f32.vlgmr.msra.gmra.mxu3 %v8639_v0  ;;  %1132 = vmatmul.f32.vlgmr.msra.gmra.mxu2 %v8639_v0 }
  0x9e   :  { %v127_v56 = vpop.f32.mrf.mxu0  ;;  %1397 = vmatpush.xpose.msra.mxu3 %v8479_v19  ;;  %1359 = vmatpush.xpose.msra.mxu2 %v8437_v3 }
  0xa0   :  { %v218_v58 = vpop.f32.mrf.mxu3  ;;  %v161_v62 = vpop.f32.mrf.mxu1 }
  0xa1   :  { %1073 = vmatmul.f32.vlgmr.msra.gmra.mxu0 %v8650_v6  ;;  %v189_v10 = vpop.f32.mrf.mxu2  ;;  %v162_v34 = vadd.f32 %v161_v62, %v127_v56  ;;  %v1186_v56 = vsub.f32 %v8705_v24, %v8711_v50  ;;  %v8721_v62 = vsub.f32 %v89_v38, %v8714_v44 }
  0xa2   :  { %1307 = vmatpush.xpose.msra.mxu0 %v8461_v13 }
  0xa3   :  { %1102 = vmatmul.f32.vlgmr.msra.gmra.mxu1 %v8658_v14  ;;  %v190_v29 = vadd.f32 %v189_v10, %v162_v34  ;;  %10143 = vst [vmem:[#allocation66_spill] sm:$0xff] %v8721_v62  ;;  %v8723_v14 = vand.u32 4294901760, %v90_v48  ;;  %v8727_v10 = vand.u32 4294901760, %v1186_v56  ;;  %v8730_v34 = vand.u32 4294901760, %v8721_v62 }
  0xa4   :  { %1333 = vmatpush.xpose.msra.mxu1 %v8437_v3  ;;  %v8739_v56 = vstv %s100_s2 }
  0xa5   :  { %1162 = vmatmul.f32.gmra.mxu3 %v8661_v15  ;;  %1136 = vmatmul.f32.gmra.mxu2 %v8661_v15  ;;  %10144 = vst [vmem:[#allocation67_spill] sm:$0xff] %v8723_v14  ;;  %v219_v61 = vadd.f32 %v218_v58, %v190_v29 }
  0xa6   :  { %v135_v0 = vpop.f32.mrf.mxu0  ;;  %10145 = vst [vmem:[#allocation68_spill] sm:$0xff] %v8727_v10 }
  0xa7   :  { %10146 = vst [vmem:[#allocation69_spill] sm:$0xff] %v8730_v34 }
  0xa8   :  { %v224_v6 = vpop.f32.mrf.mxu3  ;;  %v165_v30 = vpop.f32.mrf.mxu1 }
  0xa9   :  { %1078 = vmatmul.f32.gmra.mxu0 %v8672_v26  ;;  %v194_v2 = vpop.f32.mrf.mxu2  ;;  %v166_v63 = vadd.f32 %v165_v30, %v135_v0  ;;  %v8734_v26 = vsub.f32 %v90_v48, %v8723_v14 }
  0xab   :  { %1108 = vmatmul.f32.gmra.mxu1 %v8678_v32  ;;  %10147 = vst [vmem:[#allocation70_spill] sm:$0xff] %v8734_v26  ;;  %v195_v0 = vadd.f32 %v194_v2, %v166_v63  ;;  %v8744_v48 = vand.u32 4294901760, %v8734_v26 }
  0xad   :  { %1279 = vmatmul.f32.vlgmr.msrb.gmra.mxu3 %v8711_v50  ;;  %1250 = vmatmul.f32.vlgmr.msrb.gmra.mxu2 %v8705_v24  ;;  %v1194_v50 = vsub.f32 %v8721_v62, %v8730_v34  ;;  %10148 = vst [vmem:[#allocation71_spill] sm:$0xff] %v8744_v48  ;;  %v225_v2 = vadd.f32 %v224_v6, %v195_v0 }
  0xae   :  { %v248_v15 = vpop.f32.mrf.mxu0  ;;  %1510 = vmatpush.xpose.msrb.mxu3 %v8437_v3  ;;  %1484 = vmatpush.xpose.msrb.mxu2 %v8461_v13 }
  0xaf   :  { %v249_v38 = vadd.f32 %v248_v15, %v219_v61  ;;  %v8747_v61 = vand.u32 4294901760, %v91_v54  ;;  %v8752_v15 = vand.u32 4294901760, %v1194_v50 }
  0xb0   :  { %v338_v58 = vpop.f32.mrf.mxu3  ;;  %v274_v30 = vpop.f32.mrf.mxu1 }
  0xb1   :  { %1188 = vmatmul.f32.vlgmr.msrb.gmra.mxu0 %v8727_v10  ;;  %v304_v29 = vpop.f32.mrf.mxu2  ;;  %v275_v24 = vadd.f32 %v274_v30, %v249_v38  ;;  %10149 = vst [vmem:[#allocation72_spill] sm:$0xff] %v8747_v61  ;;  %v1363_v38 = vsub.f32 %v8734_v26, %v8744_v48  ;;  %v8759_v30 = vsub.f32 %v91_v54, %v8747_v61 }
  0xb2   :  { %1424 = vmatpush.xpose.msrb.mxu0 %v8444_v7  ;;  %10150 = vst [vmem:[#allocation73_spill] sm:$0xff] %v8752_v15 }
  0xb3   :  { %1222 = vmatmul.f32.vlgmr.msrb.gmra.mxu1 %v8698_v53  ;;  %v2689_v63 = vadd.f32 %v8739_v56, %v275_v24  ;;  %10151 = vst [vmem:[#allocation74_spill] sm:$0xff] %v8759_v30  ;;  %v8762_v0 = vand.u32 4294901760, %v1363_v38 }
  0xb4   :  { %1452 = vmatpush.xpose.msrb.mxu1 %v8437_v3 }
  0xb5   :  { %1285 = vmatmul.f32.gmra.mxu3 %v8730_v34  ;;  %4431 = vperm.xlu1 %8130, %v2689_v63   ;;  %10152 = vst [vmem:[#allocation75_spill] sm:$0xff] %v8762_v0  ;;  %v8765_v34 = vand.u32 4294901760, %v8759_v30 }
  0xb6   :  { %v252_v10 = vpop.f32.mrf.mxu0  ;;  %1255 = vmatmul.f32.gmra.mxu2 %v8721_v62  ;;  %v339_v62 = vadd.f32 %v338_v58, %v304_v29 }
  0xb7   :  { %v253_v32 = vadd.f32 %v252_v10, %v225_v2  ;;  %10153 = vst [vmem:[#allocation76_spill] sm:$0xff] %v8765_v34  ;;  %v1371_v10 = vsub.f32 %v8759_v30, %v8765_v34 }
  0xb8   :  { %v342_v60 = vpop.f32.mrf.mxu3  ;;  %v278_v24 = vpop.f32.mrf.mxu1 }
  0xb9   :  { %1196 = vmatmul.f32.gmra.mxu0 %v8752_v15  ;;  %v312_v6 = vpop.f32.mrf.mxu2  ;;  %v279_v50 = vadd.f32 %v278_v24, %v253_v32  ;;  %v8776_v29 = vand.u32 4294901760, %v1371_v10 }
  0xbb   :  { %v2690_v63 = vadd.f32 %v8739_v56, %v279_v50  ;;  %1226 = vmatmul.f32.gmra.mxu1 %v8714_v44  ;;  %10154 = vst [vmem:[#allocation77_spill] sm:$0xff] %v8776_v29 }
  0xbd   :  { %1399 = vmatmul.f32.vlgmr.msra.gmra.mxu3 %v8723_v14  ;;  %4436 = vperm.xlu1 %8130, %v2690_v63   ;;  %v343_v63 = vadd.f32 %v342_v60, %v312_v6 }
  0xbe   :  { %v366_v54 = vpop.f32.mrf.mxu0  ;;  %1365 = vmatmul.f32.vlgmr.msra.gmra.mxu2 %v8762_v0  ;;  %1612 = vmatpush.xpose.msra.mxu3 %v8437_v3 }
  0xbf   :  { %v367_v32 = vadd.f32 %v366_v54, %v339_v62  ;;  %1589 = vmatpush.xpose.msra.mxu2 %v8444_v7 }
  0xc0   :  { %v451_v2 = vpop.f32.mrf.mxu3  ;;  %v395_v38 = vpop.f32.mrf.mxu1 }
  0xc1   :  { %1309 = vmatmul.f32.vlgmr.msra.gmra.mxu0 %v8698_v53  ;;  %v425_v24 = vpop.f32.mrf.mxu2  ;;  %v396_v58 = vadd.f32 %v395_v38, %v367_v32 }
  0xc2   :  { %1536 = vmatpush.xpose.msra.mxu0 %v8437_v3 }
  0xc3   :  { %v426_v50 = vadd.f32 %v425_v24, %v396_v58  ;;  %1335 = vmatmul.f32.vlgmr.msra.gmra.mxu1 %v8698_v53  ;;  %v8785_v58 = vld [vmem:[#allocation6] sm:$0xff] }
  0xc4   :  { %1566 = vmatpush.xpose.msra.mxu1 %v8479_v19  ;;  %v8790_v6 = vand.u32 4294901760, %v8785_v58 }
  0xc5   :  { %1403 = vmatmul.f32.gmra.mxu3 %v8747_v61  ;;  %v452_v62 = vadd.f32 %v451_v2, %v426_v50 }
  0xc6   :  { %v371_v54 = vpop.f32.mrf.mxu0  ;;  %1373 = vmatmul.f32.gmra.mxu2 %v8776_v29  ;;  %10155 = vst [vmem:[#allocation78_spill] sm:$0xff] %v8790_v6 }
  0xc7   :  { %v372_v0 = vadd.f32 %v371_v54, %v343_v63  ;;  %v2691_v15 = vadd.f32 %v8739_v56, %v452_v62 }
  0xc8   :  { %v455_v32 = vpop.f32.mrf.mxu3  ;;  %v401_v10 = vpop.f32.mrf.mxu1 }
  0xc9   :  { %1313 = vmatmul.f32.gmra.mxu0 %v8714_v44  ;;  %v429_v38 = vpop.f32.mrf.mxu2  ;;  %v402_v24 = vadd.f32 %v401_v10, %v372_v0  ;;  %4441 = vperm.xlu2 %8131, %v2691_v15   ;;  %v8795_v0 = vld [vmem:[#allocation6 + $0x8] sm:$0xff]  ;;  %v8801_v10 = vsub.f32 %v8785_v58, %v8790_v6 }
  0xcb   :  { %v430_v60 = vadd.f32 %v429_v38, %v402_v24  ;;  %1339 = vmatmul.f32.gmra.mxu1 %v8714_v44  ;;  %10156 = vst [vmem:[#allocation79_spill] sm:$0xff] %v8801_v10  ;;  %v8810_v24 = vand.u32 4294901760, %v8801_v10 }
  0xcd   :  { %1512 = vmatmul.f32.vlgmr.msrb.gmra.mxu3 %v8723_v14  ;;  %v456_v2 = vadd.f32 %v455_v32, %v430_v60  ;;  %v8805_v32 = vand.u32 4294901760, %v8795_v0  ;;  %10158 = vst [vmem:[#allocation81_spill] sm:$0xff] %v8810_v24 }
  0xce   :  { %v481_v50 = vpop.f32.mrf.mxu0  ;;  %1486 = vmatmul.f32.vlgmr.msrb.gmra.mxu2 %v8723_v14  ;;  %1712 = vmatpush.xpose.msrb.mxu3 %v8479_v19 }
  0xcf   :  { %1682 = vmatpush.xpose.msrb.mxu2 %v8437_v3  ;;  %v2692_v15 = vadd.f32 %v8739_v56, %v456_v2  ;;  %10157 = vst [vmem:[#allocation80_spill] sm:$0xff] %v8805_v32  ;;  %v8816_v2 = vsub.f32 %v8795_v0, %v8805_v32 }
  0xd0   :  { %v572_v63 = vpop.f32.mrf.mxu3  ;;  %v515_v62 = vpop.f32.mrf.mxu1 }
  0xd1   :  { %1427 = vmatmul.f32.vlgmr.msrb.gmra.mxu0 %v8734_v26  ;;  %v543_v54 = vpop.f32.mrf.mxu2  ;;  %4446 = vperm.xlu0 %8132, %v2692_v15   ;;  %v516_v38 = vadd.f32 %v515_v62, %v481_v50  ;;  %10159 = vst [vmem:[#allocation82_spill] sm:$0xff] %v8816_v2  ;;  %v1540_v62 = vsub.f32 %v8801_v10, %v8810_v24 }
  0xd2   :  { %1638 = vmatpush.xpose.msrb.mxu0 %v8461_v13 }
  0xd3   :  { %1456 = vmatmul.f32.vlgmr.msrb.gmra.mxu1 %v8744_v48  ;;  %v544_v29 = vadd.f32 %v543_v54, %v516_v38  ;;  %v8822_v48 = vand.u32 4294901760, %v8816_v2  ;;  %v8826_v44 = vand.u32 4294901760, %v1540_v62 }
  0xd4   :  { %1660 = vmatpush.xpose.msrb.mxu1 %v8437_v3 }
  0xd5   :  { %1516 = vmatmul.f32.gmra.mxu3 %v8747_v61  ;;  %10160 = vst [vmem:[#allocation83_spill] sm:$0xff] %v8822_v48  ;;  %v573_v26 = vadd.f32 %v572_v63, %v544_v29  ;;  %v1686_v54 = vsub.f32 %v8816_v2, %v8822_v48 }
  0xd6   :  { %v489_v60 = vpop.f32.mrf.mxu0  ;;  %1490 = vmatmul.f32.gmra.mxu2 %v8747_v61  ;;  %10161 = vst [vmem:[#allocation84_spill] sm:$0xff] %v8826_v44 }
  0xd7   :  { %v8834_v63 = vand.u32 4294901760, %v1686_v54 }
  0xd8   :  { %v578_v15 = vpop.f32.mrf.mxu3  ;;  %v519_v14 = vpop.f32.mrf.mxu1 }
  0xd9   :  { %1432 = vmatmul.f32.gmra.mxu0 %v8759_v30  ;;  %v548_v50 = vpop.f32.mrf.mxu2  ;;  %v520_v61 = vadd.f32 %v519_v14, %v489_v60  ;;  %10162 = vst [vmem:[#allocation85_spill] sm:$0xff] %v8834_v63  ;;  %v8837_v60 = vld [vmem:[#allocation6 + $0x10] sm:$0xff] }
  0xdb   :  { %1462 = vmatmul.f32.gmra.mxu1 %v8765_v34  ;;  %v549_v20 = vadd.f32 %v548_v50, %v520_v61  ;;  %v8849_v50 = vld [vmem:[#allocation6 + $0x18] sm:$0xff] }
  0xdd   :  { %1616 = vmatmul.f32.vlgmr.msra.gmra.mxu3 %v8810_v24 }
  0xde   :  { %v602_v53 = vpop.f32.mrf.mxu0  ;;  %1592 = vmatmul.f32.vlgmr.msra.gmra.mxu2 %v8801_v10  ;;  %1806 = vmatpush.xpose.msra.mxu3 %v8437_v3 }
  0xdf   :  { %v603_v38 = vadd.f32 %v602_v53, %v573_v26  ;;  %1784 = vmatpush.xpose.msra.mxu2 %v8461_v13  ;;  %v579_v26 = vadd.f32 %v578_v15, %v549_v20  ;;  %v8844_v53 = vand.u32 4294901760, %v8837_v60 }
  0xe0   :  { %v692_v30 = vpop.f32.mrf.mxu3  ;;  %v628_v34 = vpop.f32.mrf.mxu1 }
  0xe1   :  { %1542 = vmatmul.f32.vlgmr.msra.gmra.mxu0 %v8826_v44  ;;  %v658_v14 = vpop.f32.mrf.mxu2  ;;  %v629_v29 = vadd.f32 %v628_v34, %v603_v38  ;;  %10163 = vst [vmem:[#allocation86_spill] sm:$0xff] %v8844_v53  ;;  %v8854_v38 = vsub.f32 %v8837_v60, %v8844_v53 }
  0xe2   :  { %1735 = vmatpush.xpose.msra.mxu0 %v8444_v7 }
  0xe3   :  { %v2693_v62 = vadd.f32 %v8739_v56, %v629_v29  ;;  %1568 = vmatmul.f32.vlgmr.msra.gmra.mxu1 %v8790_v6  ;;  %10164 = vst [vmem:[#allocation87_spill] sm:$0xff] %v8854_v38 }
  0xe4   :  { %1758 = vmatpush.xpose.msra.mxu1 %v8437_v3 }
  0xe5   :  { %1714 = vmatmul.f32.vlgmr.msrb.gmra.mxu3 %v8805_v32  ;;  %4451 = vperm.xlu2 %8131, %v2693_v62   ;;  %v8858_v62 = vand.u32 4294901760, %v8849_v50 }
  0xe6   :  { %v606_v61 = vpop.f32.mrf.mxu0  ;;  %1688 = vmatmul.f32.vlgmr.msrb.gmra.mxu2 %v8834_v63  ;;  %1904 = vmatpush.xpose.msrb.mxu3 %v8437_v3  ;;  %v8865_v63 = vand.u32 4294901760, %v8854_v38 }
  0xe7   :  { %v607_v34 = vadd.f32 %v606_v61, %v579_v26  ;;  %1881 = vmatpush.xpose.msrb.mxu2 %v8444_v7  ;;  %10165 = vst [vmem:[#allocation88_spill] sm:$0xff] %v8858_v62  ;;  %v693_v61 = vadd.f32 %v692_v30, %v658_v14 }
  0xe8   :  { %v696_v54 = vpop.f32.mrf.mxu3  ;;  %v632_v20 = vpop.f32.mrf.mxu1  ;;  %10166 = vst [vmem:[#allocation89_spill] sm:$0xff] %v8865_v63  ;;  %v1832_v10 = vsub.f32 %v8854_v38, %v8865_v63 }
  0xe9   :  { %1640 = vmatmul.f32.vlgmr.msrb.gmra.mxu0 %v8790_v6  ;;  %v666_v15 = vpop.f32.mrf.mxu2  ;;  %v633_v29 = vadd.f32 %v632_v20, %v607_v34  ;;  %v8870_v34 = vsub.f32 %v8849_v50, %v8858_v62 }
  0xea   :  { %1828 = vmatpush.xpose.msrb.mxu0 %v8437_v3 }
  0xeb   :  { %v2694_v26 = vadd.f32 %v8739_v56, %v633_v29  ;;  %1662 = vmatmul.f32.vlgmr.msrb.gmra.mxu1 %v8790_v6  ;;  %10167 = vst [vmem:[#allocation90_spill] sm:$0xff] %v8870_v34 }
  0xec   :  { %1858 = vmatpush.xpose.msrb.mxu1 %v8479_v19 }
  0xed   :  { %1808 = vmatmul.f32.vlgmr.msra.gmra.mxu3 %v8805_v32  ;;  %4456 = vperm.xlu0 %8132, %v2694_v26  }
  0xee   :  { %v720_v24 = vpop.f32.mrf.mxu0  ;;  %1786 = vmatmul.f32.vlgmr.msra.gmra.mxu2 %v8805_v32  ;;  %2004 = vmatpush.xpose.msra.mxu3 %v8479_v19  ;;  %v8879_v32 = vand.u32 4294901760, %v8870_v34 }
  0xef   :  { %v721_v20 = vadd.f32 %v720_v24, %v693_v61  ;;  %1974 = vmatpush.xpose.msra.mxu2 %v8437_v3  ;;  %v697_v24 = vadd.f32 %v696_v54, %v666_v15  ;;  %v8883_v61 = vand.u32 4294901760, %v1832_v10 }
  0xf0   :  { %v805_v30 = vpop.f32.mrf.mxu3  ;;  %v749_v14 = vpop.f32.mrf.mxu1  ;;  %10168 = vst [vmem:[#allocation91_spill] sm:$0xff] %v8879_v32 }
  0xf1   :  { %1738 = vmatmul.f32.vlgmr.msra.gmra.mxu0 %v8816_v2  ;;  %v779_v29 = vpop.f32.mrf.mxu2  ;;  %v750_v26 = vadd.f32 %v749_v14, %v721_v20  ;;  %10169 = vst [vmem:[#allocation92_spill] sm:$0xff] %v8883_v61  ;;  %v1978_v20 = vsub.f32 %v8870_v34, %v8879_v32 }
  0xf2   :  { %1930 = vmatpush.xpose.msra.mxu0 %v8461_v13 }
  0xf3   :  { %v780_v6 = vadd.f32 %v779_v29, %v750_v26  ;;  %1762 = vmatmul.f32.vlgmr.msra.gmra.mxu1 %v8822_v48 }
  0xf4   :  { %1952 = vmatpush.xpose.msra.mxu1 %v8437_v3 }
  0xf5   :  { %1908 = vmatmul.f32.vlgmr.msrb.gmra.mxu3 %v8865_v63  ;;  %v806_v2 = vadd.f32 %v805_v30, %v780_v6  ;;  %v8893_v6 = vand.u32 4294901760, %v1978_v20  ;;  %v8896_v30 = vld [vmem:[#allocation6 + $0x20] sm:$0xff]  ;;  %v8907_v20 = vld [vmem:[#allocation6 + $0x28] sm:$0xff] }
  0xf6   :  { %v725_v44 = vpop.f32.mrf.mxu0  ;;  %1884 = vmatmul.f32.vlgmr.msrb.gmra.mxu2 %v8854_v38  ;;  %2098 = vmatpush.xpose.msrb.mxu3 %v8437_v3  ;;  %10172 = vst [vmem:[#allocation95_spill] sm:$0xff] %v8907_v20 }
  0xf7   :  { %v726_v14 = vadd.f32 %v725_v44, %v697_v24  ;;  %2076 = vmatpush.xpose.msrb.mxu2 %v8461_v13  ;;  %v2695_v54 = vadd.f32 %v8739_v56, %v806_v2  ;;  %10170 = vst [vmem:[#allocation93_spill] sm:$0xff] %v8893_v6  ;;  %v8902_v44 = vand.u32 4294901760, %v8896_v30 }
  0xf8   :  { %v809_v15 = vpop.f32.mrf.mxu3  ;;  %v755_v29 = vpop.f32.mrf.mxu1 }
  0xf9   :  { %1834 = vmatmul.f32.vlgmr.msrb.gmra.mxu0 %v8883_v61  ;;  %v783_v10 = vpop.f32.mrf.mxu2  ;;  %v756_v26 = vadd.f32 %v755_v29, %v726_v14  ;;  %4461 = vperm.xlu0 %8132, %v2695_v54   ;;  %10171 = vst [vmem:[#allocation94_spill] sm:$0xff] %v8902_v44 }
  0xfa   :  { %2027 = vmatpush.xpose.msrb.mxu0 %v8444_v7 }
  0xfb   :  { %v784_v63 = vadd.f32 %v783_v10, %v756_v26  ;;  %1860 = vmatmul.f32.vlgmr.msrb.gmra.mxu1 %v8844_v53  ;;  %v8913_v26 = vsub.f32 %v8896_v30, %v8902_v44 }
  0xfc   :  { %2050 = vmatpush.xpose.msrb.mxu1 %v8437_v3 }
  0xfd   :  { %2006 = vmatmul.f32.vlgmr.msra.gmra.mxu3 %v8858_v62  ;;  %v810_v2 = vadd.f32 %v809_v15, %v784_v63  ;;  %10173 = vst [vmem:[#allocation96_spill] sm:$0xff] %v8913_v26  ;;  %v8917_v63 = vand.u32 4294901760, %v8907_v20 }
  0xfe   :  { %v835_v24 = vpop.f32.mrf.mxu0  ;;  %1980 = vmatmul.f32.vlgmr.msra.gmra.mxu2 %v8893_v6  ;;  %2196 = vmatpush.xpose.msra.mxu3 %v8437_v3 }
  0xff   :  { %2173 = vmatpush.xpose.msra.mxu2 %v8444_v7  ;;  %v2696_v14 = vadd.f32 %v8739_v56, %v810_v2  ;;  %10174 = vst [vmem:[#allocation97_spill] sm:$0xff] %v8917_v63  ;;  %v8923_v2 = vand.u32 4294901760, %v8913_v26 }
 0x100   :  { %v926_v54 = vpop.f32.mrf.mxu3  ;;  %v869_v29 = vpop.f32.mrf.mxu1 }
 0x101   :  { %1932 = vmatmul.f32.vlgmr.msra.gmra.mxu0 %v8844_v53  ;;  %v897_v10 = vpop.f32.mrf.mxu2  ;;  %4466 = vperm.xlu1 %8130, %v2696_v14   ;;  %v870_v15 = vadd.f32 %v869_v29, %v835_v24  ;;  %10175 = vst [vmem:[#allocation98_spill] sm:$0xff] %v8923_v2  ;;  %v8929_v14 = vsub.f32 %v8907_v20, %v8917_v63 }
 0x102   :  { %2120 = vmatpush.xpose.msra.mxu0 %v8437_v3  ;;  %v2124_v61 = vsub.f32 %v8913_v26, %v8923_v2 }
 0x103   :  { %1954 = vmatmul.f32.vlgmr.msra.gmra.mxu1 %v8844_v53  ;;  %10176 = vst [vmem:[#allocation99_spill] sm:$0xff] %v8929_v14  ;;  %v898_v24 = vadd.f32 %v897_v10, %v870_v15 }
 0x104   :  { %2150 = vmatpush.xpose.msra.mxu1 %v8479_v19  ;;  %v8941_v57 = vand.u32 4294901760, %v2124_v61 }
 0x105   :  { %2100 = vmatmul.f32.vlgmr.msrb.gmra.mxu3 %v8858_v62  ;;  %v927_v48 = vadd.f32 %v926_v54, %v898_v24 }
 0x106   :  { %v843_v6 = vpop.f32.mrf.mxu0  ;;  %2078 = vmatmul.f32.vlgmr.msrb.gmra.mxu2 %v8858_v62  ;;  %2296 = vmatpush.xpose.msrb.mxu3 %v8479_v19  ;;  %v8937_v62 = vand.u32 4294901760, %v8929_v14  ;;  %10178 = vst [vmem:[#allocation101_spill] sm:$0xff] %v8941_v57 }
 0x107   :  { %2266 = vmatpush.xpose.msrb.mxu2 %v8437_v3 }
 0x108   :  { %v932_v38 = vpop.f32.mrf.mxu3  ;;  %v873_v29 = vpop.f32.mrf.mxu1  ;;  %10177 = vst [vmem:[#allocation100_spill] sm:$0xff] %v8937_v62  ;;  %v2270_v15 = vsub.f32 %v8929_v14, %v8937_v62 }
 0x109   :  { %2030 = vmatmul.f32.vlgmr.msrb.gmra.mxu0 %v8870_v34  ;;  %v902_v53 = vpop.f32.mrf.mxu2  ;;  %v874_v20 = vadd.f32 %v873_v29, %v843_v6 }
 0x10a   :  { %2222 = vmatpush.xpose.msrb.mxu0 %v8461_v13  ;;  %v8950_v29 = vand.u32 4294901760, %v2270_v15 }
 0x10b   :  { %2054 = vmatmul.f32.vlgmr.msrb.gmra.mxu1 %v8879_v32  ;;  %v903_v54 = vadd.f32 %v902_v53, %v874_v20 }
 0x10c   :  { %2244 = vmatpush.xpose.msrb.mxu1 %v8437_v3  ;;  %10179 = vst [vmem:[#allocation102_spill] sm:$0xff] %v8950_v29 }
 0x10d   :  { %2200 = vmatmul.f32.vlgmr.msra.gmra.mxu3 %v8923_v2  ;;  %v8953_v2 = vld [vmem:[#allocation6 + $0x30] sm:$0xff] }
 0x10e   :  { %v956_v10 = vpop.f32.mrf.mxu0  ;;  %2176 = vmatmul.f32.vlgmr.msra.gmra.mxu2 %v8913_v26  ;;  %2390 = vmatpush.xpose.msra.mxu3 %v8437_v3  ;;  %10180 = vst [vmem:[#allocation103_spill] sm:$0xff] %v8953_v2  ;;  %v8960_v53 = vand.u32 4294901760, %v8953_v2 }
 0x10f   :  { %v957_v34 = vadd.f32 %v956_v10, %v927_v48  ;;  %2368 = vmatpush.xpose.msra.mxu2 %v8461_v13  ;;  %v933_v48 = vadd.f32 %v932_v38, %v903_v54  ;;  %v99_v10 = vld [vmem:[#allocation6 + $0x38] sm:$0xff] }
 0x110   :  { %v1046_v32 = vpop.f32.mrf.mxu3  ;;  %v982_v6 = vpop.f32.mrf.mxu1  ;;  %10181 = vst [vmem:[#allocation104_spill] sm:$0xff] %v8960_v53  ;;  %v8968_v54 = vsub.f32 %v8953_v2, %v8960_v53 }
 0x111   :  { %2126 = vmatmul.f32.vlgmr.msra.gmra.mxu0 %v8941_v57  ;;  %v1012_v61 = vpop.f32.mrf.mxu2  ;;  %v983_v24 = vadd.f32 %v982_v6, %v957_v34 }
 0x112   :  { %2319 = vmatpush.xpose.msra.mxu0 %v8444_v7  ;;  %10182 = vst [vmem:[#allocation105_spill] sm:$0xff] %v8968_v54 }
 0x113   :  { %v2697_v26 = vadd.f32 %v8739_v56, %v983_v24  ;;  %2152 = vmatmul.f32.vlgmr.msra.gmra.mxu1 %v8902_v44 }
 0x114   :  { %2342 = vmatpush.xpose.msra.mxu1 %v8437_v3 }
 0x115   :  { %2298 = vmatmul.f32.vlgmr.msrb.gmra.mxu3 %v8917_v63  ;;  %4471 = vperm.xlu1 %8130, %v2697_v26   ;;  %v8971_v26 = vand.u32 4294901760, %v99_v10 }
 0x116   :  { %v960_v20 = vpop.f32.mrf.mxu0  ;;  %2272 = vmatmul.f32.vlgmr.msrb.gmra.mxu2 %v8950_v29  ;;  %2488 = vmatpush.xpose.msrb.mxu3 %v8437_v3  ;;  %v8978_v29 = vand.u32 4294901760, %v8968_v54 }
 0x117   :  { %v961_v34 = vadd.f32 %v960_v20, %v933_v48  ;;  %2465 = vmatpush.xpose.msrb.mxu2 %v8444_v7  ;;  %10183 = vst [vmem:[#allocation106_spill] sm:$0xff] %v8971_v26  ;;  %v1047_v20 = vadd.f32 %v1046_v32, %v1012_v61 }
 0x118   :  { %v1050_v15 = vpop.f32.mrf.mxu3  ;;  %v986_v6 = vpop.f32.mrf.mxu1  ;;  %10184 = vst [vmem:[#allocation107_spill] sm:$0xff] %v8978_v29 }
 0x119   :  { %2224 = vmatmul.f32.vlgmr.msrb.gmra.mxu0 %v8902_v44  ;;  %v1020_v38 = vpop.f32.mrf.mxu2  ;;  %v987_v24 = vadd.f32 %v986_v6, %v961_v34  ;;  %v8982_v34 = vsub.f32 %v99_v10, %v8971_v26 }
 0x11a   :  { %2412 = vmatpush.xpose.msrb.mxu0 %v8437_v3 }
 0x11b   :  { %v2698_v48 = vadd.f32 %v8739_v56, %v987_v24  ;;  %2246 = vmatmul.f32.vlgmr.msrb.gmra.mxu1 %v8902_v44  ;;  %10185 = vst [vmem:[#allocation108_spill] sm:$0xff] %v8982_v34  ;;  %v2416_v44 = vsub.f32 %v8968_v54, %v8978_v29 }
 0x11c   :  { %2442 = vmatpush.xpose.msrb.mxu1 %v8479_v19 }
 0x11d   :  { %2392 = vmatmul.f32.vlgmr.msra.gmra.mxu3 %v8917_v63  ;;  %4476 = vperm.xlu2 %8131, %v2698_v48   ;;  %v8991_v48 = vand.u32 4294901760, %v8982_v34 }
 0x11e   :  { %v1074_v57 = vpop.f32.mrf.mxu0  ;;  %2370 = vmatmul.f32.vlgmr.msra.gmra.mxu2 %v8917_v63  ;;  %2588 = vmatpush.xpose.msra.mxu3 %v8479_v19  ;;  %v8995_v19 = vand.u32 4294901760, %v2416_v44  ;;  %v9045_v63 = vstv %s8116_s3 }
 0x11f   :  { %v1075_v6 = vadd.f32 %v1074_v57, %v1047_v20  ;;  %2558 = vmatpush.xpose.msra.mxu2 %v8437_v3  ;;  %10186 = vst [vmem:[#allocation109_spill] sm:$0xff] %v8991_v48  ;;  %v1051_v57 = vadd.f32 %v1050_v15, %v1020_v38 }
 0x120   :  { %v1159_v32 = vpop.f32.mrf.mxu3  ;;  %v1103_v61 = vpop.f32.mrf.mxu1  ;;  %10187 = vst [vmem:[#allocation110_spill] sm:$0xff] %v8995_v19 }
 0x121   :  { %2322 = vmatmul.f32.vlgmr.msra.gmra.mxu0 %v8929_v14  ;;  %v1133_v24 = vpop.f32.mrf.mxu2  ;;  %v1104_v2 = vadd.f32 %v1103_v61, %v1075_v6  ;;  %v2562_v6 = vsub.f32 %v8982_v34, %v8991_v48 }
 0x122   :  { %2514 = vmatpush.xpose.msra.mxu0 %v8461_v13 }
 0x123   :  { %v1134_v10 = vadd.f32 %v1133_v24, %v1104_v2  ;;  %2346 = vmatmul.f32.vlgmr.msra.gmra.mxu1 %v8937_v62 }
 0x124   :  { %2536 = vmatpush.xpose.msra.mxu1 %v8437_v3 }
 0x125   :  { %2492 = vmatmul.f32.vlgmr.msrb.gmra.mxu3 %v8978_v29  ;;  %v1160_v20 = vadd.f32 %v1159_v32, %v1134_v10  ;;  %v9005_v32 = vand.u32 4294901760, %v2562_v6 }
 0x126   :  { %v1079_v14 = vpop.f32.mrf.mxu0  ;;  %2468 = vmatmul.f32.vlgmr.msrb.gmra.mxu2 %v8968_v54  ;;  %2682 = vmatpush.xpose.msrb.mxu3 %v8437_v3 }
 0x127   :  { %v1080_v61 = vadd.f32 %v1079_v14, %v1051_v57  ;;  %2660 = vmatpush.xpose.msrb.mxu2 %v8461_v13  ;;  %v2699_v2 = vadd.f32 %v8739_v56, %v1160_v20  ;;  %10188 = vst [vmem:[#allocation111_spill] sm:$0xff] %v9005_v32 }
 0x128   :  { %v1163_v15 = vpop.f32.mrf.mxu3  ;;  %v1109_v38 = vpop.f32.mrf.mxu1 }
 0x129   :  { %2418 = vmatmul.f32.vlgmr.msrb.gmra.mxu0 %v8995_v19  ;;  %v1137_v44 = vpop.f32.mrf.mxu2  ;;  %v1110_v24 = vadd.f32 %v1109_v38, %v1080_v61  ;;  %4481 = vperm.xlu1 %8130, %v2699_v2  }
 0x12a   :  { %2611 = vmatpush.xpose.msrb.mxu0 %v8444_v7 }
 0x12b   :  { %v1138_v10 = vadd.f32 %v1137_v44, %v1110_v24  ;;  %2444 = vmatmul.f32.vlgmr.msrb.gmra.mxu1 %v8960_v53 }
 0x12c   :  { %2634 = vmatpush.xpose.msrb.mxu1 %v8437_v3 }
 0x12d   :  { %2590 = vmatmul.f32.vlgmr.msra.gmra.mxu3 %v8971_v26  ;;  %v1164_v13 = vadd.f32 %v1163_v15, %v1138_v10 }
 0x12e   :  { %v1189_v14 = vpop.f32.mrf.mxu0  ;;  %2564 = vmatmul.f32.vlgmr.msra.gmra.mxu2 %v9005_v32 }
 0x12f   :  { %v2700_v57 = vadd.f32 %v8739_v56, %v1164_v13 }
 0x130   :  { %v1280_v20 = vpop.f32.mrf.mxu3  ;;  %v1223_v61 = vpop.f32.mrf.mxu1 }
 0x131   :  { %2516 = vmatmul.f32.vlgmr.msra.gmra.mxu0 %v8960_v53  ;;  %v1251_v6 = vpop.f32.mrf.mxu2  ;;  %4486 = vperm.xlu1 %8130, %v2700_v57   ;;  %v1224_v7 = vadd.f32 %v1223_v61, %v1189_v14 }
 0x133   :  { %2538 = vmatmul.f32.vlgmr.msra.gmra.mxu1 %v8960_v53  ;;  %v1252_v15 = vadd.f32 %v1251_v6, %v1224_v7 }
 0x135   :  { %2684 = vmatmul.f32.vlgmr.msrb.gmra.mxu3 %v8971_v26  ;;  %v1281_v24 = vadd.f32 %v1280_v20, %v1252_v15 }
 0x136   :  { %v1197_v2 = vpop.f32.mrf.mxu0  ;;  %2662 = vmatmul.f32.vlgmr.msrb.gmra.mxu2 %v8971_v26 }
 0x138   :  { %v1286_v3 = vpop.f32.mrf.mxu3  ;;  %v1227_v38 = vpop.f32.mrf.mxu1 }
 0x139   :  { %2614 = vmatmul.f32.vlgmr.msrb.gmra.mxu0 %v8982_v34  ;;  %v1256_v44 = vpop.f32.mrf.mxu2  ;;  %v1228_v10 = vadd.f32 %v1227_v38, %v1197_v2 }
 0x13b   :  { %2638 = vmatmul.f32.vlgmr.msrb.gmra.mxu1 %v8991_v48  ;;  %v1257_v14 = vadd.f32 %v1256_v44, %v1228_v10 }
 0x13d   :  { %v1287_v6 = vadd.f32 %v1286_v3, %v1257_v14 }
 0x13e   :  { %v1310_v13 = vpop.f32.mrf.mxu0 }
 0x13f   :  { %v1311_v57 = vadd.f32 %v1310_v13, %v1281_v24 }
 0x140   :  { %v9019_v32 = vpop.f32.mrf.mxu3  ;;  %v1336_v61 = vpop.f32.mrf.mxu1 }
 0x141   :  { %v9021_v54 = vpop.f32.mrf.mxu2  ;;  %v1337_v29 = vadd.f32 %v1336_v61, %v1311_v57 }
 0x143   :  { %v2701_v26 = vadd.f32 %v8739_v56, %v1337_v29 }
 0x145   :  { %4491 = vperm.xlu0 %8132, %v2701_v26  }
 0x146   :  { %v1314_v7 = vpop.f32.mrf.mxu0 }
 0x147   :  { %v1315_v34 = vadd.f32 %v1314_v7, %v1287_v6 }
 0x148   :  { %v9024_v53 = vpop.f32.mrf.mxu3  ;;  %v1340_v48 = vpop.f32.mrf.mxu1 }
 0x149   :  { %10189 = vst [vmem:[#allocation112_spill] sm:$0xff] %v9024_v53  ;;  %v9026_v20 = vpop.f32.mrf.mxu2  ;;  %v1341_v2 = vadd.f32 %v1340_v48, %v1315_v34 }
 0x14a   :  { %10190 = vst [vmem:[#allocation113_spill] sm:$0xff] %v9026_v20  ;;  %v9049_v20 = vld [vmem:[#allocation8 + $0x2] ss:$0 sm:$0xff] }
 0x14b   :  { %v2702_v15 = vadd.f32 %v8739_v56, %v1341_v2 }
 0x14d   :  { %4496 = vperm.xlu1 %8130, %v2702_v15  }
 0x14e   :  { %v9029_v38 = vpop.f32.mrf.mxu0 }
 0x150   :  { %v9031_v44 = vpop.f32.mrf.mxu3  ;;  %v9033_v24 = vpop.f32.mrf.mxu1 }
 0x151   :  { %v9035_v29 = vpop.f32.mrf.mxu2 }
 0x156   :  { %v9037_v3 = vpop.f32.mrf.mxu0 }
 0x157   :  { %10191 = vst [vmem:[#allocation114_spill] sm:$0xff] %v9037_v3 }
 0x158   :  { %v9039_v26 = vpop.f32.mrf.mxu3  ;;  %v9041_v10 = vpop.f32.mrf.mxu1 }
 0x159   :  { %10192 = vst [vmem:[#allocation115_spill] sm:$0xff] %v9039_v26  ;;  %v9043_v13 = vpop.f32.mrf.mxu2 }
 0x15a   :  { %10193 = vst [vmem:[#allocation116_spill] sm:$0xff] %v9041_v10 }
 0x15b   :  { %10194 = vst [vmem:[#allocation117_spill] sm:$0xff] %v9043_v13 }
 0x15e   :  { %v1543_v34 = vpop.f32.mrf.mxu0 }
 0x160   :  { %v1617_v48 = vpop.f32.mrf.mxu3  ;;  %v1569_v57 = vpop.f32.mrf.mxu1 }
 0x161   :  { %v1593_v14 = vpop.f32.mrf.mxu2  ;;  %v1570_v61 = vadd.f32 %v1569_v57, %v1543_v34 }
 0x163   :  { %v1594_v6 = vadd.f32 %v1593_v14, %v1570_v61 }
 0x165   :  { %v1618_v7 = vadd.f32 %v1617_v48, %v1594_v6  ;;  %v2716_v48 = vmul.f32 %v9049_v20, %v8785_v58 }
 0x166   :  { %v1641_v2 = vpop.f32.mrf.mxu0 }
 0x167   :  { %v1642_v15 = vadd.f32 %v1641_v2, %v1618_v7  ;;  %v2740_v7 = vand.u32 4294901760, %v2716_v48 }
 0x168   :  { %v1715_v19 = vpop.f32.mrf.mxu3  ;;  %v1663_v62 = vpop.f32.mrf.mxu1 }
 0x169   :  { %v1689_v3 = vpop.f32.mrf.mxu2  ;;  %v1664_v26 = vadd.f32 %v1663_v62, %v1642_v15  ;;  %2741 = vmatpush.xpose.msra.mxu0 %v2740_v7  ;;  %v2775_v62 = vsub.f32 %v2716_v48, %v2740_v7  ;;  %2834 = vmatpush.xpose.msra.mxu3 %v2740_v7 }
 0x16a   :  { %v1716_v53 = vadd.f32 %v1715_v19, %v1689_v3 }
 0x16b   :  { %v2706_v10 = vadd.f32 %v9045_v63, %v1664_v26  ;;  %v2776_v26 = vand.u32 4294901760, %v2775_v62  ;;  %2806 = vmatpush.xpose.msra.mxu2 %v2775_v62 }
 0x16c   :  { %2747 = vmatmul.f32.vlgmr.msra.gmra.mxu0 %v8477_v18  ;;  %2838 = vmatmul.f32.vlgmr.msra.gmra.mxu3 %v8458_v12 }
 0x16d   :  { %4149 = vrot.lane.b32.xlu0 %v2706_v10, %s8396_s8  ;;  %v2777_v58 = vsub.f32 %v2775_v62, %v2776_v26  ;;  %2866 = vmatpush.xpose.msrb.mxu0 %v2776_v26 }
 0x16e   :  { %v1739_v13 = vpop.f32.mrf.mxu0  ;;  %2809 = vmatmul.f32.vlgmr.msra.gmra.mxu2 %v8449_v8 }
 0x16f   :  { %v1740_v34 = vadd.f32 %v1739_v13, %v1716_v53 }
 0x170   :  { %v1809_v57 = vpop.f32.mrf.mxu3  ;;  %v1763_v14 = vpop.f32.mrf.mxu1 }
 0x171   :  { %v1787_v61 = vpop.f32.mrf.mxu2  ;;  %v1764_v6 = vadd.f32 %v1763_v14, %v1740_v34 }
 0x173   :  { %v1788_v2 = vadd.f32 %v1787_v61, %v1764_v6 }
 0x174   :  { %2755 = vmatmul.f32.gmra.mxu0 %v8497_v23  ;;  %2844 = vmatmul.f32.gmra.mxu3 %v8471_v16 }
 0x175   :  { %v1810_v19 = vadd.f32 %v1809_v57, %v1788_v2  ;;  %v2778_v57 = vand.u32 4294901760, %v2777_v58 }
 0x176   :  { %v1835_v3 = vpop.f32.mrf.mxu0  ;;  %2814 = vmatmul.f32.gmra.mxu2 %v8452_v9 }
 0x177   :  { %v2707_v53 = vadd.f32 %v9045_v63, %v1810_v19  ;;  %2779 = vmatpush.xpose.msra.mxu1 %v2778_v57 }
 0x178   :  { %v1909_v10 = vpop.f32.mrf.mxu3  ;;  %v1861_v13 = vpop.f32.mrf.mxu1 }
 0x179   :  { %v1885_v15 = vpop.f32.mrf.mxu2  ;;  %v1862_v34 = vadd.f32 %v1861_v13, %v1835_v3  ;;  %4151 = vrot.lane.b32.xlu0 %v2707_v53, %s8396_s8 }
 0x17a   :  { %2781 = vmatmul.f32.vlgmr.msra.gmra.mxu1 %v8439_v4 }
 0x17b   :  { %v1886_v48 = vadd.f32 %v1885_v15, %v1862_v34  ;;  %2892 = vmatpush.xpose.msrb.mxu1 %v2740_v7  ;;  %v2717_v7 = vmul.f32 %v9049_v20, %v8795_v0 }
 0x17c   :  { %2868 = vmatmul.f32.vlgmr.msrb.gmra.mxu0 %v8439_v4 }
 0x17d   :  { %v1910_v14 = vadd.f32 %v1909_v10, %v1886_v48  ;;  %v2917_v15 = vand.u32 4294901760, %v2717_v7 }
 0x17e   :  { %v1933_v61 = vpop.f32.mrf.mxu0 }
 0x17f   :  { %v1934_v6 = vadd.f32 %v1933_v61, %v1910_v14  ;;  %2918 = vmatpush.xpose.msrb.mxu2 %v2917_v15  ;;  %v2952_v14 = vsub.f32 %v2717_v7, %v2917_v15  ;;  %3011 = vmatpush.xpose.msra.mxu1 %v2917_v15 }
 0x180   :  { %v2007_v2 = vpop.f32.mrf.mxu3  ;;  %v1955_v62 = vpop.f32.mrf.mxu1 }
 0x181   :  { %v1981_v19 = vpop.f32.mrf.mxu2  ;;  %v1956_v3 = vadd.f32 %v1955_v62, %v1934_v6  ;;  %v2953_v6 = vand.u32 4294901760, %v2952_v14  ;;  %2983 = vmatpush.xpose.msra.mxu0 %v2952_v14 }
 0x182   :  { %v2008_v26 = vadd.f32 %v2007_v2, %v1981_v19  ;;  %2785 = vmatmul.f32.gmra.mxu1 %v8441_v5  ;;  %2924 = vmatmul.f32.vlgmr.msrb.gmra.mxu2 %v8507_v27 }
 0x183   :  { %v2708_v53 = vadd.f32 %v9045_v63, %v1956_v3  ;;  %v2954_v62 = vsub.f32 %v2952_v14, %v2953_v6  ;;  %3043 = vmatpush.xpose.msra.mxu2 %v2953_v6 }
 0x184   :  { %2872 = vmatmul.f32.gmra.mxu0 %v8441_v5 }
 0x185   :  { %4153 = vrot.lane.b32.xlu1 %v2708_v53, %s8396_s8 }
 0x186   :  { %v2031_v58 = vpop.f32.mrf.mxu0 }
 0x187   :  { %v2032_v10 = vadd.f32 %v2031_v58, %v2008_v26  ;;  %v2955_v26 = vand.u32 4294901760, %v2954_v62 }
 0x188   :  { %v2101_v13 = vpop.f32.mrf.mxu3  ;;  %v2055_v34 = vpop.f32.mrf.mxu1 }
 0x189   :  { %v2079_v57 = vpop.f32.mrf.mxu2  ;;  %v2056_v48 = vadd.f32 %v2055_v34, %v2032_v10  ;;  %2956 = vmatpush.xpose.msrb.mxu3 %v2955_v26 }
 0x18a   :  { %2894 = vmatmul.f32.vlgmr.msrb.gmra.mxu1 %v8439_v4  ;;  %2932 = vmatmul.f32.gmra.mxu2 %v8520_v31 }
 0x18b   :  { %v2080_v61 = vadd.f32 %v2079_v57, %v2056_v48 }
 0x18c   :  { %2958 = vmatmul.f32.vlgmr.msrb.gmra.mxu3 %v8454_v11  ;;  %2986 = vmatmul.f32.vlgmr.msra.gmra.mxu0 %v8475_v17 }
 0x18d   :  { %v2102_v2 = vadd.f32 %v2101_v13, %v2080_v61  ;;  %3069 = vmatpush.xpose.msra.mxu3 %v2917_v15 }
 0x18e   :  { %v2127_v0 = vpop.f32.mrf.mxu0 }
 0x18f   :  { %v2709_v19 = vadd.f32 %v9045_v63, %v2102_v2 }
 0x190   :  { %v2201_v3 = vpop.f32.mrf.mxu3  ;;  %v2153_v53 = vpop.f32.mrf.mxu1 }
 0x191   :  { %v2177_v58 = vpop.f32.mrf.mxu2  ;;  %v2154_v7 = vadd.f32 %v2153_v53, %v2127_v0  ;;  %4155 = vrot.lane.b32.xlu0 %v2709_v19, %s8396_s8 }
 0x192   :  { %2898 = vmatmul.f32.gmra.mxu1 %v8441_v5  ;;  %3045 = vmatmul.f32.vlgmr.msra.gmra.mxu2 %v8454_v11 }
 0x193   :  { %v2178_v10 = vadd.f32 %v2177_v58, %v2154_v7 }
 0x194   :  { %2962 = vmatmul.f32.gmra.mxu3 %v8491_v22  ;;  %2991 = vmatmul.f32.gmra.mxu0 %v8504_v25 }
 0x195   :  { %v2202_v13 = vadd.f32 %v2201_v3, %v2178_v10  ;;  %v2718_v3 = vmul.f32 %v9049_v20, %v8837_v60  ;;  %v2719_v10 = vmul.f32 %v9049_v20, %v8849_v50 }
 0x196   :  { %v2225_v34 = vpop.f32.mrf.mxu0 }
 0x197   :  { %v2226_v57 = vadd.f32 %v2225_v34, %v2202_v13  ;;  %v3094_v7 = vand.u32 4294901760, %v2718_v3 }
 0x198   :  { %v2299_v48 = vpop.f32.mrf.mxu3  ;;  %v2247_v14 = vpop.f32.mrf.mxu1 }
 0x199   :  { %v2273_v61 = vpop.f32.mrf.mxu2  ;;  %v2248_v6 = vadd.f32 %v2247_v14, %v2226_v57  ;;  %3095 = vmatpush.xpose.msrb.mxu0 %v3094_v7  ;;  %v3129_v34 = vsub.f32 %v2718_v3, %v3094_v7  ;;  %3188 = vmatpush.xpose.msrb.mxu3 %v3094_v7  ;;  %v3271_v57 = vand.u32 4294901760, %v2719_v10 }
 0x19a   :  { %v2300_v2 = vadd.f32 %v2299_v48, %v2273_v61  ;;  %3015 = vmatmul.f32.vlgmr.msra.gmra.mxu1 %v8489_v21  ;;  %3049 = vmatmul.f32.gmra.mxu2 %v8491_v22 }
 0x19b   :  { %v2710_v0 = vadd.f32 %v9045_v63, %v2248_v6  ;;  %v3130_v61 = vand.u32 4294901760, %v3129_v34  ;;  %3160 = vmatpush.xpose.msrb.mxu2 %v3129_v34  ;;  %v3306_v60 = vsub.f32 %v2719_v10, %v3271_v57 }
 0x19c   :  { %3071 = vmatmul.f32.vlgmr.msra.gmra.mxu3 %v8454_v11  ;;  %3101 = vmatmul.f32.vlgmr.msrb.gmra.mxu0 %v8559_v41 }
 0x19d   :  { %4157 = vrot.lane.b32.xlu2 %v2710_v0, %s8396_s8  ;;  %3220 = vmatpush.xpose.msra.mxu0 %v3130_v61 }
 0x19e   :  { %v2323_v15 = vpop.f32.mrf.mxu0 }
 0x19f   :  { %v2324_v62 = vadd.f32 %v2323_v15, %v2300_v2  ;;  %v3131_v2 = vsub.f32 %v3129_v34, %v3130_v61  ;;  %3272 = vmatpush.xpose.msra.mxu2 %v3271_v57 }
 0x1a0   :  { %v2393_v19 = vpop.f32.mrf.mxu3  ;;  %v2347_v26 = vpop.f32.mrf.mxu1 }
 0x1a1   :  { %v2371_v53 = vpop.f32.mrf.mxu2  ;;  %v2348_v58 = vadd.f32 %v2347_v26, %v2324_v62  ;;  %3337 = vmatpush.xpose.msrb.mxu0 %v3306_v60 }
 0x1a2   :  { %3021 = vmatmul.f32.gmra.mxu1 %v8510_v28  ;;  %3163 = vmatmul.f32.vlgmr.msrb.gmra.mxu2 %v8537_v35  ;;  %v9163_v35 = vstv %s8117_s9 }
 0x1a3   :  { %v2372_v13 = vadd.f32 %v2371_v53, %v2348_v58 }
 0x1a4   :  { %3075 = vmatmul.f32.gmra.mxu3 %v8491_v22  ;;  %3109 = vmatmul.f32.gmra.mxu0 %v8581_v47 }
 0x1a5   :  { %v2394_v48 = vadd.f32 %v2393_v19, %v2372_v13  ;;  %v3132_v19 = vand.u32 4294901760, %v3131_v2 }
 0x1a6   :  { %v2419_v14 = vpop.f32.mrf.mxu0 }
 0x1a7   :  { %v2711_v50 = vadd.f32 %v9045_v63, %v2394_v48  ;;  %3133 = vmatpush.xpose.msrb.mxu1 %v3132_v19 }
 0x1a8   :  { %v2493_v6 = vpop.f32.mrf.mxu3  ;;  %v2445_v0 = vpop.f32.mrf.mxu1 }
 0x1a9   :  { %v2469_v15 = vpop.f32.mrf.mxu2  ;;  %v2446_v62 = vadd.f32 %v2445_v0, %v2419_v14  ;;  %4159 = vrot.lane.b32.xlu1 %v2711_v50, %s8396_s8 }
 0x1aa   :  { %3135 = vmatmul.f32.vlgmr.msrb.gmra.mxu1 %v8530_v33  ;;  %3168 = vmatmul.f32.gmra.mxu2 %v8553_v39 }
 0x1ab   :  { %v2470_v3 = vadd.f32 %v2469_v15, %v2446_v62  ;;  %3246 = vmatpush.xpose.msra.mxu1 %v3094_v7  ;;  %v9103_v62 = vpop.permute.xlu1 %4431 }
 0x1ac   :  { %3192 = vmatmul.f32.vlgmr.msrb.gmra.mxu3 %v8543_v36  ;;  %3222 = vmatmul.f32.vlgmr.msra.gmra.mxu0 %v8530_v33 }
 0x1ad   :  { %v2494_v26 = vadd.f32 %v2493_v6, %v2470_v3  ;;  %v3307_v3 = vand.u32 4294901760, %v3306_v60 }
 0x1ae   :  { %v2517_v53 = vpop.f32.mrf.mxu0 }
 0x1af   :  { %v2518_v58 = vadd.f32 %v2517_v53, %v2494_v26  ;;  %3365 = vmatpush.xpose.msrb.mxu1 %v3271_v57  ;;  %v3308_v53 = vsub.f32 %v3306_v60, %v3307_v3  ;;  %3397 = vmatpush.xpose.msrb.mxu2 %v3307_v3  ;;  %v9145_v3 = vpop.permute.xlu2 %4441 }
 0x1b0   :  { %v2591_v10 = vpop.f32.mrf.mxu3  ;;  %v2539_v13 = vpop.f32.mrf.mxu1 }
 0x1b1   :  { %v2565_v34 = vpop.f32.mrf.mxu2  ;;  %v2540_v48 = vadd.f32 %v2539_v13, %v2518_v58  ;;  %v9111_v13 = vpop.permute.xlu0 %4446 }
 0x1b2   :  { %v2592_v14 = vadd.f32 %v2591_v10, %v2565_v34  ;;  %3139 = vmatmul.f32.gmra.mxu1 %v8546_v37  ;;  %3278 = vmatmul.f32.vlgmr.msra.gmra.mxu2 %v8591_v51  ;;  %v3309_v10 = vand.u32 4294901760, %v3308_v53  ;;  %v10197_v53 = vld [vmem:[#allocation48_spill] sm:$0xff] }
 0x1b3   :  { %v2712_v61 = vadd.f32 %v9045_v63, %v2540_v48  ;;  %v9115_v34 = vpop.permute.xlu1 %4436 }
 0x1b4   :  { %3198 = vmatmul.f32.gmra.mxu3 %v8562_v42  ;;  %3226 = vmatmul.f32.gmra.mxu0 %v8546_v37 }
 0x1b5   :  { %4161 = vrot.lane.b32.xlu1 %v2712_v61, %s8396_s8  ;;  %3310 = vmatpush.xpose.msra.mxu3 %v3309_v10  ;;  %v10199_v10 = vld [vmem:[#allocation49_spill] sm:$0xff] }
 0x1b6   :  { %v2615_v50 = vpop.f32.mrf.mxu0 }
 0x1b7   :  { %v2616_v7 = vadd.f32 %v2615_v50, %v2592_v14 }
 0x1b8   :  { %v2639_v6 = vpop.f32.mrf.mxu1  ;;  %v2685_v15 = vpop.f32.mrf.mxu3 }
 0x1b9   :  { %v2663_v2 = vpop.f32.mrf.mxu2  ;;  %v2640_v0 = vadd.f32 %v2639_v6, %v2616_v7  ;;  %3423 = vmatpush.xpose.msrb.mxu3 %v3271_v57  ;;  %v9119_v60 = vpop.permute.xlu0 %4456  ;;  %v2720_v57 = vmul.f32 %v9049_v20, %v8896_v30 }
 0x1ba   :  { %3248 = vmatmul.f32.vlgmr.msra.gmra.mxu1 %v8530_v33  ;;  %3286 = vmatmul.f32.gmra.mxu2 %v8604_v55 }
 0x1bb   :  { %v2664_v19 = vadd.f32 %v2663_v2, %v2640_v0  ;;  %v3448_v48 = vand.u32 4294901760, %v2720_v57 }
 0x1bc   :  { %3312 = vmatmul.f32.vlgmr.msra.gmra.mxu3 %v8555_v40  ;;  %3340 = vmatmul.f32.vlgmr.msrb.gmra.mxu0 %v8566_v43 }
 0x1bd   :  { %v2686_v26 = vadd.f32 %v2685_v15, %v2664_v19  ;;  %3449 = vmatpush.xpose.msra.mxu0 %v3448_v48  ;;  %v3483_v61 = vsub.f32 %v2720_v57, %v3448_v48  ;;  %3542 = vmatpush.xpose.msra.mxu3 %v3448_v48  ;;  %v10195_v15 = vld [vmem:[#allocation46_spill] sm:$0xff]  ;;  %v10196_v19 = vld [vmem:[#allocation57_spill] sm:$0xff]  ;;  %v9151_v57 = vpop.permute.xlu2 %4451 }
 0x1bf   :  { %v2713_v58 = vadd.f32 %v9045_v63, %v2686_v26  ;;  %v9123_v63 = vpop.permute.xlu1 %4466  ;;  %v3484_v7 = vand.u32 4294901760, %v3483_v61  ;;  %3514 = vmatpush.xpose.msra.mxu2 %v3483_v61 }
 0x1c1   :  { %4163 = vrot.lane.b32.xlu2 %v2713_v58, %s8396_s8  ;;  %v9129_v14 = vpop.permute.xlu0 %4461  ;;  %v3485_v6 = vsub.f32 %v3483_v61, %v3484_v7  ;;  %3574 = vmatpush.xpose.msrb.mxu0 %v3484_v7  ;;  %v10198_v58 = vld [vmem:[#allocation50_spill] sm:$0xff]  ;;  %v10200_v7 = vld [vmem:[#allocation53_spill] sm:$0xff] }
 0x1c2   :  { %3252 = vmatmul.f32.gmra.mxu1 %v8546_v37  ;;  %3399 = vmatmul.f32.vlgmr.msrb.gmra.mxu2 %v8555_v40 }
 0x1c3   :  { %v3486_v30 = vand.u32 4294901760, %v3485_v6 }
 0x1c4   :  { %3316 = vmatmul.f32.gmra.mxu3 %v8577_v46  ;;  %3345 = vmatmul.f32.gmra.mxu0 %v8588_v49 }
 0x1c5   :  { %3487 = vmatpush.xpose.msra.mxu1 %v3486_v30  ;;  %v9158_v6 = vpop.permute.xlu2 %4476 }
 0x1c7   :  { %v9133_v50 = vpop.permute.xlu1 %4471 }
 0x1c9   :  { %v9137_v2 = vpop.permute.xlu0 %4491 }
 0x1ca   :  { %3369 = vmatmul.f32.vlgmr.msrb.gmra.mxu1 %v8574_v45  ;;  %3403 = vmatmul.f32.gmra.mxu2 %v8577_v46 }
 0x1cb   :  { %3600 = vmatpush.xpose.msrb.mxu1 %v3448_v48 }
 0x1cc   :  { %3425 = vmatmul.f32.vlgmr.msrb.gmra.mxu3 %v8555_v40  ;;  %3455 = vmatmul.f32.vlgmr.msra.gmra.mxu0 %v8643_v1 }
 0x1cf   :  { %v9141_v0 = vpop.permute.xlu1 %4481 }
 0x1d2   :  { %3375 = vmatmul.f32.gmra.mxu1 %v8594_v52  ;;  %3517 = vmatmul.f32.vlgmr.msra.gmra.mxu2 %v8621_v59 }
 0x1d4   :  { %3429 = vmatmul.f32.gmra.mxu3 %v8577_v46  ;;  %3463 = vmatmul.f32.gmra.mxu0 %v10196_v19 }
 0x1d7   :  { %v9153_v61 = vpop.permute.xlu1 %4486 }
 0x1da   :  { %3489 = vmatmul.f32.vlgmr.msra.gmra.mxu1 %v10195_v15  ;;  %3522 = vmatmul.f32.gmra.mxu2 %v10198_v58 }
 0x1dc   :  { %3546 = vmatmul.f32.vlgmr.msra.gmra.mxu3 %v10197_v53  ;;  %3576 = vmatmul.f32.vlgmr.msrb.gmra.mxu0 %v10195_v15 }
 0x1df   :  { %v4150_v26 = vpop.permute.xlu0 %4149  ;;  %v9160_v30 = vpop.permute.xlu1 %4496 }
 0x1e2   :  { %3493 = vmatmul.f32.gmra.mxu1 %v10199_v10 }
 0x1e4   :  { %3552 = vmatmul.f32.gmra.mxu3 %v10200_v7  ;;  %3580 = vmatmul.f32.gmra.mxu0 %v10199_v10 }
 0x1e7   :  { %4173 = vxpose.xlu2.b32.start.end [1/1] (short) (narrow) %v4150_v26, 8 }
 0x1e9   :  { %v2748_v26 = vpop.f32.mrf.mxu0 }
 0x1ea   :  { %3602 = vmatmul.f32.vlgmr.msrb.gmra.mxu1 %v10195_v15  ;;  %v2749_v39 = vadd.f32 %v2748_v26, %v9163_v35 }
 0x1eb   :  { %v4152_v48 = vpop.permute.xlu0 %4151 }
 0x1ec   :  { %4205 = vxpose.xlu1.b32.start.end [1/1] (short) (narrow) %v4152_v48, 8 }
 0x1ef   :  { %v2839_v43 = vpop.f32.mrf.mxu3 }
 0x1f1   :  { %v2810_v58 = vpop.f32.mrf.mxu2  ;;  %v2756_v7 = vpop.f32.mrf.mxu0 }
 0x1f2   :  { %3606 = vmatmul.f32.gmra.mxu1 %v10199_v10  ;;  %v2757_v17 = vadd.f32 %v2756_v7, %v9163_v35 }
 0x1f7   :  { %v4158_v53 = vpop.permute.xlu2 %4157  ;;  %v4154_v59 = vpop.permute.xlu1 %4153 }
 0x1f8   :  { %4301 = vxpose.xlu2.b32.start.end [1/1] (short) (narrow) %v4158_v53, 8  ;;  %4237 = vxpose.xlu0.b32.start.end [1/1] (short) (narrow) %v4154_v59, 8  ;;  %v2782_v48 = vpop.f32.mrf.mxu1  ;;  %v2845_v45 = vpop.f32.mrf.mxu3 }
 0x1f9   :  { %v2815_v19 = vpop.f32.mrf.mxu2  ;;  %v2869_v49 = vpop.f32.mrf.mxu0  ;;  %v2783_v21 = vadd.f32 %v2782_v48, %v2749_v39 }
 0x1fb   :  { %v2811_v22 = vadd.f32 %v2810_v58, %v2783_v21 }
 0x1fd   :  { %v2840_v12 = vadd.f32 %v2839_v43, %v2811_v22 }
 0x1ff   :  { %v2870_v18 = vadd.f32 %v2869_v49, %v2840_v12 }
 0x200   :  { %v2786_v15 = vpop.f32.mrf.mxu1 }
 0x201   :  { %v2873_v42 = vpop.f32.mrf.mxu0  ;;  %v2787_v28 = vadd.f32 %v2786_v15, %v2757_v17 }
 0x203   :  { %v4156_v1 = vpop.permute.xlu0 %4155  ;;  %v2816_v27 = vadd.f32 %v2815_v19, %v2787_v28 }
 0x204   :  { %4269 = vxpose.xlu0.b32.start.end [1/1] (short) (narrow) %v4156_v1, 8 }
 0x205   :  { %v2925_v36 = vpop.f32.mrf.mxu2  ;;  %v2846_v16 = vadd.f32 %v2845_v45, %v2816_v27 }
 0x206   :  { %v2926_v5 = vadd.f32 %v2925_v36, %v9163_v35 }
 0x207   :  { %v2874_v39 = vadd.f32 %v2873_v42, %v2846_v16 }
 0x208   :  { %v2895_v52 = vpop.f32.mrf.mxu1 }
 0x209   :  { %v2987_v40 = vpop.f32.mrf.mxu0  ;;  %v2896_v48 = vadd.f32 %v2895_v52, %v2870_v18 }
 0x20d   :  { %v2933_v55 = vpop.f32.mrf.mxu2 }
 0x20e   :  { %v2934_v26 = vadd.f32 %v2933_v55, %v9163_v35 }
 0x20f   :  { %v2959_v51 = vpop.f32.mrf.mxu3 }
 0x210   :  { %v2899_v10 = vpop.f32.mrf.mxu1  ;;  %v2960_v28 = vadd.f32 %v2959_v51, %v2926_v5 }
 0x211   :  { %v2992_v46 = vpop.f32.mrf.mxu0  ;;  %v2900_v22 = vadd.f32 %v2899_v10, %v2874_v39  ;;  %v10201_v39 = vld [vmem:[#allocation95_spill] sm:$0xff] }
 0x212   :  { %v2988_v45 = vadd.f32 %v2987_v40, %v2960_v28 }
 0x215   :  { %v3046_v1 = vpop.f32.mrf.mxu2 }
 0x217   :  { %v2963_v53 = vpop.f32.mrf.mxu3 }
 0x218   :  { %v3016_v59 = vpop.f32.mrf.mxu1  ;;  %v2964_v15 = vadd.f32 %v2963_v53, %v2934_v26 }
 0x219   :  { %v3102_v47 = vpop.f32.mrf.mxu0  ;;  %v3017_v40 = vadd.f32 %v3016_v59, %v2988_v45 }
 0x21a   :  { %v2993_v55 = vadd.f32 %v2992_v46, %v2964_v15  ;;  %v3103_v51 = vadd.f32 %v3102_v47, %v9163_v35 }
 0x21b   :  { %v9167_v31 = vpop.permute.xlu2 %4163  ;;  %v9175_v17 = vpop.permute.xlu1 %4159  ;;  %v3047_v10 = vadd.f32 %v3046_v1, %v3017_v40 }
 0x21d   :  { %v3050_v41 = vpop.f32.mrf.mxu2 }
 0x21f   :  { %v3072_v33 = vpop.f32.mrf.mxu3 }
 0x220   :  { %v3022_v37 = vpop.f32.mrf.mxu1 }
 0x221   :  { %v9169_v9 = vpop.f32.mrf.mxu0  ;;  %v3023_v46 = vadd.f32 %v3022_v37, %v2993_v55  ;;  %v10202_v55 = vld [vmem:[#allocation59_spill] sm:$0xff] }
 0x223   :  { %v3051_v53 = vadd.f32 %v3050_v41, %v3023_v46 }
 0x225   :  { %v3164_v8 = vpop.f32.mrf.mxu2 }
 0x227   :  { %v3076_v25 = vpop.f32.mrf.mxu3  ;;  %v9191_v49 = vpop.permute.xlu1 %4161 }
 0x228   :  { %v3136_v11 = vpop.f32.mrf.mxu1 }
 0x229   :  { %v3223_v43 = vpop.f32.mrf.mxu0 }
 0x22d   :  { %v9177_v58 = vpop.f32.mrf.mxu2 }
 0x22f   :  { %v3193_v4 = vpop.f32.mrf.mxu3 }
 0x230   :  { %v9173_v7 = vpop.f32.mrf.mxu1 }
 0x231   :  { %v9194_v26 = vpop.f32.mrf.mxu0 }
 0x237   :  { %v9185_v42 = vpop.f32.mrf.mxu3 }
 0x238   :  { %v3249_v52 = vpop.f32.mrf.mxu1 }
 0x23f   :  { %v3313_v15 = vpop.f32.mrf.mxu3 }
 0x280   :  { %v4189_v21 = vpop.trf.xlu2 }
 0x281   :  { %v4509_v19 = vperm.slane %v4189_v21, 0  ;;  %v2721_v21 = vmul.f32 %v9049_v20, %v10201_v39 }
 0x283   :  { %v4517_v27 = vadd.f32 %v4509_v19, %v9103_v62  ;;  %v4518_v36 = vadd.f32 %v4509_v19, %v9115_v34  ;;  %v3137_v62 = vadd.f32 %v3136_v11, %v3103_v51  ;;  %v3279_v34 = vpop.f32.mrf.mxu2 }
 0x284   :  { %v3280_v1 = vadd.f32 %v3279_v34, %v9163_v35  ;;  %v3317_v34 = vpop.f32.mrf.mxu3 }
 0x285   :  { %v9181_v12 = vadd.f32 %v4518_v36, %v2900_v22  ;;  %v9183_v16 = vadd.f32 %v4517_v27, %v2896_v48  ;;  %v3165_v28 = vadd.f32 %v3164_v8, %v3137_v62  ;;  %v3073_v48 = vadd.f32 %v3072_v33, %v3047_v10  ;;  %v9198_v36 = vpop.f32.mrf.mxu1  ;;  %v10204_v62 = vld [vmem:[#allocation54_spill] sm:$0xff] }
 0x286   :  { %v3077_v22 = vadd.f32 %v3076_v25, %v3051_v53  ;;  %v3625_v27 = vand.u32 4294901760, %v2721_v21  ;;  %v3314_v40 = vadd.f32 %v3313_v15, %v3280_v1 }
 0x287   :  { %v4553_v5 = vsel %vm4549_vm0, %v9181_v12, -inf  ;;  %v4550_v18 = vsel %vm4549_vm0, %v9183_v16, -inf  ;;  %v3194_v59 = vadd.f32 %v3193_v4, %v3165_v28 }
 0x288   :  { %4554 = vmax.xlane.f32.xlu1 %v4553_v5  ;;  %4551 = vmax.xlane.f32.xlu0 %v4550_v18  ;;  %v3660_v41 = vsub.f32 %v2721_v21, %v3625_v27  ;;  %v10203_v5 = vld [vmem:[#allocation55_spill] sm:$0xff]  ;;  %v3341_v18 = vpop.f32.mrf.mxu0 }
 0x289   :  { %3626 = vmatpush.xpose.msrb.mxu2 %v3625_v27  ;;  %3719 = vmatpush.xpose.msra.mxu1 %v3625_v27  ;;  %v3224_v51 = vadd.f32 %v3223_v43, %v3194_v59  ;;  %v3342_v28 = vadd.f32 %v3341_v18, %v3314_v40  ;;  %v10209_v59 = vld [vmem:[#allocation103_spill] sm:$0xff]  ;;  %v10210_v40 = vld [vmem:[#allocation56_spill] sm:$0xff] }
 0x28a   :  { %v3661_v33 = vand.u32 4294901760, %v3660_v41  ;;  %3691 = vmatpush.xpose.msra.mxu0 %v3660_v41  ;;  %v2722_v1 = vmul.f32 %v9049_v20, %v10209_v59 }
 0x28b   :  { %v3287_v25 = vpop.f32.mrf.mxu2  ;;  %v3250_v21 = vadd.f32 %v3249_v52, %v3224_v51 }
 0x28c   :  { %3632 = vmatmul.f32.vlgmr.msrb.gmra.mxu2 %v10202_v55  ;;  %3723 = vmatmul.f32.vlgmr.msra.gmra.mxu1 %v10203_v5  ;;  %v3662_v4 = vsub.f32 %v3660_v41, %v3661_v33  ;;  %v3288_v10 = vadd.f32 %v3287_v25, %v9163_v35 }
 0x28d   :  { %3751 = vmatpush.xpose.msra.mxu2 %v3661_v33  ;;  %3694 = vmatmul.f32.vlgmr.msra.gmra.mxu0 %v10204_v62  ;;  %v3370_v53 = vpop.f32.mrf.mxu1 }
 0x28e   :  { %v3663_v46 = vand.u32 4294901760, %v3662_v4  ;;  %v3318_v43 = vadd.f32 %v3317_v34, %v3288_v10 }
 0x290   :  { %v4221_v19 = vpop.trf.xlu1  ;;  %3664 = vmatpush.xpose.msrb.mxu3 %v3663_v46  ;;  %v3346_v52 = vpop.f32.mrf.mxu0 }
 0x291   :  { %v4510_v47 = vperm.slane %v4221_v19, 0  ;;  %v3347_v33 = vadd.f32 %v3346_v52, %v3318_v43 }
 0x293   :  { %v4519_v37 = vadd.f32 %v4510_v47, %v9145_v3  ;;  %v4520_v11 = vadd.f32 %v4510_v47, %v9111_v13  ;;  %v10207_v47 = vld [vmem:[#allocation60_spill] sm:$0xff] }
 0x294   :  { %3777 = vmatpush.xpose.msra.mxu3 %v3625_v27  ;;  %3729 = vmatmul.f32.gmra.mxu1 %v10207_v47  ;;  %v10208_v27 = vld [vmem:[#allocation58_spill] sm:$0xff] }
 0x295   :  { %v9203_v45 = vadd.f32 %v4520_v11, %v3077_v22  ;;  %v9205_v8 = vadd.f32 %v4519_v37, %v3073_v48  ;;  %v10205_v48 = vld [vmem:[#allocation51_spill] sm:$0xff]  ;;  %v10206_v22 = vld [vmem:[#allocation61_spill] sm:$0xff]  ;;  %v3400_v37 = vpop.f32.mrf.mxu2  ;;  %v3371_v11 = vadd.f32 %v3370_v53, %v3342_v28  ;;  %3699 = vmatmul.f32.gmra.mxu0 %v10208_v27  ;;  %v3376_v51 = vpop.f32.mrf.mxu1 }
 0x296   :  { %3666 = vmatmul.f32.vlgmr.msrb.gmra.mxu3 %v10205_v48  ;;  %3640 = vmatmul.f32.gmra.mxu2 %v10206_v22  ;;  %v3377_v34 = vadd.f32 %v3376_v51, %v3347_v33  ;;  %v10216_v51 = vld [vmem:[#allocation64_spill] sm:$0xff] }
 0x297   :  { %v4559_v13 = vsel %vm4549_vm0, %v9203_v45, -inf  ;;  %v4556_v3 = vsel %vm4549_vm0, %v9205_v8, -inf  ;;  %v3401_v4 = vadd.f32 %v3400_v37, %v3371_v11 }
 0x298   :  { %4560 = vmax.xlane.f32.xlu2 %v4559_v13  ;;  %4557 = vmax.xlane.f32.xlu0 %v4556_v3  ;;  %v1401_v13 = vadd.f32 %v9019_v32, %v9021_v54  ;;  %v3802_v3 = vand.u32 4294901760, %v2722_v1 }
 0x29a   :  { %v1429_v18 = vadd.f32 %v9029_v38, %v1401_v13  ;;  %v3837_v46 = vsub.f32 %v2722_v1, %v3802_v3  ;;  %3896 = vmatpush.xpose.msrb.mxu3 %v3802_v3  ;;  %3803 = vmatpush.xpose.msrb.mxu0 %v3802_v3  ;;  %v10212_v13 = vld [vmem:[#allocation62_spill] sm:$0xff] }
 0x29c   :  { %v9215_v39 = vpop.trf.xlu0  ;;  %v3838_v53 = vand.u32 4294901760, %v3837_v46  ;;  %3868 = vmatpush.xpose.msrb.mxu2 %v3837_v46  ;;  %v1458_v32 = vadd.f32 %v9033_v24, %v1429_v18  ;;  %v10214_v18 = vld [vmem:[#allocation63_spill] sm:$0xff] }
 0x29d   :  { %v10081_v19 = vperm.slane %v9215_v39, 0  ;;  %v3404_v28 = vpop.f32.mrf.mxu2 }
 0x29e   :  { %3670 = vmatmul.f32.gmra.mxu3 %v10210_v40  ;;  %3753 = vmatmul.f32.vlgmr.msra.gmra.mxu2 %v10205_v48  ;;  %v3839_v43 = vsub.f32 %v3837_v46, %v3838_v53  ;;  %v3405_v38 = vadd.f32 %v3404_v28, %v3377_v34  ;;  %v1488_v59 = vadd.f32 %v9035_v29, %v1458_v32  ;;  %v10217_v46 = vld [vmem:[#allocation66_spill] sm:$0xff]  ;;  %v8246_v34 = vld [vmem:[#allocation6 + $0x38] sm:$0xff]  ;;  %v10218_v32 = vld [vmem:[#allocation84_spill] sm:$0xff] }
 0x29f   :  { %v4521_v15 = vadd.f32 %v10081_v19, %v9151_v57  ;;  %v3426_v57 = vpop.f32.mrf.mxu3  ;;  %3928 = vmatpush.xpose.msra.mxu0 %v3838_v53  ;;  %v3490_v53 = vpop.f32.mrf.mxu1  ;;  %v10229_v19 = vld [vmem:[#allocation72_spill] sm:$0xff] }
 0x2a0   :  { %v3840_v11 = vand.u32 4294901760, %v3839_v43 }
 0x2a1   :  { %v9224_v41 = vadd.f32 %v4521_v15, %v3250_v21  ;;  %v3427_v21 = vadd.f32 %v3426_v57, %v3401_v4  ;;  %v10211_v15 = vld [vmem:[#allocation68_spill] sm:$0xff]  ;;  %v10213_v57 = vld [vmem:[#allocation73_spill] sm:$0xff] }
 0x2a2   :  { %3809 = vmatmul.f32.vlgmr.msrb.gmra.mxu0 %v10211_v15  ;;  %3841 = vmatpush.xpose.msrb.mxu1 %v3840_v11 }
 0x2a3   :  { %v4562_v25 = vsel %vm4549_vm0, %v9224_v41, -inf }
 0x2a4   :  { %4563 = vmax.xlane.f32.xlu0 %v4562_v25 }
 0x2a5   :  { %3843 = vmatmul.f32.vlgmr.msrb.gmra.mxu1 %v10212_v13 }
 0x2a6   :  { %3779 = vmatmul.f32.vlgmr.msra.gmra.mxu3 %v10205_v48  ;;  %3757 = vmatmul.f32.gmra.mxu2 %v10210_v40 }
 0x2a7   :  { %v3430_v1 = vpop.f32.mrf.mxu3  ;;  %3954 = vmatpush.xpose.msra.mxu1 %v3802_v3  ;;  %v10215_v3 = vld [vmem:[#allocation65_spill] sm:$0xff] }
 0x2a8   :  { %v4285_v10 = vpop.trf.xlu0  ;;  %v3431_v33 = vadd.f32 %v3430_v1, %v3405_v38  ;;  %v10222_v1 = vld [vmem:[#allocation79_spill] sm:$0xff] }
 0x2a9   :  { %v4512_v54 = vperm.slane %v4285_v10, 0  ;;  %v2723_v10 = vmul.f32 %v8246_v34, %v9049_v20  ;;  %v10220_v20 = vld [vmem:[#allocation75_spill] sm:$0xff]  ;;  %v10224_v34 = vld [vmem:[#allocation81_spill] sm:$0xff] }
 0x2aa   :  { %3817 = vmatmul.f32.gmra.mxu0 %v10213_v57 }
 0x2ab   :  { %v4523_v37 = vadd.f32 %v4512_v54, %v9129_v14  ;;  %v4524_v24 = vadd.f32 %v4512_v54, %v9123_v63  ;;  %v1514_v14 = vadd.f32 %v9031_v44, %v1488_v59  ;;  %v3456_v44 = vpop.f32.mrf.mxu0  ;;  %v3518_v59 = vpop.f32.mrf.mxu2 }
 0x2ac   :  { %v3457_v28 = vadd.f32 %v3456_v44, %v9163_v35 }
 0x2ad   :  { %v9239_v52 = vadd.f32 %v4523_v37, %v3427_v21  ;;  %v9250_v29 = vadd.f32 %v4524_v24, %v3431_v33  ;;  %v2703_v4 = vadd.f32 %v8739_v56, %v1514_v14  ;;  %3847 = vmatmul.f32.gmra.mxu1 %v10215_v3  ;;  %v3979_v21 = vand.u32 4294901760, %v2723_v10  ;;  %v10219_v37 = vld [vmem:[#allocation69_spill] sm:$0xff] }
 0x2ae   :  { %3783 = vmatmul.f32.gmra.mxu3 %v10210_v40  ;;  %3871 = vmatmul.f32.vlgmr.msrb.gmra.mxu2 %v10214_v18  ;;  %v3491_v33 = vadd.f32 %v3490_v53, %v3457_v28 }
 0x2af   :  { %v4568_v25 = vsel %vm4549_vm0, %v9239_v52, -inf  ;;  %v4571_v63 = vsel %vm4549_vm0, %v9250_v29, -inf  ;;  %3980 = vmatpush.xpose.msra.mxu2 %v3979_v21  ;;  %v4014_v54 = vsub.f32 %v2723_v10, %v3979_v21  ;;  %4073 = vmatpush.xpose.msrb.mxu1 %v3979_v21  ;;  %v3547_v14 = vpop.f32.mrf.mxu3  ;;  %v10225_v10 = vld [vmem:[#allocation67_spill] sm:$0xff] }
 0x2b0   :  { %4569 = vmax.xlane.f32.xlu2 %v4568_v25  ;;  %v3494_v25 = vpop.f32.mrf.mxu1  ;;  %v3519_v44 = vadd.f32 %v3518_v59, %v3491_v33 }
 0x2b1   :  { %v4015_v43 = vand.u32 4294901760, %v4014_v54  ;;  %4045 = vmatpush.xpose.msrb.mxu0 %v4014_v54 }
 0x2b2   :  { %3930 = vmatmul.f32.vlgmr.msra.gmra.mxu0 %v10212_v13  ;;  %v3548_v28 = vadd.f32 %v3547_v14, %v3519_v44 }
 0x2b3   :  { %v3464_v38 = vpop.f32.mrf.mxu0  ;;  %v4016_v11 = vsub.f32 %v4014_v54, %v4015_v43  ;;  %4105 = vmatpush.xpose.msrb.mxu2 %v4015_v43  ;;  %v10226_v54 = vld [vmem:[#allocation77_spill] sm:$0xff]  ;;  %v3523_v43 = vpop.f32.mrf.mxu2 }
 0x2b5   :  { %3956 = vmatmul.f32.vlgmr.msra.gmra.mxu1 %v10212_v13  ;;  %v4017_v24 = vand.u32 4294901760, %v4016_v11  ;;  %v4317_v11 = vpop.trf.xlu2 }
 0x2b6   :  { %3900 = vmatmul.f32.vlgmr.msrb.gmra.mxu3 %v10216_v51  ;;  %3876 = vmatmul.f32.gmra.mxu2 %v10217_v46 }
 0x2b7   :  { %4754 = vmatpush.msra.mxu1 %v10218_v32  ;;  %4018 = vmatpush.xpose.msra.mxu3 %v4017_v24  ;;  %v4513_v24 = vperm.slane %v4317_v11, 0 }
 0x2b8   :  { %4572 = vmax.xlane.f32.xlu2 %v4571_v63  ;;  %4501 = vperm.xlu0 %8132, %v2703_v4   ;;  %v10223_v4 = vld [vmem:[#allocation70_spill] sm:$0xff]  ;;  %v3465_v63 = vadd.f32 %v3464_v38, %v9163_v35 }
 0x2b9   :  { %v10228_v38 = vld [vmem:[#allocation74_spill] sm:$0xff] }
 0x2ba   :  { %3934 = vmatmul.f32.gmra.mxu0 %v10215_v3  ;;  %v3495_v32 = vadd.f32 %v3494_v25, %v3465_v63  ;;  %v4525_v63 = vadd.f32 %v4513_v24, %v9133_v50 }
 0x2bb   :  { %4131 = vmatpush.xpose.msrb.mxu3 %v3979_v21  ;;  %v3577_v53 = vpop.f32.mrf.mxu0  ;;  %v3603_v21 = vpop.f32.mrf.mxu1 }
 0x2bc   :  { %v3578_v59 = vadd.f32 %v3577_v53, %v3548_v28  ;;  %v3524_v33 = vadd.f32 %v3523_v43, %v3495_v32  ;;  %v10232_v32 = vld [vmem:[#allocation85_spill] sm:$0xff]  ;;  %v4526_v28 = vadd.f32 %v4513_v24, %v9158_v6 }
 0x2bd   :  { %3960 = vmatmul.f32.gmra.mxu1 %v10215_v3 }
 0x2be   :  { %3906 = vmatmul.f32.gmra.mxu3 %v10219_v37  ;;  %3986 = vmatmul.f32.vlgmr.msra.gmra.mxu2 %v10220_v20  ;;  %v3604_v25 = vadd.f32 %v3603_v21, %v3578_v59 }
 0x2bf   :  { %4781 = vmatpush.msra.mxu2 %v10222_v1  ;;  %v10227_v1 = vld [vmem:[#allocation71_spill] sm:$0xff] }
 0x2c0   :  { %v9286_v51 = vadd.f32 %v4525_v63, %v3604_v25  ;;  %v3111_v25 = vadd.f32 %v9169_v9, %v9163_v35 }
 0x2c2   :  { %4333 = vxpose.xlu1.b32.start.end [1/1] (short) (narrow) %v9175_v17, 8  ;;  %v10221_v17 = vld [vmem:[#allocation78_spill] sm:$0xff]  ;;  %4048 = vmatmul.f32.vlgmr.msrb.gmra.mxu0 %v10223_v4  ;;  %v10230_v4 = vld [vmem:[#allocation80_spill] sm:$0xff]  ;;  %v4574_v50 = vsel %vm4549_vm0, %v9286_v51, -inf }
 0x2c3   :  { %4716 = vmatpush.msra.mxu0 %v10221_v17  ;;  %v3581_v44 = vpop.f32.mrf.mxu0  ;;  %v3607_v53 = vpop.f32.mrf.mxu1 }
 0x2c5   :  { %4841 = vmatpush.msrb.mxu0 %v10224_v34  ;;  %4077 = vmatmul.f32.vlgmr.msrb.gmra.mxu1 %v10227_v1  ;;  %v3553_v34 = vpop.f32.mrf.mxu3  ;;  %v10231_v1 = vld [vmem:[#allocation76_spill] sm:$0xff] }
 0x2c6   :  { %4020 = vmatmul.f32.vlgmr.msra.gmra.mxu3 %v10225_v10  ;;  %3994 = vmatmul.f32.gmra.mxu2 %v10226_v54  ;;  %v3554_v14 = vadd.f32 %v3553_v34, %v3524_v33 }
 0x2c7   :  { %4809 = vmatpush.msra.mxu3 %v10221_v17  ;;  %4867 = vmatpush.msrb.mxu1 %v10221_v17 }
 0x2c8   :  { %v3582_v17 = vadd.f32 %v3581_v44, %v3554_v14 }
 0x2ca   :  { %4053 = vmatmul.f32.gmra.mxu0 %v10228_v38  ;;  %v3608_v43 = vadd.f32 %v3607_v53, %v3582_v17  ;;  %v3141_v17 = vadd.f32 %v9173_v7, %v3111_v25 }
 0x2cc   :  { %v9295_v11 = vadd.f32 %v4526_v28, %v3608_v43  ;;  %v3170_v43 = vadd.f32 %v9177_v58, %v3141_v17 }
 0x2cd   :  { %4083 = vmatmul.f32.gmra.mxu1 %v10231_v1 }
 0x2ce   :  { %4024 = vmatmul.f32.gmra.mxu3 %v10229_v19  ;;  %4107 = vmatmul.f32.vlgmr.msrb.gmra.mxu2 %v10225_v10  ;;  %v4577_v21 = vsel %vm4549_vm0, %v9295_v11, -inf  ;;  %v3200_v17 = vadd.f32 %v9185_v42, %v3170_v43 }
 0x2cf   :  { %4899 = vmatpush.msrb.mxu2 %v10230_v4 }
 0x2d6   :  { %4133 = vmatmul.f32.vlgmr.msrb.gmra.mxu3 %v10225_v10  ;;  %4111 = vmatmul.f32.gmra.mxu2 %v10229_v19 }
 0x2d7   :  { %4937 = vmatpush.msrb.mxu3 %v10232_v32 }
 0x2de   :  { %4137 = vmatmul.f32.gmra.mxu3 %v10229_v19 }
 0x2e1   :  { %4365 = vxpose.xlu2.b32.start.end [1/1] (short) (narrow) %v9191_v49, 8 }
 0x2e2   :  { %4575 = vmax.xlane.f32.xlu0 %v4574_v50 }
 0x2ea   :  { %4578 = vmax.xlane.f32.xlu0 %v4577_v21 }
 0x2fb   :  { %v9300_v59 = vpop.xlane.xlu0 %4551  ;;  %v9302_v33 = vpop.xlane.xlu1 %4554 }
 0x2fc   :  { %v4598_v6 = vsub.f32 %v9183_v16, %v9300_v59  ;;  %v4599_v49 = vsub.f32 %v9181_v12, %v9302_v33 }
 0x2fe   :  { %v4614_v24 = vmul.f32 1.442695, %v4598_v6  ;;  %v4616_v34 = vmul.f32 1.442695, %v4599_v49 }
 0x300   :  { %8134 = vpow2.f32 %v4614_v24  ;;  %v10233_v24 = vld [vmem:[#allocation83_spill] sm:$0xff] }
 0x301   :  { %8136 = vpow2.f32 %v4616_v34 }
 0x306   :  { %v9310_v14 = vpop.eup %8134 }
 0x307   :  { %v9312_v63 = vpop.eup %8136  ;;  %v4695_v44 = vsel %vm4549_vm0, %v9310_v14, 0 }
 0x308   :  { %v9317_v16 = vand.u32 4294901760, %v4695_v44  ;;  %v4698_v12 = vsel %vm4549_vm0, %v9312_v63, 0 }
 0x309   :  { %v9321_v53 = vand.u32 4294901760, %v4698_v12 }
 0x30a   :  { %4756 = vmatmul.f32.vlgmr.msra.gmra.mxu1 %v9317_v16  ;;  %v4718_v9 = vsub.f32 %v4695_v44, %v9317_v16 }
 0x30b   :  { %v9325_v32 = vpop.xlane.xlu2 %4560  ;;  %v9327_v28 = vpop.xlane.xlu0 %4557  ;;  %4992 = vmatpush.msra.mxu1 %v10230_v4  ;;  %v4726_v49 = vsub.f32 %v4698_v12, %v9321_v53  ;;  %v3228_v12 = vadd.f32 %v9194_v26, %v3200_v17 }
 0x30c   :  { %v4601_v7 = vsub.f32 %v9203_v45, %v9325_v32  ;;  %v4600_v50 = vsub.f32 %v9205_v8, %v9327_v28  ;;  %4784 = vmatmul.f32.vlgmr.msra.gmra.mxu2 %v4718_v9  ;;  %v6245_v21 = vmax.f32 %v9327_v28, %v9325_v32  ;;  %v4719_v6 = vand.u32 4294901760, %v4718_v9 }
 0x30d   :  { %5024 = vmatpush.msra.mxu2 %v10233_v24  ;;  %v4727_v38 = vand.u32 4294901760, %v4726_v49  ;;  %v10236_v24 = vperm.slane %v9215_v39, 0  ;;  %v10237_v39 = vld [vmem:[#allocation92_spill] sm:$0xff] }
 0x30e   :  { %v4620_v34 = vmul.f32 1.442695, %v4601_v7  ;;  %v4618_v25 = vmul.f32 1.442695, %v4600_v50  ;;  %v6246_v44 = vrot.slane %v6245_v21, 4  ;;  %4813 = vmatmul.f32.vlgmr.msra.gmra.mxu3 %v4719_v6  ;;  %v4720_v58 = vsub.f32 %v4718_v9, %v4719_v6  ;;  %v10234_v7 = vld [vmem:[#allocation82_spill] sm:$0xff] }
 0x30f   :  { %5050 = vmatpush.msra.mxu3 %v10230_v4  ;;  %v4728_v9 = vsub.f32 %v4726_v49, %v4727_v38  ;;  %v4522_v26 = vadd.f32 %v10236_v24, %v9119_v60 }
 0x310   :  { %8138 = vpow2.f32 %v4620_v34  ;;  %v6247_v45 = vmax.f32 %v6245_v21, %v6246_v44  ;;  %v4721_v8 = vand.u32 4294901760, %v4720_v58  ;;  %v3254_v21 = vadd.f32 %v9198_v36, %v3228_v12 }
 0x311   :  { %8140 = vpow2.f32 %v4618_v25 }
 0x312   :  { %4760 = vmatmul.f32.gmra.mxu1 %v9321_v53  ;;  %v6248_v1 = vrot.slane %v6247_v45, 2  ;;  %4722 = vmatmul.f32.vlgmr.msra.gmra.mxu0 %v4721_v8 }
 0x313   :  { %4964 = vmatpush.msra.mxu0 %v10234_v7 }
 0x314   :  { %4789 = vmatmul.f32.gmra.mxu2 %v4726_v49  ;;  %v6249_v50 = vmax.f32 %v6247_v45, %v6248_v1  ;;  %v4729_v49 = vand.u32 4294901760, %v4728_v9  ;;  %v9368_v45 = vadd.f32 %v4522_v26, %v3254_v21  ;;  %v10240_v21 = vld [vmem:[#allocation113_spill] sm:$0xff]  ;;  %v10241_v26 = vld [vmem:[#allocation112_spill] sm:$0xff] }
 0x316   :  { %v9344_v6 = vpop.eup %8138  ;;  %v6250_v4 = vrot.slane %v6249_v50, 1  ;;  %4819 = vmatmul.f32.gmra.mxu3 %v4727_v38 }
 0x317   :  { %10235 = vst [vmem:[#allocation95_spill] sm:$0xff] %v9344_v6  ;;  %v9346_v42 = vpop.eup %8140  ;;  %v4881_v43 = vsel %vm4549_vm0, %v9344_v6, 0  ;;  %v9358_v58 = vpop.xlane.xlu0 %4563 }
 0x318   :  { %v4878_v34 = vsel %vm4549_vm0, %v9346_v42, 0  ;;  %v9356_v1 = vmax.f32 %v6249_v50, %v6250_v4  ;;  %v4908_v44 = vand.u32 4294901760, %v4881_v43  ;;  %v4602_v17 = vsub.f32 %v9224_v41, %v9358_v58  ;;  %v10238_v50 = vld [vmem:[#allocation86_spill] sm:$0xff]  ;;  %v10239_v41 = vld [vmem:[#allocation87_spill] sm:$0xff] }
 0x319   :  { %v4900_v25 = vand.u32 4294901760, %v4878_v34  ;;  %v4565_v4 = vsel %vm4549_vm0, %v9368_v45, -inf }
 0x31a   :  { %4869 = vmatmul.f32.vlgmr.msrb.gmra.mxu1 %v9317_v16  ;;  %4730 = vmatmul.f32.gmra.mxu0 %v4729_v49  ;;  %v4909_v12 = vsub.f32 %v4881_v43, %v4908_v44  ;;  %v4622_v9 = vmul.f32 1.442695, %v4602_v17  ;;  %v10242_v17 = vld [vmem:[#allocation114_spill] sm:$0xff] }
 0x31b   :  { %v4901_v60 = vsub.f32 %v4878_v34, %v4900_v25  ;;  %5120 = vmatpush.msrb.mxu1 %v10237_v39  ;;  %v1405_v34 = vadd.f32 %v10241_v26, %v10240_v21 }
 0x31c   :  { %v4910_v49 = vand.u32 4294901760, %v4909_v12  ;;  %8142 = vpow2.f32 %v4622_v9 }
 0x31d   :  { %v4902_v8 = vand.u32 4294901760, %v4901_v60 }
 0x31e   :  { %4939 = vmatmul.f32.vlgmr.msrb.gmra.mxu3 %v4900_v25  ;;  %v4911_v43 = vsub.f32 %v4909_v12, %v4910_v49 }
 0x31f   :  { %v4903_v7 = vsub.f32 %v4901_v60, %v4902_v8  ;;  %5175 = vmatpush.msrb.mxu3 %v10238_v50 }
 0x320   :  { %v4912_v39 = vand.u32 4294901760, %v4911_v43  ;;  %v10245_v43 = vld [vmem:[#allocation117_spill] sm:$0xff] }
 0x321   :  { %v4904_v24 = vand.u32 4294901760, %v4903_v7  ;;  %v1434_v7 = vadd.f32 %v10242_v17, %v1405_v34  ;;  %v10248_v34 = vld [vmem:[#allocation115_spill] sm:$0xff] }
 0x322   :  { %4566 = vmax.xlane.f32.xlu1 %v4565_v4  ;;  %4873 = vmatmul.f32.gmra.mxu1 %v9321_v53  ;;  %v9380_v4 = vpop.eup %8142 }
 0x323   :  { %4843 = vmatmul.f32.vlgmr.msrb.gmra.mxu0 %v9317_v16  ;;  %4905 = vmatmul.f32.vlgmr.msrb.gmra.mxu2 %v4904_v24  ;;  %v10243_v16 = vld [vmem:[#allocation116_spill] sm:$0xff]  ;;  %v5061_v9 = vsel %vm4549_vm0, %v9380_v4, 0 }
 0x324   :  { %5082 = vmatpush.msrb.mxu0 %v10238_v50  ;;  %5147 = vmatpush.msrb.mxu2 %v10239_v41  ;;  %v1464_v24 = vadd.f32 %v10243_v16, %v1434_v7  ;;  %v10244_v41 = vld [vmem:[#allocation93_spill] sm:$0xff]  ;;  %v9388_v21 = vand.u32 4294901760, %v5061_v9 }
 0x326   :  { %4943 = vmatmul.f32.gmra.mxu3 %v4908_v44  ;;  %v1492_v26 = vadd.f32 %v10245_v43, %v1464_v24  ;;  %v3695_v24 = vpop.f32.mrf.mxu0 }
 0x32a   :  { %4996 = vmatmul.f32.vlgmr.msra.gmra.mxu1 %v4902_v8  ;;  %v10246_v8 = vld [vmem:[#allocation88_spill] sm:$0xff] }
 0x32b   :  { %4847 = vmatmul.f32.gmra.mxu0 %v9321_v53  ;;  %4913 = vmatmul.f32.gmra.mxu2 %v4912_v39  ;;  %v10247_v53 = vld [vmem:[#allocation89_spill] sm:$0xff]  ;;  %v1518_v39 = vadd.f32 %v10248_v34, %v1492_v26 }
 0x32c   :  { %5233 = vmatpush.msra.mxu1 %v10238_v50  ;;  %v5084_v50 = vsub.f32 %v5061_v9, %v9388_v21  ;;  %v10249_v9 = vld [vmem:[#allocation91_spill] sm:$0xff] }
 0x32d   :  { %v2704_v7 = vadd.f32 %v8739_v56, %v1518_v39  ;;  %v10250_v56 = vld [vmem:[#allocation90_spill] sm:$0xff] }
 0x32e   :  { %5052 = vmatmul.f32.vlgmr.msra.gmra.mxu3 %v4900_v25  ;;  %v5085_v17 = vand.u32 4294901760, %v5084_v50  ;;  %v3700_v43 = vpop.f32.mrf.mxu0 }
 0x32f   :  { %5303 = vmatpush.msra.mxu3 %v10244_v41 }
 0x332   :  { %5002 = vmatmul.f32.gmra.mxu1 %v4910_v49  ;;  %v3633_v49 = vpop.f32.mrf.mxu2 }
 0x333   :  { %4967 = vmatmul.f32.vlgmr.msra.gmra.mxu0 %v4901_v60  ;;  %5026 = vmatmul.f32.vlgmr.msra.gmra.mxu2 %v4900_v25  ;;  %v5086_v25 = vsub.f32 %v5084_v50, %v5085_v17  ;;  %v3667_v60 = vpop.f32.mrf.mxu3  ;;  %v3634_v34 = vadd.f32 %v3633_v49, %v9163_v35 }
 0x334   :  { %5265 = vmatpush.msra.mxu2 %v10246_v8  ;;  %5207 = vmatpush.msra.mxu0 %v10247_v53 }
 0x335   :  { %v5087_v16 = vand.u32 4294901760, %v5086_v25 }
 0x336   :  { %5056 = vmatmul.f32.gmra.mxu3 %v4908_v44 }
 0x33a   :  { %5122 = vmatmul.f32.vlgmr.msrb.gmra.mxu1 %v9388_v21  ;;  %v3641_v41 = vpop.f32.mrf.mxu2 }
 0x33b   :  { %4972 = vmatmul.f32.gmra.mxu0 %v4909_v12  ;;  %5030 = vmatmul.f32.gmra.mxu2 %v4908_v44  ;;  %v3724_v12 = vpop.f32.mrf.mxu1  ;;  %v3671_v44 = vpop.f32.mrf.mxu3 }
 0x33c   :  { %4506 = vperm.xlu1 %8130, %v2704_v7   ;;  %5358 = vmatpush.msrb.mxu1 %v10246_v8  ;;  %v3810_v7 = vpop.f32.mrf.mxu0 }
 0x33d   :  { %v3811_v49 = vadd.f32 %v3810_v7, %v9163_v35 }
 0x33e   :  { %5179 = vmatmul.f32.vlgmr.msrb.gmra.mxu3 %v5085_v17  ;;  %v3668_v17 = vadd.f32 %v3667_v60, %v3634_v34 }
 0x33f   :  { %5416 = vmatpush.msrb.mxu3 %v10246_v8  ;;  %v3642_v8 = vadd.f32 %v3641_v41, %v9163_v35  ;;  %v9405_v41 = vpop.xlane.xlu2 %4569 }
 0x341   :  { %v3672_v36 = vadd.f32 %v3671_v44, %v3642_v8 }
 0x342   :  { %v3754_v26 = vpop.f32.mrf.mxu2 }
 0x343   :  { %5088 = vmatmul.f32.vlgmr.msrb.gmra.mxu0 %v5087_v16  ;;  %5150 = vmatmul.f32.vlgmr.msrb.gmra.mxu2 %v5084_v50  ;;  %v3730_v53 = vpop.f32.mrf.mxu1  ;;  %v3780_v39 = vpop.f32.mrf.mxu3  ;;  %v3696_v50 = vadd.f32 %v3695_v24, %v3668_v17 }
 0x344   :  { %5390 = vmatpush.msrb.mxu2 %v10249_v9  ;;  %5330 = vmatpush.msrb.mxu0 %v10250_v56  ;;  %v3701_v56 = vadd.f32 %v3700_v43, %v3672_v36  ;;  %v3818_v37 = vpop.f32.mrf.mxu0 }
 0x345   :  { %v3725_v38 = vadd.f32 %v3724_v12, %v3696_v50  ;;  %v3819_v34 = vadd.f32 %v3818_v37, %v9163_v35 }
 0x346   :  { %v3731_v54 = vadd.f32 %v3730_v53, %v3701_v56 }
 0x347   :  { %v3755_v20 = vadd.f32 %v3754_v26, %v3725_v38 }
 0x349   :  { %v3781_v3 = vadd.f32 %v3780_v39, %v3755_v20 }
 0x34a   :  { %v3758_v25 = vpop.f32.mrf.mxu2 }
 0x34b   :  { %v3844_v16 = vpop.f32.mrf.mxu1  ;;  %v3784_v9 = vpop.f32.mrf.mxu3  ;;  %v3759_v17 = vadd.f32 %v3758_v25, %v3731_v54 }
 0x34c   :  { %v3845_v12 = vadd.f32 %v3844_v16, %v3811_v49  ;;  %v3931_v38 = vpop.f32.mrf.mxu0 }
 0x34d   :  { %v3785_v26 = vadd.f32 %v3784_v9, %v3759_v17 }
 0x352   :  { %v3872_v10 = vpop.f32.mrf.mxu2 }
 0x353   :  { %v3848_v19 = vpop.f32.mrf.mxu1  ;;  %v3901_v24 = vpop.f32.mrf.mxu3  ;;  %v3873_v54 = vadd.f32 %v3872_v10, %v3845_v12 }
 0x354   :  { %v3849_v36 = vadd.f32 %v3848_v19, %v3819_v34  ;;  %v3935_v10 = vpop.f32.mrf.mxu0 }
 0x355   :  { %v3902_v8 = vadd.f32 %v3901_v24, %v3873_v54  ;;  %v4652_v54 = vsel %vm4549_vm0, %v9346_v42, 0.0  ;;  %v4658_v42 = vsel %vm4549_vm0, %v9380_v4, 0.0 }
 0x357   :  { %v3932_v9 = vadd.f32 %v3931_v38, %v3902_v8 }
 0x35a   :  { %v3877_v39 = vpop.f32.mrf.mxu2 }
 0x35b   :  { %v3878_v7 = vadd.f32 %v3877_v39, %v3849_v36 }
 0x366   :  { %v4349_v13 = vpop.trf.xlu1 }
 0x367   :  { %v4514_v60 = vperm.slane %v4349_v13, 0  ;;  %v10251_v13 = vsub.f32 %v9327_v28, %v9356_v1  ;;  %v10252_v28 = vsub.f32 %v9325_v32, %v9356_v1  ;;  %v9431_v32 = vpop.permute.xlu0 %4501 }
 0x369   :  { %v4527_v44 = vadd.f32 %v4514_v60, %v9141_v0  ;;  %v4528_v53 = vadd.f32 %v4514_v60, %v9153_v61  ;;  %v6314_v37 = vmul.f32 1.442695, %v10251_v13  ;;  %v3957_v0 = vpop.f32.mrf.mxu1  ;;  %v3907_v61 = vpop.f32.mrf.mxu3  ;;  %v6316_v16 = vmul.f32 1.442695, %v10252_v28 }
 0x36a   :  { %v3908_v25 = vadd.f32 %v3907_v61, %v3878_v7  ;;  %v3958_v34 = vadd.f32 %v3957_v0, %v3932_v9 }
 0x36b   :  { %v9408_v43 = vadd.f32 %v4527_v44, %v3781_v3  ;;  %v9417_v19 = vadd.f32 %v4528_v53, %v3785_v26  ;;  %8144 = vpow2.f32 %v6314_v37  ;;  %v9419_v3 = vpop.xlane.xlu2 %4572 }
 0x36c   :  { %v3936_v56 = vadd.f32 %v3935_v10, %v3908_v25  ;;  %8146 = vpow2.f32 %v6316_v16  ;;  %v4605_v37 = vsub.f32 %v9250_v29, %v9419_v3 }
 0x36d   :  { %v4580_v20 = vsel %vm4549_vm0, %v9408_v43, -inf  ;;  %v4583_v50 = vsel %vm4549_vm0, %v9417_v19, -inf }
 0x36e   :  { %4581 = vmax.xlane.f32.xlu0 %v4580_v20  ;;  %v4649_v20 = vsel %vm4549_vm0, %v9312_v63, 0.0  ;;  %v4628_v7 = vmul.f32 1.442695, %v4605_v37 }
 0x371   :  { %4397 = vxpose.xlu1.b32.start.end [1/1] (short) (narrow) %v9167_v31, 8  ;;  %v9426_v31 = vpop.eup %8144  ;;  %v3961_v49 = vpop.f32.mrf.mxu1 }
 0x372   :  { %10253 = vst [vmem:[#allocation59_spill] sm:$0xff] %v9426_v31  ;;  %v3962_v24 = vadd.f32 %v3961_v49, %v3936_v56  ;;  %v9437_v38 = vpop.eup %8146 }
 0x373   :  { %10254 = vst [vmem:[#allocation51_spill] sm:$0xff] %v9437_v38 }
 0x376   :  { %4584 = vmax.xlane.f32.xlu0 %v4583_v50 }
 0x379   :  { %6430 = vxpose.xlu1.b32.start [1/2] (short) (narrow) %v9426_v31, 8 }
 0x37a   :  { %v4381_v60 = vpop.trf.xlu2 }
 0x37b   :  { %v4515_v17 = vperm.slane %v4381_v60, 0 }
 0x37d   :  { %v4529_v44 = vadd.f32 %v4515_v17, %v9137_v2  ;;  %v4530_v12 = vadd.f32 %v4515_v17, %v9160_v30  ;;  %v4604_v2 = vsub.f32 %v9239_v52, %v9405_v41  ;;  %v9446_v30 = vpop.xlane.xlu0 %4575 }
 0x37f   :  { %v9433_v1 = vadd.f32 %v4529_v44, %v3958_v34  ;;  %v9435_v36 = vadd.f32 %v4530_v12, %v3962_v24  ;;  %v4626_v13 = vmul.f32 1.442695, %v4604_v2 }
 0x381   :  { %6431 = vxpose.xlu1.b32.end [2/2] (short) (narrow) %v9437_v38, 8  ;;  %v4586_v26 = vsel %vm4549_vm0, %v9433_v1, -inf  ;;  %v4589_v53 = vsel %vm4549_vm0, %v9435_v36, -inf  ;;  %8148 = vpow2.f32 %v4626_v13 }
 0x382   :  { %4587 = vmax.xlane.f32.xlu2 %v4586_v26  ;;  %4590 = vmax.xlane.f32.xlu0 %v4589_v53  ;;  %8150 = vpow2.f32 %v4628_v7 }
 0x385   :  { %v9452_v39 = vpop.xlane.xlu0 %4578 }
 0x386   :  { %v6266_v52 = vmax.f32 %v9446_v30, %v9452_v39 }
 0x387   :  { %v8149_v0 = vpop.eup %8148 }
 0x388   :  { %v5244_v25 = vsel %vm4549_vm0, %v8149_v0, 0  ;;  %v6267_v29 = vrot.slane %v6266_v52, 4  ;;  %v8151_v49 = vpop.eup %8150 }
 0x389   :  { %v9463_v10 = vand.u32 4294901760, %v5244_v25  ;;  %v5247_v44 = vsel %vm4549_vm0, %v8151_v49, 0 }
 0x38a   :  { %4650 = vadd.xlane.f32.xlu2 %v4649_v20  ;;  %v6268_v9 = vmax.f32 %v6266_v52, %v6267_v29  ;;  %v9472_v20 = vand.u32 4294901760, %v5247_v44 }
 0x38b   :  { %v9466_v60 = vsub.f32 %v5244_v25, %v9463_v10 }
 0x38c   :  { %v6269_v24 = vrot.slane %v6268_v9, 2  ;;  %v9477_v29 = vsub.f32 %v5247_v44, %v9472_v20 }
 0x38d   :  { %v5268_v2 = vand.u32 4294901760, %v9466_v60 }
 0x38e   :  { %v6270_v13 = vmax.f32 %v6268_v9, %v6269_v24 }
 0x38f   :  { %v5269_v25 = vsub.f32 %v9466_v60, %v5268_v2 }
 0x392   :  { %4653 = vadd.xlane.f32.xlu2 %v4652_v54 }
 0x395   :  { %v4567_v61 = vpop.xlane.xlu1 %4566 }
 0x396   :  { %v4603_v63 = vsub.f32 %v9368_v45, %v4567_v61  ;;  %v6252_v8 = vmax.f32 %v9358_v58, %v4567_v61 }
 0x398   :  { %v4624_v50 = vmul.f32 1.442695, %v4603_v63  ;;  %v6253_v28 = vrot.slane %v6252_v8, 4 }
 0x39a   :  { %8152 = vpow2.f32 %v4624_v50  ;;  %v6254_v16 = vmax.f32 %v6252_v8, %v6253_v28  ;;  %4659 = vadd.xlane.f32.xlu2 %v4658_v42  ;;  %v4606_v50 = vsub.f32 %v9286_v51, %v9446_v30  ;;  %v6271_v28 = vrot.slane %v6270_v13, 1 }
 0x39c   :  { %v6255_v56 = vrot.slane %v6254_v16, 2  ;;  %v6272_v9 = vmax.f32 %v6270_v13, %v6271_v28  ;;  %v10258_v13 = vld [vmem:[#allocation94_spill] sm:$0xff] }
 0x39e   :  { %v6256_v45 = vmax.f32 %v6254_v16, %v6255_v56  ;;  %v4630_v16 = vmul.f32 1.442695, %v4606_v50  ;;  %v5270_v56 = vand.u32 4294901760, %v5269_v25  ;;  %v6302_v44 = vsub.f32 %v9446_v30, %v6272_v9  ;;  %v9507_v25 = vpop.f32.mrf.mxu3  ;;  %v10260_v50 = vld [vmem:[#allocation97_spill] sm:$0xff] }
 0x3a0   :  { %v8153_v34 = vpop.eup %8152  ;;  %v6257_v17 = vrot.slane %v6256_v45, 1 }
 0x3a1   :  { %v4661_v12 = vsel %vm4549_vm0, %v8153_v34, 0.0  ;;  %v5064_v4 = vsel %vm4549_vm0, %v8153_v34, 0  ;;  %v10255_v34 = vld [vmem:[#allocation101_spill] sm:$0xff] }
 0x3a2   :  { %v6258_v26 = vmax.f32 %v6256_v45, %v6257_v17  ;;  %4662 = vadd.xlane.f32.xlu2 %v4661_v12  ;;  %v5091_v53 = vand.u32 4294901760, %v5064_v4  ;;  %v5276_v45 = vand.u32 4294901760, %v9477_v29  ;;  %v4607_v17 = vsub.f32 %v9295_v11, %v9452_v39 }
 0x3a4   :  { %v6298_v37 = vsub.f32 %v9358_v58, %v6258_v26  ;;  %v6299_v54 = vsub.f32 %v4567_v61, %v6258_v26  ;;  %5126 = vmatmul.f32.gmra.mxu1 %v5091_v53  ;;  %v5092_v7 = vsub.f32 %v5064_v4, %v5091_v53  ;;  %v4664_v58 = vsel %vm4549_vm0, %v8149_v0, 0.0  ;;  %v10256_v0 = vld [vmem:[#allocation96_spill] sm:$0xff] }
 0x3a5   :  { %v5277_v4 = vsub.f32 %v9477_v29, %v5276_v45  ;;  %v4667_v26 = vsel %vm4549_vm0, %v8151_v49, 0.0 }
 0x3a6   :  { %v6318_v52 = vmul.f32 1.442695, %v6298_v37  ;;  %v6320_v63 = vmul.f32 1.442695, %v6299_v54  ;;  %5155 = vmatmul.f32.gmra.mxu2 %v5092_v7  ;;  %v5093_v8 = vand.u32 4294901760, %v5092_v7 }
 0x3a7   :  { %v4632_v37 = vmul.f32 1.442695, %v4607_v17  ;;  %v6326_v54 = vmul.f32 1.442695, %v6302_v44  ;;  %v5278_v11 = vand.u32 4294901760, %v5277_v4  ;;  %v10264_v17 = vld [vmem:[#allocation100_spill] sm:$0xff] }
 0x3a8   :  { %8154 = vpow2.f32 %v6318_v52  ;;  %5185 = vmatmul.f32.gmra.mxu3 %v5093_v8  ;;  %v5094_v42 = vsub.f32 %v5092_v7, %v5093_v8  ;;  %v6303_v7 = vsub.f32 %v9452_v39, %v6272_v9  ;;  %v9523_v9 = vpop.f32.mrf.mxu1 }
 0x3a9   :  { %8156 = vpow2.f32 %v6320_v63  ;;  %v9500_v63 = vpop.f32.mrf.mxu2 }
 0x3aa   :  { %4665 = vadd.xlane.f32.xlu2 %v4664_v58  ;;  %v5095_v61 = vand.u32 4294901760, %v5094_v42  ;;  %8158 = vpow2.f32 %v4630_v16  ;;  %v6328_v52 = vmul.f32 1.442695, %v6303_v7  ;;  %v10262_v42 = vld [vmem:[#allocation98_spill] sm:$0xff] }
 0x3ab   :  { %8160 = vpow2.f32 %v4632_v37 }
 0x3ac   :  { %5096 = vmatmul.f32.gmra.mxu0 %v5095_v61  ;;  %5235 = vmatmul.f32.vlgmr.msra.gmra.mxu1 %v9388_v21  ;;  %8162 = vpow2.f32 %v6326_v54 }
 0x3ad   :  { %5486 = vmatpush.msra.mxu1 %v10255_v34  ;;  %8164 = vpow2.f32 %v6328_v52  ;;  %v10266_v52 = vld [vmem:[#allocation110_spill] sm:$0xff] }
 0x3ae   :  { %v8155_v51 = vpop.eup %8154  ;;  %5271 = vmatmul.f32.vlgmr.msra.gmra.mxu2 %v5270_v56  ;;  %v9525_v56 = vpop.f32.mrf.mxu0 }
 0x3af   :  { %v8157_v24 = vpop.eup %8156  ;;  %6462 = vxpose.xlu1.b32.start [1/2] (short) (narrow) %v8155_v51, 8  ;;  %5513 = vmatpush.msra.mxu2 %v10256_v0 }
 0x3b0   :  { %v9489_v12 = vadd.f32 %v8157_v24, %v8155_v51  ;;  %5305 = vmatmul.f32.vlgmr.msra.gmra.mxu3 %v9463_v10  ;;  %v8159_v30 = vpop.eup %8158 }
 0x3b1   :  { %5541 = vmatpush.msra.mxu3 %v10258_v13  ;;  %v4670_v49 = vsel %vm4549_vm0, %v8159_v30, 0.0  ;;  %v5427_v39 = vsel %vm4549_vm0, %v8159_v30, 0  ;;  %v9518_v61 = vpop.f32.mrf.mxu2 }
 0x3b2   :  { %10257 = vst [vmem:[#allocation61_spill] sm:$0xff] %v9489_v12  ;;  %4668 = vadd.xlane.f32.xlu2 %v4667_v26  ;;  %v5449_v28 = vand.u32 4294901760, %v5427_v39 }
 0x3b4   :  { %5209 = vmatmul.f32.vlgmr.msra.gmra.mxu0 %v9388_v21  ;;  %5239 = vmatmul.f32.gmra.mxu1 %v5091_v53  ;;  %v8161_v21 = vpop.eup %8160  ;;  %v5450_v16 = vsub.f32 %v5427_v39, %v5449_v28 }
 0x3b5   :  { %5448 = vmatpush.msra.mxu0 %v10258_v13  ;;  %v9503_v8 = vpop.eup %8162 }
 0x3b6   :  { %5279 = vmatmul.f32.gmra.mxu2 %v5278_v11  ;;  %10259 = vst [vmem:[#allocation60_spill] sm:$0xff] %v9503_v8  ;;  %v9516_v58 = vpop.eup %8164  ;;  %v9538_v44 = vpop.f32.mrf.mxu0 }
 0x3b7   :  { %6463 = vxpose.xlu1.b32.end [2/2] (short) (narrow) %v8157_v24, 8  ;;  %10263 = vst [vmem:[#allocation103_spill] sm:$0xff] %v9516_v58 }
 0x3b8   :  { %5309 = vmatmul.f32.gmra.mxu3 %v9472_v20 }
 0x3b9   :  { %v9533_v0 = vpop.f32.mrf.mxu2 }
 0x3ba   :  { %4671 = vadd.xlane.f32.xlu2 %v4670_v49 }
 0x3bc   :  { %5213 = vmatmul.f32.gmra.mxu0 %v5091_v53  ;;  %5362 = vmatmul.f32.vlgmr.msrb.gmra.mxu1 %v5268_v2  ;;  %v4673_v53 = vsel %vm4549_vm0, %v8161_v21, 0.0  ;;  %v10261_v2 = vld [vmem:[#allocation102_spill] sm:$0xff] }
 0x3bd   :  { %5599 = vmatpush.msrb.mxu1 %v10258_v13  ;;  %v10265_v13 = vld [vmem:[#allocation99_spill] sm:$0xff] }
 0x3be   :  { %5392 = vmatmul.f32.vlgmr.msrb.gmra.mxu2 %v9463_v10  ;;  %v9547_v7 = vpop.f32.mrf.mxu0 }
 0x3bf   :  { %6526 = vxpose.xlu1.b32.start [1/2] (short) (narrow) %v9503_v8, 8  ;;  %5631 = vmatpush.msrb.mxu2 %v10260_v50 }
 0x3c0   :  { %5418 = vmatmul.f32.vlgmr.msrb.gmra.mxu3 %v9463_v10  ;;  %v5430_v10 = vsel %vm4549_vm0, %v8161_v21, 0 }
 0x3c1   :  { %5669 = vmatpush.msrb.mxu3 %v10261_v2  ;;  %v5457_v34 = vand.u32 4294901760, %v5430_v10  ;;  %v9543_v54 = vpop.f32.mrf.mxu2  ;;  %v10267_v2 = vld [vmem:[#allocation104_spill] sm:$0xff] }
 0x3c2   :  { %4674 = vadd.xlane.f32.xlu2 %v4673_v53 }
 0x3c3   :  { %v5458_v24 = vsub.f32 %v5430_v10, %v5457_v34 }
 0x3c4   :  { %5333 = vmatmul.f32.vlgmr.msrb.gmra.mxu0 %v9466_v60  ;;  %5368 = vmatmul.f32.gmra.mxu1 %v5276_v45  ;;  %v9528_v60 = vpop.f32.mrf.mxu3  ;;  %v5451_v45 = vand.u32 4294901760, %v5450_v16 }
 0x3c5   :  { %5573 = vmatpush.msrb.mxu0 %v10262_v42  ;;  %v5459_v26 = vand.u32 4294901760, %v5458_v24 }
 0x3c6   :  { %5396 = vmatmul.f32.gmra.mxu2 %v9472_v20  ;;  %v5452_v51 = vsub.f32 %v5450_v16, %v5451_v45 }
 0x3c7   :  { %6527 = vxpose.xlu1.b32.end [2/2] (short) (narrow) %v9516_v58, 8  ;;  %v5460_v37 = vsub.f32 %v5458_v24, %v5459_v26 }
 0x3c8   :  { %5422 = vmatmul.f32.gmra.mxu3 %v9472_v20  ;;  %v9536_v20 = vpop.f32.mrf.mxu1  ;;  %v5453_v4 = vand.u32 4294901760, %v5452_v51 }
 0x3c9   :  { %v5461_v11 = vand.u32 4294901760, %v5460_v37 }
 0x3cc   :  { %5338 = vmatmul.f32.gmra.mxu0 %v9477_v29  ;;  %5488 = vmatmul.f32.vlgmr.msra.gmra.mxu1 %v5449_v28  ;;  %v9540_v29 = vpop.f32.mrf.mxu3 }
 0x3cd   :  { %5724 = vmatpush.msra.mxu1 %v10260_v50 }
 0x3ce   :  { %5516 = vmatmul.f32.vlgmr.msra.gmra.mxu2 %v5450_v16  ;;  %v4731_v16 = vpop.f32.mrf.mxu0 }
 0x3cf   :  { %5756 = vmatpush.msra.mxu2 %v10264_v17 }
 0x3d0   :  { %5545 = vmatmul.f32.vlgmr.msra.gmra.mxu3 %v5451_v45  ;;  %v9545_v30 = vpop.f32.mrf.mxu1 }
 0x3d1   :  { %5782 = vmatpush.msra.mxu3 %v10260_v50  ;;  %v9556_v50 = vpop.f32.mrf.mxu2 }
 0x3d4   :  { %5454 = vmatmul.f32.vlgmr.msra.gmra.mxu0 %v5453_v4  ;;  %5492 = vmatmul.f32.gmra.mxu1 %v5457_v34  ;;  %v9549_v49 = vpop.f32.mrf.mxu3 }
 0x3d5   :  { %5696 = vmatpush.msra.mxu0 %v10265_v13 }
 0x3d6   :  { %5521 = vmatmul.f32.gmra.mxu2 %v5458_v24 }
 0x3d8   :  { %5551 = vmatmul.f32.gmra.mxu3 %v5459_v26  ;;  %v4761_v42 = vpop.f32.mrf.mxu1 }
 0x3d9   :  { %v4790_v13 = vpop.f32.mrf.mxu2 }
 0x3dc   :  { %5462 = vmatmul.f32.gmra.mxu0 %v5461_v11  ;;  %5601 = vmatmul.f32.vlgmr.msrb.gmra.mxu1 %v5449_v28  ;;  %v9559_v10 = vpop.f32.mrf.mxu3 }
 0x3dd   :  { %5852 = vmatpush.msrb.mxu1 %v10266_v52 }
 0x3e0   :  { %v9571_v52 = vpop.f32.mrf.mxu1 }
 0x3e1   :  { %v9552_v21 = vpop.xlane.xlu0 %4581  ;;  %v4906_v38 = vpop.f32.mrf.mxu2 }
 0x3e2   :  { %v4608_v39 = vsub.f32 %v9408_v43, %v9552_v21 }
 0x3e4   :  { %v4634_v53 = vmul.f32 1.442695, %v4608_v39  ;;  %5575 = vmatmul.f32.vlgmr.msrb.gmra.mxu0 %v5449_v28  ;;  %5605 = vmatmul.f32.gmra.mxu1 %v5457_v34 }
 0x3e5   :  { %5814 = vmatpush.msrb.mxu0 %v10267_v2 }
 0x3e6   :  { %8166 = vpow2.f32 %v4634_v53 }
 0x3e9   :  { %v9561_v45 = vpop.xlane.xlu0 %4584  ;;  %v9603_v5 = vpop.f32.mrf.mxu2 }
 0x3ea   :  { %v4609_v51 = vsub.f32 %v9417_v19, %v9561_v45  ;;  %v6273_v43 = vmax.f32 %v9552_v21, %v9561_v45  ;;  %v9573_v19 = vpop.f32.mrf.mxu0  ;;  %10270 = vst [vmem:[#allocation56_spill] sm:$0xff] %v9603_v5 }
 0x3ec   :  { %v8167_v24 = vpop.eup %8166  ;;  %v4636_v17 = vmul.f32 1.442695, %v4609_v51  ;;  %v6274_v4 = vrot.slane %v6273_v43, 4  ;;  %5579 = vmatmul.f32.gmra.mxu0 %v5457_v34  ;;  %v4820_v34 = vpop.f32.mrf.mxu3 }
 0x3ed   :  { %v5610_v28 = vsel %vm4549_vm0, %v8167_v24, 0  ;;  %v4676_v26 = vsel %vm4549_vm0, %v8167_v24, 0.0 }
 0x3ee   :  { %8168 = vpow2.f32 %v4636_v17  ;;  %v6275_v37 = vmax.f32 %v6273_v43, %v6274_v4  ;;  %4677 = vadd.xlane.f32.xlu2 %v4676_v26  ;;  %v9569_v11 = vand.u32 4294901760, %v5610_v28 }
 0x3f0   :  { %v6276_v39 = vrot.slane %v6275_v37, 2  ;;  %5671 = vmatmul.f32.vlgmr.msrb.gmra.mxu3 %v9569_v11  ;;  %v5633_v53 = vsub.f32 %v5610_v28, %v9569_v11  ;;  %v10268_v28 = vld [vmem:[#allocation107_spill] sm:$0xff] }
 0x3f1   :  { %5907 = vmatpush.msrb.mxu3 %v10267_v2 }
 0x3f2   :  { %v6277_v51 = vmax.f32 %v6275_v37, %v6276_v39  ;;  %v5634_v24 = vand.u32 4294901760, %v5633_v53  ;;  %v4848_v15 = vpop.f32.mrf.mxu0 }
 0x3f4   :  { %v8169_v58 = vpop.eup %8168  ;;  %v6278_v17 = vrot.slane %v6277_v51, 1  ;;  %5699 = vmatmul.f32.vlgmr.msra.gmra.mxu0 %v5633_v53  ;;  %5728 = vmatmul.f32.vlgmr.msra.gmra.mxu1 %v5634_v24  ;;  %v5635_v43 = vsub.f32 %v5633_v53, %v5634_v24  ;;  %v4940_v46 = vpop.f32.mrf.mxu3 }
 0x3f5   :  { %v9578_v4 = vpop.xlane.xlu2 %4587  ;;  %v9580_v26 = vpop.xlane.xlu0 %4590  ;;  %v4679_v8 = vsel %vm4549_vm0, %v8169_v58, 0.0  ;;  %v5613_v12 = vsel %vm4549_vm0, %v8169_v58, 0  ;;  %5965 = vmatpush.msra.mxu1 %v10267_v2  ;;  %5939 = vmatpush.msra.mxu0 %v10268_v28 }
 0x3f6   :  { %v9586_v37 = vmax.f32 %v6277_v51, %v6278_v17  ;;  %v4610_v39 = vsub.f32 %v9433_v1, %v9578_v4  ;;  %v4611_v53 = vsub.f32 %v9435_v36, %v9580_v26  ;;  %v6280_v24 = vmax.f32 %v9578_v4, %v9580_v26  ;;  %4680 = vadd.xlane.f32.xlu2 %v4679_v8  ;;  %v4874_v36 = vpop.f32.mrf.mxu1  ;;  %v10269_v8 = vld [vmem:[#allocation105_spill] sm:$0xff] }
 0x3f7   :  { %v5636_v31 = vand.u32 4294901760, %v5635_v43  ;;  %v9594_v18 = vand.u32 4294901760, %v5613_v12  ;;  %v4762_v43 = vadd.f32 %v4761_v42, %v4731_v16 }
 0x3f8   :  { %v4638_v51 = vmul.f32 1.442695, %v4610_v39  ;;  %v4640_v17 = vmul.f32 1.442695, %v4611_v53  ;;  %v6281_v28 = vrot.slane %v6280_v24, 4 }
 0x3f9   :  { %5637 = vmatmul.f32.vlgmr.msrb.gmra.mxu2 %v5636_v31  ;;  %5675 = vmatmul.f32.gmra.mxu3 %v9594_v18  ;;  %v5641_v1 = vsub.f32 %v5613_v12, %v9594_v18  ;;  %v4791_v31 = vadd.f32 %v4790_v13, %v4762_v43  ;;  %v10271_v13 = vld [vmem:[#allocation111_spill] sm:$0xff] }
 0x3fa   :  { %8170 = vpow2.f32 %v4638_v51  ;;  %5879 = vmatpush.msrb.mxu2 %v10269_v8  ;;  %v6282_v58 = vmax.f32 %v6280_v24, %v6281_v28 }
 0x3fb   :  { %8172 = vpow2.f32 %v4640_v17  ;;  %v5642_v62 = vand.u32 4294901760, %v5641_v1 }
 0x3fc   :  { %5704 = vmatmul.f32.gmra.mxu0 %v5641_v1  ;;  %v6283_v2 = vrot.slane %v6282_v58, 2  ;;  %v9619_v5 = vpop.f32.mrf.mxu3 }
 0x3fd   :  { %5734 = vmatmul.f32.gmra.mxu1 %v5642_v62  ;;  %v4651_v39 = vpop.xlane.xlu2 %4650  ;;  %v5643_v53 = vsub.f32 %v5641_v1, %v5642_v62  ;;  %v3988_v1 = vadd.f32 %v9500_v63, %v9163_v35 }
 0x3fe   :  { %8174 = vrcp.f32 %v4651_v39  ;;  %v6284_v57 = vmax.f32 %v6282_v58, %v6283_v2  ;;  %v4821_v58 = vadd.f32 %v4820_v34, %v4791_v31  ;;  %v4997_v43 = vpop.f32.mrf.mxu1 }
 0x3ff   :  { %v5644_v27 = vand.u32 4294901760, %v5643_v53  ;;  %v4968_v53 = vpop.f32.mrf.mxu0 }
 0x400   :  { %v8171_v12 = vpop.eup %8170  ;;  %v6285_v42 = vrot.slane %v6284_v57, 1 }
 0x401   :  { %v8173_v51 = vpop.eup %8172  ;;  %v5793_v8 = vsel %vm4549_vm0, %v8171_v12, 0  ;;  %5645 = vmatmul.f32.gmra.mxu2 %v5644_v27  ;;  %5784 = vmatmul.f32.vlgmr.msra.gmra.mxu3 %v9569_v11  ;;  %v4682_v16 = vsel %vm4549_vm0, %v8171_v12, 0.0  ;;  %v4941_v27 = vadd.f32 %v4940_v46, %v4906_v38  ;;  %v10272_v38 = vld [vmem:[#allocation106_spill] sm:$0xff] }
 0x402   :  { %4683 = vadd.xlane.f32.xlu2 %v4682_v16  ;;  %v9608_v24 = vand.u32 4294901760, %v5793_v8  ;;  %v5796_v62 = vsel %vm4549_vm0, %v8173_v51, 0  ;;  %6035 = vmatpush.msra.mxu3 %v10271_v13  ;;  %v6286_v2 = vmax.f32 %v6284_v57, %v6285_v42  ;;  %v4849_v16 = vadd.f32 %v4848_v15, %v4821_v58 }
 0x403   :  { %v9612_v17 = vand.u32 4294901760, %v5796_v62 }
 0x404   :  { %v8175_v28 = vpop.eup %8174  ;;  %v9617_v12 = vsub.f32 %v5793_v8, %v9608_v24  ;;  %v6306_v6 = vsub.f32 %v9578_v4, %v6286_v2  ;;  %v6307_v34 = vsub.f32 %v9580_v26, %v6286_v2  ;;  %v4969_v8 = vadd.f32 %v4968_v53, %v4941_v27  ;;  %v5027_v27 = vpop.f32.mrf.mxu2 }
 0x405   :  { %v6175_v57 = vmul.f32 %v8175_v28, %v4651_v39  ;;  %5854 = vmatmul.f32.vlgmr.msrb.gmra.mxu1 %v9608_v24  ;;  %v4654_v31 = vpop.xlane.xlu2 %4653  ;;  %v9626_v46 = vsub.f32 %v5796_v62, %v9612_v17  ;;  %v4022_v4 = vadd.f32 %v9507_v25, %v3988_v1  ;;  %v3996_v26 = vadd.f32 %v9518_v61, %v9163_v35 }
 0x406   :  { %8176 = vrcp.f32 %v4654_v31  ;;  %v5817_v63 = vand.u32 4294901760, %v9617_v12  ;;  %6090 = vmatpush.msrb.mxu1 %v10272_v38  ;;  %v6334_v15 = vmul.f32 1.442695, %v6306_v6  ;;  %v6336_v42 = vmul.f32 1.442695, %v6307_v34 }
 0x407   :  { %v6191_v13 = vsub.f32 2.0, %v6175_v57  ;;  %v4875_v58 = vadd.f32 %v4874_v36, %v4849_v16  ;;  %v4685_v62 = vsel %vm4549_vm0, %v8173_v51, 0.0  ;;  %v5825_v25 = vand.u32 4294901760, %v9626_v46  ;;  %v8247_v51 = vld [vmem:[#allocation10 + $0x20] sm:$0xff]  ;;  %v10273_v57 = vld [vmem:[#allocation108_spill] sm:$0xff] }
 0x408   :  { %v5818_v39 = vsub.f32 %v9617_v12, %v5817_v63  ;;  %8178 = vpow2.f32 %v6334_v15  ;;  %v4998_v35 = vadd.f32 %v4997_v43, %v4969_v8  ;;  %v4026_v36 = vadd.f32 %v9528_v60, %v3996_v26  ;;  %v9643_v8 = vpop.f32.mrf.mxu1 }
 0x409   :  { %v6207_v2 = vmul.f32 %v8175_v28, %v6191_v13  ;;  %5758 = vmatmul.f32.vlgmr.msra.gmra.mxu2 %v9569_v11  ;;  %5788 = vmatmul.f32.gmra.mxu3 %v9594_v18  ;;  %8180 = vpow2.f32 %v6336_v42  ;;  %v4050_v28 = vadd.f32 %v9525_v56, %v4022_v4  ;;  %v4507_v11 = vpop.permute.xlu1 %4506  ;;  %v5826_v15 = vsub.f32 %v9626_v46, %v5825_v25  ;;  %v5053_v42 = vpop.f32.mrf.mxu3 }
 0x40a   :  { %4686 = vadd.xlane.f32.xlu2 %v4685_v62  ;;  %v5819_v6 = vand.u32 4294901760, %v5818_v39  ;;  %5997 = vmatpush.msra.mxu2 %v10272_v38  ;;  %v5028_v53 = vadd.f32 %v5027_v27, %v4998_v35  ;;  %v4055_v4 = vadd.f32 %v9538_v44, %v4026_v36  ;;  %v9654_v35 = vpop.f32.mrf.mxu0 }
 0x40b   :  { %v6223_v61 = vmul.f32 %v6207_v2, %v4875_v58  ;;  %v4079_v13 = vadd.f32 %v9523_v9, %v4050_v28  ;;  %v5827_v58 = vand.u32 4294901760, %v5826_v15  ;;  %v8248_v9 = vld [vmem:[#allocation10 + $0x40] sm:$0xff] }
 0x40c   :  { %v8177_v1 = vpop.eup %8176  ;;  %5820 = vmatmul.f32.vlgmr.msrb.gmra.mxu0 %v5819_v6  ;;  %v5054_v26 = vadd.f32 %v5053_v42, %v5028_v53  ;;  %v4085_v27 = vadd.f32 %v9536_v20, %v4055_v4 }
 0x40d   :  { %8008 = vst [vmem:[#allocation10 + $0x28] sm:$0xff] %v6223_v61  ;;  %v8024_v16 = vmul.f32 %v8247_v51, %v6223_v61  ;;  %v6176_v34 = vmul.f32 %v8177_v1, %v4654_v31  ;;  %5858 = vmatmul.f32.gmra.mxu1 %v9612_v17  ;;  %6062 = vmatpush.msrb.mxu0 %v10273_v57  ;;  %v10276_v51 = vld [vmem:[#allocation16_spill] sm:$0xff] }
 0x40e   :  { %v8179_v43 = vpop.eup %8178  ;;  %v4109_v62 = vadd.f32 %v9533_v0, %v4079_v13  ;;  %v4113_v0 = vadd.f32 %v9543_v54, %v4085_v27  ;;  %v4660_v54 = vpop.xlane.xlu2 %4659 }
 0x40f   :  { %8040 = vst [vmem:[#allocation10 + $0x30] sm:$0xff] %v8024_v16  ;;  %v6192_v60 = vsub.f32 2.0, %v6176_v34  ;;  %v8181_v56 = vpop.eup %8180  ;;  %6590 = vxpose.xlu1.b32.start [1/2] (short) (narrow) %v8179_v43, 8  ;;  %v10277_v16 = vld [vmem:[#allocation15_spill] sm:$0xff]  ;;  %8182 = vrcp.f32 %v4660_v54 }
 0x410   :  { %v9647_v31 = vadd.f32 %v8181_v56, %v8179_v43  ;;  %v4139_v53 = vadd.f32 %v9549_v49, %v4113_v0 }
 0x411   :  { %v6208_v39 = vmul.f32 %v8177_v1, %v6192_v60  ;;  %5762 = vmatmul.f32.gmra.mxu2 %v9594_v18  ;;  %5911 = vmatmul.f32.vlgmr.msrb.gmra.mxu3 %v5817_v63  ;;  %v9657_v18 = vpop.f32.mrf.mxu2  ;;  %v4135_v63 = vadd.f32 %v9540_v29, %v4109_v62  ;;  %v5123_v1 = vpop.f32.mrf.mxu1 }
 0x412   :  { %6148 = vmatpush.msrb.mxu3 %v10272_v38  ;;  %v10274_v38 = vld [vmem:[#allocation23_spill] sm:$0xff]  ;;  %v9663_v36 = vpop.f32.mrf.mxu3 }
 0x413   :  { %v6224_v2 = vmul.f32 %v6208_v39, %v5054_v26 }
 0x414   :  { %5828 = vmatmul.f32.gmra.mxu0 %v5827_v58 }
 0x415   :  { %8009 = vst [vmem:[#allocation10 + $0x48] sm:$0xff] %v6224_v2  ;;  %v8025_v44 = vmul.f32 %v8248_v9, %v6224_v2  ;;  %5967 = vmatmul.f32.vlgmr.msra.gmra.mxu1 %v9608_v24  ;;  %v4413_v6 = vpop.trf.xlu1  ;;  %v8183_v42 = vpop.eup %8182 }
 0x416   :  { %v4516_v61 = vperm.slane %v4413_v6, 0  ;;  %6704 = vmatpush.msra.mxu1 %v8497_v23  ;;  %v10275_v23 = vld [vmem:[#allocation109_spill] sm:$0xff]  ;;  %v4663_v43 = vpop.xlane.xlu2 %4662  ;;  %v6178_v58 = vmul.f32 %v8183_v42, %v4660_v54 }
 0x417   :  { %8041 = vst [vmem:[#allocation10 + $0x50] sm:$0xff] %v8025_v44  ;;  %6591 = vxpose.xlu1.b32.end [2/2] (short) (narrow) %v8181_v56, 8  ;;  %8184 = vrcp.f32 %v4663_v43 }
 0x418   :  { %v4531_v20 = vadd.f32 %v4516_v61, %v9431_v32  ;;  %6710 = vmatpush.msra.mxu1 %v10274_v38  ;;  %v4532_v29 = vadd.f32 %v4516_v61, %v4507_v11  ;;  %v6194_v62 = vsub.f32 2.0, %v6178_v58  ;;  %v6259_v38 = vmax.f32 %v9405_v41, %v9419_v3 }
 0x419   :  { %5882 = vmatmul.f32.vlgmr.msrb.gmra.mxu2 %v9617_v12  ;;  %5917 = vmatmul.f32.gmra.mxu3 %v5825_v25  ;;  %v5089_v12 = vpop.f32.mrf.mxu0  ;;  %v5151_v34 = vpop.f32.mrf.mxu2 }
 0x41a   :  { %v9666_v28 = vadd.f32 %v4531_v20, %v4135_v63  ;;  %6122 = vmatpush.msrb.mxu2 %v10275_v23  ;;  %v9675_v25 = vadd.f32 %v4532_v29, %v4139_v53  ;;  %v5180_v11 = vpop.f32.mrf.mxu3  ;;  %v5124_v13 = vadd.f32 %v5123_v1, %v5089_v12  ;;  %v6210_v23 = vmul.f32 %v8183_v42, %v6194_v62 }
 0x41c   :  { %5941 = vmatmul.f32.vlgmr.msra.gmra.mxu0 %v9608_v24  ;;  %v4592_v32 = vsel %vm4549_vm0, %v9666_v28, -inf  ;;  %v6238_v24 = vmax.f32 %v9300_v59, %v9302_v33  ;;  %v4595_v57 = vsel %vm4549_vm0, %v9675_v25, -inf  ;;  %v5152_v39 = vadd.f32 %v5151_v34, %v5124_v13 }
 0x41d   :  { %5971 = vmatmul.f32.gmra.mxu1 %v9612_v17  ;;  %4593 = vmax.xlane.f32.xlu0 %v4592_v32  ;;  %v8185_v9 = vpop.eup %8184  ;;  %v6260_v34 = vrot.slane %v6259_v38, 4 }
 0x41e   :  { %6673 = vmatpush.msra.mxu0 %v10276_v51  ;;  %v6239_v15 = vrot.slane %v6238_v24, 4  ;;  %v4666_v61 = vpop.xlane.xlu2 %4665  ;;  %v6179_v53 = vmul.f32 %v8185_v9, %v4663_v43 }
 0x41f   :  { %8186 = vrcp.f32 %v4666_v61  ;;  %v6261_v58 = vmax.f32 %v6259_v38, %v6260_v34 }
 0x420   :  { %6675 = vmatpush.msra.mxu0 %v10277_v16 }
 0x421   :  { %5887 = vmatmul.f32.gmra.mxu2 %v9626_v46  ;;  %v5127_v49 = vpop.f32.mrf.mxu1  ;;  %v6240_v46 = vmax.f32 %v6238_v24, %v6239_v15 }
 0x423   :  { %v6241_v2 = vrot.slane %v6240_v46, 2 }
 0x424   :  { %5945 = vmatmul.f32.gmra.mxu0 %v9612_v17  ;;  %v5181_v17 = vadd.f32 %v5180_v11, %v5152_v39  ;;  %v8249_v11 = vld [vmem:[#allocation10 + $0x80] sm:$0xff] }
 0x425   :  { %4596 = vmax.xlane.f32.xlu0 %v4595_v57  ;;  %v6242_v20 = vmax.f32 %v6240_v46, %v6241_v2  ;;  %v8187_v2 = vpop.eup %8186 }
 0x427   :  { %v6243_v12 = vrot.slane %v6242_v20, 1 }
 0x429   :  { %v5097_v60 = vpop.f32.mrf.mxu0  ;;  %v5156_v56 = vpop.f32.mrf.mxu2  ;;  %v6244_v39 = vmax.f32 %v6242_v20, %v6243_v12 }
 0x42a   :  { %v5236_v4 = vpop.f32.mrf.mxu1  ;;  %v5128_v27 = vadd.f32 %v5127_v49, %v5097_v60  ;;  %v6195_v49 = vsub.f32 2.0, %v6179_v53 }
 0x42b   :  { %v5186_v26 = vpop.f32.mrf.mxu3 }
 0x42c   :  { %v5157_v29 = vadd.f32 %v5156_v56, %v5128_v27  ;;  %v6211_v43 = vmul.f32 %v8185_v9, %v6195_v49  ;;  %v4669_v56 = vpop.xlane.xlu2 %4668  ;;  %v6294_v27 = vsub.f32 %v9300_v59, %v6244_v39  ;;  %v6295_v59 = vsub.f32 %v9302_v33, %v6244_v39 }
 0x42d   :  { %8188 = vrcp.f32 %v4669_v56 }
 0x42e   :  { %v5187_v24 = vadd.f32 %v5186_v26, %v5157_v29  ;;  %v6180_v26 = vmul.f32 %v8187_v2, %v4666_v61  ;;  %v6310_v20 = vmul.f32 1.442695, %v6294_v27 }
 0x430   :  { %8190 = vpow2.f32 %v6310_v20 }
 0x431   :  { %v5210_v44 = vpop.f32.mrf.mxu0  ;;  %v5272_v6 = vpop.f32.mrf.mxu2 }
 0x432   :  { %v5211_v63 = vadd.f32 %v5210_v44, %v5181_v17  ;;  %v5240_v0 = vpop.f32.mrf.mxu1  ;;  %v6262_v17 = vrot.slane %v6261_v58, 2 }
 0x433   :  { %v5306_v1 = vpop.f32.mrf.mxu3  ;;  %v8189_v12 = vpop.eup %8188 }
 0x434   :  { %v5237_v32 = vadd.f32 %v5236_v4, %v5211_v63  ;;  %v5307_v44 = vadd.f32 %v5306_v1, %v5272_v6  ;;  %v8250_v63 = vld [vmem:[#allocation10 + $0xa0] sm:$0xff]  ;;  %v6263_v38 = vmax.f32 %v6261_v58, %v6262_v17  ;;  %v6181_v1 = vmul.f32 %v8189_v12, %v4669_v56  ;;  %v4672_v39 = vpop.xlane.xlu2 %4671 }
 0x436   :  { %v6226_v54 = vmul.f32 %v6210_v23, %v5237_v32  ;;  %v6264_v61 = vrot.slane %v6263_v38, 1  ;;  %v9688_v17 = vpop.eup %8190 }
 0x438   :  { %8011 = vst [vmem:[#allocation10 + $0x88] sm:$0xff] %v6226_v54  ;;  %v8027_v57 = vmul.f32 %v8249_v11, %v6226_v54  ;;  %v6196_v54 = vsub.f32 2.0, %v6180_v26  ;;  %v6265_v58 = vmax.f32 %v6263_v38, %v6264_v61 }
 0x439   :  { %v5214_v15 = vpop.f32.mrf.mxu0  ;;  %v5280_v60 = vpop.f32.mrf.mxu2 }
 0x43a   :  { %8043 = vst [vmem:[#allocation10 + $0x90] sm:$0xff] %v8027_v57  ;;  %v5215_v13 = vadd.f32 %v5214_v15, %v5187_v24  ;;  %v5363_v46 = vpop.f32.mrf.mxu1  ;;  %v6212_v6 = vmul.f32 %v8187_v2, %v6196_v54 }
 0x43b   :  { %v5310_v42 = vpop.f32.mrf.mxu3 }
 0x43c   :  { %v5241_v4 = vadd.f32 %v5240_v0, %v5215_v13  ;;  %v5311_v24 = vadd.f32 %v5310_v42, %v5280_v60  ;;  %v6300_v60 = vsub.f32 %v9405_v41, %v6265_v58  ;;  %v4675_v41 = vpop.xlane.xlu2 %4674 }
 0x43e   :  { %v6227_v62 = vmul.f32 %v6211_v43, %v5241_v4  ;;  %v6312_v43 = vmul.f32 1.442695, %v6295_v59  ;;  %v6197_v4 = vsub.f32 2.0, %v6181_v1 }
 0x440   :  { %8012 = vst [vmem:[#allocation10 + $0xa8] sm:$0xff] %v6227_v62  ;;  %v8028_v23 = vmul.f32 %v8250_v63, %v6227_v62  ;;  %v8251_v62 = vld [vmem:[#allocation10 + $0xc0] sm:$0xff]  ;;  %8192 = vpow2.f32 %v6312_v43  ;;  %v6213_v56 = vmul.f32 %v8189_v12, %v6197_v4 }
 0x441   :  { %v5334_v53 = vpop.f32.mrf.mxu0  ;;  %v5393_v9 = vpop.f32.mrf.mxu2  ;;  %8194 = vrcp.f32 %v4672_v39 }
 0x442   :  { %8044 = vst [vmem:[#allocation10 + $0xb0] sm:$0xff] %v8028_v23  ;;  %v5335_v29 = vadd.f32 %v5334_v53, %v5307_v44  ;;  %v5369_v32 = vpop.f32.mrf.mxu1  ;;  %v6322_v53 = vmul.f32 1.442695, %v6300_v60 }
 0x443   :  { %v5419_v34 = vpop.f32.mrf.mxu3 }
 0x444   :  { %v5364_v0 = vadd.f32 %v5363_v46, %v5335_v29  ;;  %v8252_v29 = vld [vmem:[#allocation10 + $0xe0] sm:$0xff]  ;;  %8196 = vpow2.f32 %v6322_v53  ;;  %v10279_v53 = vsub.f32 %v9561_v45, %v9586_v37  ;;  %v4646_v45 = vsel %vm4549_vm0, %v9310_v14, 0.0 }
 0x445   :  { %8198 = vrcp.f32 %v4675_v41 }
 0x446   :  { %v5394_v49 = vadd.f32 %v5393_v9, %v5364_v0  ;;  %v9692_v38 = vpop.eup %8192 }
 0x447   :  { %v8195_v0 = vpop.eup %8194 }
 0x448   :  { %v5420_v11 = vadd.f32 %v5419_v34, %v5394_v49  ;;  %v6182_v59 = vmul.f32 %v8195_v0, %v4672_v39 }
 0x449   :  { %v5339_v57 = vpop.f32.mrf.mxu0  ;;  %v5397_v26 = vpop.f32.mrf.mxu2 }
 0x44a   :  { %v6228_v15 = vmul.f32 %v6212_v6, %v5420_v11  ;;  %v5340_v13 = vadd.f32 %v5339_v57, %v5311_v24  ;;  %v5489_v33 = vpop.f32.mrf.mxu1  ;;  %v9696_v6 = vpop.eup %8196  ;;  %v6198_v24 = vsub.f32 2.0, %v6182_v59 }
 0x44b   :  { %v5423_v42 = vpop.f32.mrf.mxu3  ;;  %v8199_v57 = vpop.eup %8198 }
 0x44c   :  { %8013 = vst [vmem:[#allocation10 + $0xc8] sm:$0xff] %v6228_v15  ;;  %v8029_v46 = vmul.f32 %v8251_v62, %v6228_v15  ;;  %v5370_v27 = vadd.f32 %v5369_v32, %v5340_v13  ;;  %v6301_v32 = vsub.f32 %v9419_v3, %v6265_v58  ;;  %v10278_v58 = vsub.f32 %v9552_v21, %v9586_v37 }
 0x44e   :  { %8045 = vst [vmem:[#allocation10 + $0xd0] sm:$0xff] %v8029_v46  ;;  %v5398_v2 = vadd.f32 %v5397_v26, %v5370_v27  ;;  %6398 = vxpose.xlu0.b32.start [1/2] (short) (narrow) %v9688_v17, 8  ;;  %v6324_v49 = vmul.f32 1.442695, %v6301_v32  ;;  %v6330_v4 = vmul.f32 1.442695, %v10278_v58  ;;  %v6214_v46 = vmul.f32 %v8195_v0, %v6198_v24 }
 0x44f   :  { %v6183_v27 = vmul.f32 %v8199_v57, %v4675_v41  ;;  %v8254_v0 = vld [vmem:[#allocation10 + $0x120] sm:$0xff] }
 0x450   :  { %v5424_v44 = vadd.f32 %v5423_v42, %v5398_v2  ;;  %8200 = vpow2.f32 %v6324_v49 }
 0x451   :  { %v5455_v63 = vpop.f32.mrf.mxu0  ;;  %v5517_v12 = vpop.f32.mrf.mxu2  ;;  %8202 = vpow2.f32 %v6330_v4  ;;  %v6199_v42 = vsub.f32 2.0, %v6183_v27 }
 0x452   :  { %v6229_v23 = vmul.f32 %v6213_v56, %v5424_v44  ;;  %v5493_v9 = vpop.f32.mrf.mxu1  ;;  %v5490_v54 = vadd.f32 %v5489_v33, %v5455_v63  ;;  %v8253_v44 = vld [vmem:[#allocation10 + $0x100] sm:$0xff] }
 0x453   :  { %v5546_v1 = vpop.f32.mrf.mxu3  ;;  %v6215_v32 = vmul.f32 %v8199_v57, %v6199_v42 }
 0x454   :  { %8014 = vst [vmem:[#allocation10 + $0xe8] sm:$0xff] %v6229_v23  ;;  %v8030_v20 = vmul.f32 %v8252_v29, %v6229_v23  ;;  %v5518_v61 = vadd.f32 %v5517_v12, %v5490_v54  ;;  %v6332_v29 = vmul.f32 1.442695, %v10279_v53 }
 0x456   :  { %8046 = vst [vmem:[#allocation10 + $0xf0] sm:$0xff] %v8030_v20  ;;  %6399 = vxpose.xlu0.b32.end [2/2] (short) (narrow) %v9692_v38, 8  ;;  %v5547_v11 = vadd.f32 %v5546_v1, %v5518_v61  ;;  %v9702_v39 = vpop.eup %8200  ;;  %8204 = vpow2.f32 %v6332_v29 }
 0x457   :  { %v9708_v41 = vpop.eup %8202 }
 0x459   :  { %v5463_v34 = vpop.f32.mrf.mxu0  ;;  %v5522_v62 = vpop.f32.mrf.mxu2 }
 0x45a   :  { %v5494_v3 = vadd.f32 %v5493_v9, %v5463_v34  ;;  %v5602_v15 = vpop.f32.mrf.mxu1 }
 0x45b   :  { %v5552_v60 = vpop.f32.mrf.mxu3 }
 0x45c   :  { %v5523_v26 = vadd.f32 %v5522_v62, %v5494_v3  ;;  %v9711_v49 = vpop.eup %8204 }
 0x45e   :  { %6494 = vxpose.xlu0.b32.start [1/2] (short) (narrow) %v9696_v6, 8  ;;  %v5553_v56 = vadd.f32 %v5552_v60, %v5523_v26 }
 0x461   :  { %v5576_v13 = vpop.f32.mrf.mxu0  ;;  %v4678_v61 = vpop.xlane.xlu2 %4677 }
 0x462   :  { %v5577_v43 = vadd.f32 %v5576_v13, %v5547_v11  ;;  %v5606_v20 = vpop.f32.mrf.mxu1  ;;  %8206 = vrcp.f32 %v4678_v61 }
 0x464   :  { %v5603_v33 = vadd.f32 %v5602_v15, %v5577_v43 }
 0x466   :  { %v6230_v2 = vmul.f32 %v6214_v46, %v5603_v33  ;;  %6495 = vxpose.xlu0.b32.end [2/2] (short) (narrow) %v9702_v39, 8 }
 0x468   :  { %8015 = vst [vmem:[#allocation10 + $0x108] sm:$0xff] %v6230_v2  ;;  %v8031_v63 = vmul.f32 %v8253_v44, %v6230_v2  ;;  %v8207_v13 = vpop.eup %8206 }
 0x469   :  { %v5580_v23 = vpop.f32.mrf.mxu0  ;;  %v4681_v57 = vpop.xlane.xlu2 %4680  ;;  %v6184_v58 = vmul.f32 %v8207_v13, %v4678_v61 }
 0x46a   :  { %8047 = vst [vmem:[#allocation10 + $0x110] sm:$0xff] %v8031_v63  ;;  %v5581_v21 = vadd.f32 %v5580_v23, %v5553_v56  ;;  %8208 = vrcp.f32 %v4681_v57 }
 0x46b   :  { %v6200_v27 = vsub.f32 2.0, %v6184_v58 }
 0x46c   :  { %v5607_v9 = vadd.f32 %v5606_v20, %v5581_v21 }
 0x46d   :  { %v6216_v44 = vmul.f32 %v8207_v13, %v6200_v27 }
 0x46e   :  { %v6231_v54 = vmul.f32 %v6215_v32, %v5607_v9  ;;  %6558 = vxpose.xlu0.b32.start [1/2] (short) (narrow) %v9708_v41, 8 }
 0x470   :  { %8016 = vst [vmem:[#allocation10 + $0x128] sm:$0xff] %v6231_v54  ;;  %v8032_v12 = vmul.f32 %v8254_v0, %v6231_v54  ;;  %v8209_v2 = vpop.eup %8208  ;;  %v8255_v54 = vld [vmem:[#allocation10 + $0x140] sm:$0xff] }
 0x471   :  { %v5700_v37 = vpop.f32.mrf.mxu0  ;;  %v5729_v59 = vpop.f32.mrf.mxu1  ;;  %v6185_v63 = vmul.f32 %v8209_v2, %v4681_v57 }
 0x472   :  { %8048 = vst [vmem:[#allocation10 + $0x130] sm:$0xff] %v8032_v12 }
 0x473   :  { %v5672_v34 = vpop.f32.mrf.mxu3  ;;  %v6201_v9 = vsub.f32 2.0, %v6185_v63 }
 0x475   :  { %v4684_v14 = vpop.xlane.xlu2 %4683 }
 0x476   :  { %6559 = vxpose.xlu0.b32.end [2/2] (short) (narrow) %v9711_v49, 8  ;;  %8210 = vrcp.f32 %v4684_v14 }
 0x477   :  { %4647 = vadd.xlane.f32.xlu1 %v4646_v45 }
 0x479   :  { %v5705_v11 = vpop.f32.mrf.mxu0 }
 0x47a   :  { %v5735_v3 = vpop.f32.mrf.mxu1 }
 0x47c   :  { %v5638_v1 = vpop.f32.mrf.mxu2  ;;  %v5676_v24 = vpop.f32.mrf.mxu3 }
 0x47d   :  { %v5673_v15 = vadd.f32 %v5672_v34, %v5638_v1  ;;  %v4687_v61 = vpop.xlane.xlu2 %4686 }
 0x47f   :  { %v5701_v4 = vadd.f32 %v5700_v37, %v5673_v15 }
 0x481   :  { %v5730_v33 = vadd.f32 %v5729_v59, %v5701_v4 }
 0x482   :  { %v5855_v60 = vpop.f32.mrf.mxu1 }
 0x484   :  { %v5646_v43 = vpop.f32.mrf.mxu2  ;;  %v5785_v62 = vpop.f32.mrf.mxu3 }
 0x485   :  { %v5677_v26 = vadd.f32 %v5676_v24, %v5646_v43  ;;  %v8211_v24 = vpop.eup %8210 }
 0x486   :  { %v6186_v43 = vmul.f32 %v8211_v24, %v4684_v14 }
 0x487   :  { %v5706_v23 = vadd.f32 %v5705_v11, %v5677_v26  ;;  %v6217_v11 = vmul.f32 %v8209_v2, %v6201_v9 }
 0x488   :  { %v6202_v14 = vsub.f32 2.0, %v6186_v43 }
 0x489   :  { %v5821_v46 = vpop.f32.mrf.mxu0  ;;  %v5736_v34 = vadd.f32 %v5735_v3, %v5706_v23 }
 0x48a   :  { %v5859_v1 = vpop.f32.mrf.mxu1  ;;  %v5856_v4 = vadd.f32 %v5855_v60, %v5821_v46 }
 0x48c   :  { %v5759_v42 = vpop.f32.mrf.mxu2  ;;  %v5789_v32 = vpop.f32.mrf.mxu3 }
 0x48d   :  { %v5760_v56 = vadd.f32 %v5759_v42, %v5730_v33 }
 0x48f   :  { %v5786_v21 = vadd.f32 %v5785_v62, %v5760_v56  ;;  %v8256_v62 = vld [vmem:[#allocation10 + $0x160] sm:$0xff] }
 0x490   :  { %v9716_v53 = vpop.xlane.xlu0 %4593 }
 0x491   :  { %v6232_v29 = vmul.f32 %v6216_v44, %v5786_v21  ;;  %v4612_v20 = vsub.f32 %v9666_v28, %v9716_v53  ;;  %v5829_v45 = vpop.f32.mrf.mxu0 }
 0x493   :  { %8017 = vst [vmem:[#allocation10 + $0x148] sm:$0xff] %v6232_v29  ;;  %v8033_v0 = vmul.f32 %v8255_v54, %v6232_v29  ;;  %v4642_v12 = vmul.f32 1.442695, %v4612_v20 }
 0x494   :  { %v5763_v37 = vpop.f32.mrf.mxu2  ;;  %v5912_v42 = vpop.f32.mrf.mxu3 }
 0x495   :  { %8049 = vst [vmem:[#allocation10 + $0x150] sm:$0xff] %v8033_v0  ;;  %8212 = vpow2.f32 %v4642_v12  ;;  %v5764_v59 = vadd.f32 %v5763_v37, %v5736_v34  ;;  %v6218_v12 = vmul.f32 %v8211_v24, %v6202_v14  ;;  %v10280_v37 = vld [vmem:[#allocation21_spill] sm:$0xff] }
 0x496   :  { %8214 = vrcp.f32 %v4687_v61 }
 0x497   :  { %v5790_v57 = vadd.f32 %v5789_v32, %v5764_v59  ;;  %v5968_v32 = vpop.f32.mrf.mxu1 }
 0x498   :  { %v9720_v15 = vpop.xlane.xlu0 %4596 }
 0x499   :  { %v6233_v28 = vmul.f32 %v6217_v11, %v5790_v57  ;;  %v4613_v13 = vsub.f32 %v9675_v25, %v9720_v15  ;;  %v6287_v3 = vmax.f32 %v9716_v53, %v9720_v15  ;;  %v5942_v46 = vpop.f32.mrf.mxu0  ;;  %v5860_v11 = vadd.f32 %v5859_v1, %v5829_v45 }
 0x49b   :  { %v8213_v58 = vpop.eup %8212  ;;  %8018 = vst [vmem:[#allocation10 + $0x168] sm:$0xff] %v6233_v28  ;;  %v8034_v27 = vmul.f32 %v8256_v62, %v6233_v28  ;;  %v4644_v26 = vmul.f32 1.442695, %v4613_v13  ;;  %v6288_v33 = vrot.slane %v6287_v3, 4 }
 0x49c   :  { %v5976_v2 = vsel %vm4549_vm0, %v8213_v58, 0  ;;  %v5883_v56 = vpop.f32.mrf.mxu2  ;;  %v4688_v44 = vsel %vm4549_vm0, %v8213_v58, 0.0  ;;  %v8215_v60 = vpop.eup %8214 }
 0x49d   :  { %8050 = vst [vmem:[#allocation10 + $0x170] sm:$0xff] %v8034_v27  ;;  %8216 = vpow2.f32 %v4644_v26  ;;  %v6289_v25 = vmax.f32 %v6287_v3, %v6288_v33  ;;  %v5884_v63 = vadd.f32 %v5883_v56, %v5856_v4  ;;  %4689 = vadd.xlane.f32.xlu1 %v4688_v44  ;;  %v9728_v23 = vand.u32 4294901760, %v5976_v2  ;;  %v10281_v4 = vld [vmem:[#allocation20_spill] sm:$0xff]  ;;  %v5918_v45 = vpop.f32.mrf.mxu3 }
 0x49e   :  { %v6187_v34 = vmul.f32 %v8215_v60, %v4687_v61 }
 0x49f   :  { %v6290_v21 = vrot.slane %v6289_v25, 2  ;;  %v5913_v29 = vadd.f32 %v5912_v42, %v5884_v63  ;;  %6037 = vmatmul.f32.vlgmr.msra.gmra.mxu3 %v9728_v23  ;;  %v5999_v20 = vsub.f32 %v5976_v2, %v9728_v23  ;;  %v9742_v42 = vld [vmem:[#allocation10 + $0x180] sm:$0xff] }
 0x4a0   :  { %6757 = vmatpush.msra.mxu3 %v10276_v51  ;;  %v6203_v26 = vsub.f32 2.0, %v6187_v34 }
 0x4a1   :  { %v6291_v9 = vmax.f32 %v6289_v25, %v6290_v21  ;;  %v5943_v54 = vadd.f32 %v5942_v46, %v5913_v29  ;;  %6065 = vmatmul.f32.vlgmr.msrb.gmra.mxu0 %v5999_v20  ;;  %v6000_v0 = vand.u32 4294901760, %v5999_v20  ;;  %v5946_v44 = vpop.f32.mrf.mxu0  ;;  %v10282_v21 = vld [vmem:[#allocation18_spill] sm:$0xff] }
 0x4a2   :  { %6759 = vmatpush.msra.mxu3 %v10277_v16  ;;  %6784 = vmatpush.msrb.mxu0 %v10280_v37 }
 0x4a3   :  { %v8217_v59 = vpop.eup %8216  ;;  %v6292_v57 = vrot.slane %v6291_v9, 1  ;;  %v5969_v28 = vadd.f32 %v5968_v32, %v5943_v54  ;;  %6094 = vmatmul.f32.vlgmr.msrb.gmra.mxu1 %v6000_v0  ;;  %v6001_v13 = vsub.f32 %v5999_v20, %v6000_v0  ;;  %v10283_v20 = vld [vmem:[#allocation17_spill] sm:$0xff]  ;;  %v9747_v0 = vld [vmem:[#allocation10 + $0x1a0] sm:$0xff] }
 0x4a4   :  { %v5888_v3 = vpop.f32.mrf.mxu2  ;;  %v4691_v43 = vsel %vm4549_vm0, %v8217_v59, 0.0  ;;  %v5979_v58 = vsel %vm4549_vm0, %v8217_v59, 0  ;;  %6788 = vmatpush.msrb.mxu0 %v10281_v4  ;;  %6809 = vmatpush.msrb.mxu1 %v10276_v51  ;;  %v4758_v4 = vadd.f32 %v9545_v30, %v9547_v7 }
 0x4a5   :  { %v6293_v61 = vmax.f32 %v6291_v9, %v6292_v57  ;;  %v6234_v24 = vmul.f32 %v6218_v12, %v5969_v28  ;;  %v5889_v62 = vadd.f32 %v5888_v3, %v5860_v11  ;;  %4692 = vadd.xlane.f32.xlu2 %v4691_v43  ;;  %v6002_v27 = vand.u32 4294901760, %v6001_v13  ;;  %v10285_v11 = vld [vmem:[#allocation27_spill] sm:$0xff]  ;;  %v10286_v57 = vld [vmem:[#allocation25_spill] sm:$0xff]  ;;  %v6446_v13 = vpop.trf.xlu1 }
 0x4a6   :  { %v6006_v1 = vand.u32 4294901760, %v5979_v58  ;;  %6811 = vmatpush.msrb.mxu1 %v10277_v16  ;;  %v5972_v16 = vpop.f32.mrf.mxu1  ;;  %v10287_v28 = vld [vmem:[#allocation19_spill] sm:$0xff] }
 0x4a7   :  { %v6308_v33 = vsub.f32 %v9716_v53, %v6293_v61  ;;  %v6309_v2 = vsub.f32 %v9720_v15, %v6293_v61  ;;  %8019 = vst [vmem:[#allocation10 + $0x188] sm:$0xff] %v6234_v24  ;;  %v8035_v56 = vmul.f32 %v9742_v42, %v6234_v24  ;;  %v5919_v51 = vadd.f32 %v5918_v45, %v5889_v62 }
 0x4a8   :  { %6003 = vmatmul.f32.vlgmr.msra.gmra.mxu2 %v6002_v27  ;;  %6041 = vmatmul.f32.gmra.mxu3 %v6006_v1  ;;  %v6007_v25 = vsub.f32 %v5979_v58, %v6006_v1  ;;  %v6219_v15 = vmul.f32 %v8215_v60, %v6203_v26  ;;  %v10284_v60 = vld [vmem:[#allocation29_spill] sm:$0xff]  ;;  %v6818_v61 = vsel %vm6654_vm1, %v6446_v13, 0  ;;  %v4786_v62 = vadd.f32 %v9556_v50, %v4758_v4  ;;  %v10297_v13 = vld [vmem:[#allocation30_spill] sm:$0xff] }
 0x4a9   :  { %v6338_v63 = vmul.f32 1.442695, %v6308_v33  ;;  %v6340_v14 = vmul.f32 1.442695, %v6309_v2  ;;  %8051 = vst [vmem:[#allocation10 + $0x190] sm:$0xff] %v8035_v56  ;;  %v5947_v46 = vadd.f32 %v5946_v44, %v5919_v51  ;;  %6732 = vmatpush.msra.mxu2 %v10282_v21  ;;  %v6838_v24 = vand.u32 4294901760, %v6818_v61 }
 0x4aa   :  { %6070 = vmatmul.f32.gmra.mxu0 %v6007_v25  ;;  %v6008_v53 = vand.u32 4294901760, %v6007_v25  ;;  %v4815_v26 = vadd.f32 %v9559_v10, %v4786_v62  ;;  %v9777_v21 = vld [vmem:[#allocation10] sm:$0xff] }
 0x4ab   :  { %8218 = vpow2.f32 %v6338_v63  ;;  %v5973_v29 = vadd.f32 %v5972_v16, %v5947_v46  ;;  %6735 = vmatpush.msra.mxu2 %v10283_v20  ;;  %v9766_v27 = vsub.f32 %v6818_v61, %v6838_v24  ;;  %v10290_v20 = vld [vmem:[#allocation26_spill] sm:$0xff]  ;;  %v10298_v61 = vld [vmem:[#allocation40_spill] sm:$0xff]  ;;  %v10299_v62 = vld [vmem:[#allocation35_spill] sm:$0xff] }
 0x4ac   :  { %8220 = vpow2.f32 %v6340_v14  ;;  %6100 = vmatmul.f32.gmra.mxu1 %v6008_v53  ;;  %v6009_v32 = vsub.f32 %v6007_v25, %v6008_v53  ;;  %v4845_v33 = vadd.f32 %v9573_v19, %v4815_v26  ;;  %v10288_v19 = vld [vmem:[#allocation28_spill] sm:$0xff]  ;;  %v10300_v26 = vld [vmem:[#allocation45_spill] sm:$0xff] }
 0x4ad   :  { %v6235_v9 = vmul.f32 %v6219_v15, %v5973_v29  ;;  %v6478_v3 = vpop.trf.xlu1  ;;  %v6840_v30 = vand.u32 4294901760, %v9766_v27 }
 0x4ae   :  { %v6010_v54 = vand.u32 4294901760, %v6009_v32  ;;  %v4871_v25 = vadd.f32 %v9571_v52, %v4845_v33  ;;  %v10289_v52 = vld [vmem:[#allocation24_spill] sm:$0xff]  ;;  %v6980_v29 = vsel %vm6654_vm1, %v6478_v3, 0  ;;  %v10291_v32 = vld [vmem:[#allocation41_spill] sm:$0xff] }
 0x4af   :  { %8020 = vst [vmem:[#allocation10 + $0x1a8] sm:$0xff] %v6235_v9  ;;  %v8036_v12 = vmul.f32 %v9747_v0, %v6235_v9  ;;  %v6841_v10 = vsub.f32 %v9766_v27, %v6840_v30  ;;  %v10292_v9 = vld [vmem:[#allocation22_spill] sm:$0xff] }
 0x4b0   :  { %6011 = vmatmul.f32.gmra.mxu2 %v6010_v54  ;;  %6150 = vmatmul.f32.vlgmr.msrb.gmra.mxu3 %v9728_v23  ;;  %v10293_v54 = vld [vmem:[#allocation34_spill] sm:$0xff] }
 0x4b1   :  { %v8219_v34 = vpop.eup %8218  ;;  %8052 = vst [vmem:[#allocation10 + $0x1b0] sm:$0xff] %v8036_v12  ;;  %6866 = vmatpush.msrb.mxu3 %v10284_v60  ;;  %v6842_v53 = vand.u32 4294901760, %v6841_v10  ;;  %v7000_v12 = vand.u32 4294901760, %v6980_v29  ;;  %v10294_v60 = vld [vmem:[#allocation36_spill] sm:$0xff]  ;;  %v10307_v10 = vld [vmem:[#allocation57_spill] sm:$0xff] }
 0x4b2   :  { %v8221_v37 = vpop.eup %8220  ;;  %6622 = vxpose.xlu0.b32.start [1/2] (short) (narrow) %v8219_v34, 8 }
 0x4b3   :  { %v9752_v59 = vadd.f32 %v8221_v37, %v8219_v34  ;;  %6872 = vmatpush.msrb.mxu3 %v10285_v11  ;;  %v10295_v11 = vld [vmem:[#allocation31_spill] sm:$0xff]  ;;  %v7001_v3 = vsub.f32 %v6980_v29, %v7000_v12 }
 0x4b5   :  { %v9758_v43 = vpop.trf.xlu1 }
 0x4b8   :  { %6124 = vmatmul.f32.vlgmr.msrb.gmra.mxu2 %v9728_v23  ;;  %6154 = vmatmul.f32.gmra.mxu3 %v6006_v1 }
 0x4b9   :  { %6835 = vmatpush.msrb.mxu2 %v10286_v57 }
 0x4ba   :  { %6623 = vxpose.xlu0.b32.end [2/2] (short) (narrow) %v8221_v37, 8 }
 0x4bb   :  { %6837 = vmatpush.msrb.mxu2 %v10287_v28 }
 0x4bd   :  { %v9760_v58 = vpop.trf.xlu1 }
 0x4c0   :  { %6128 = vmatmul.f32.gmra.mxu2 %v6006_v1 }
 0x4ea   :  { %v4648_v23 = vpop.xlane.xlu1 %4647 }
 0x4eb   :  { %8222 = vrcp.f32 %v4648_v23 }
 0x4f1   :  { %v8223_v45 = vpop.eup %8222 }
 0x4f2   :  { %v6414_v1 = vpop.trf.xlu0  ;;  %v6174_v2 = vmul.f32 %v8223_v45, %v4648_v23  ;;  %v7002_v23 = vand.u32 4294901760, %v7001_v3 }
 0x4f3   :  { %v6656_v56 = vsel %vm6654_vm1, %v6414_v1, 0  ;;  %v10301_v1 = vld [vmem:[#allocation43_spill] sm:$0xff] }
 0x4f4   :  { %v6676_v7 = vand.u32 4294901760, %v6656_v56  ;;  %v6190_v51 = vsub.f32 2.0, %v6174_v2  ;;  %v7003_v33 = vsub.f32 %v7001_v3, %v7002_v23  ;;  %v10302_v2 = vld [vmem:[#allocation37_spill] sm:$0xff] }
 0x4f6   :  { %v6677_v44 = vsub.f32 %v6656_v56, %v6676_v7  ;;  %6712 = vmatmul.f32.vlgmr.msra.gmra.mxu1 %v6676_v7  ;;  %v6206_v50 = vmul.f32 %v8223_v45, %v6190_v51  ;;  %v10305_v51 = vld [vmem:[#allocation39_spill] sm:$0xff] }
 0x4f7   :  { %6919 = vmatpush.msra.mxu1 %v10286_v57 }
 0x4f8   :  { %v6678_v63 = vand.u32 4294901760, %v6677_v44  ;;  %6738 = vmatmul.f32.vlgmr.msra.gmra.mxu2 %v6677_v44  ;;  %v6222_v14 = vmul.f32 %v6206_v50, %v4871_v25  ;;  %v7304_v25 = vsel %vm6654_vm1, %v9758_v43, 0  ;;  %v10306_v50 = vld [vmem:[#allocation42_spill] sm:$0xff] }
 0x4f9   :  { %6946 = vmatpush.msra.mxu2 %v10288_v19  ;;  %6921 = vmatpush.msra.mxu1 %v10287_v28  ;;  %v10309_v19 = vld [vmem:[#allocation50_spill] sm:$0xff] }
 0x4fa   :  { %v6679_v46 = vsub.f32 %v6677_v44, %v6678_v63  ;;  %6763 = vmatmul.f32.vlgmr.msra.gmra.mxu3 %v6678_v63  ;;  %8007 = vst [vmem:[#allocation10 + $0x8] sm:$0xff] %v6222_v14  ;;  %v8023_v16 = vmul.f32 %v9777_v21, %v6222_v14  ;;  %v10308_v63 = vld [vmem:[#allocation38_spill] sm:$0xff] }
 0x4fb   :  { %6950 = vmatpush.msra.mxu2 %v10289_v52  ;;  %6971 = vmatpush.msra.mxu3 %v10286_v57  ;;  %v10296_v57 = vld [vmem:[#allocation33_spill] sm:$0xff]  ;;  %v10311_v52 = vld [vmem:[#allocation47_spill] sm:$0xff] }
 0x4fc   :  { %v6680_v15 = vand.u32 4294901760, %v6679_v46  ;;  %8039 = vst [vmem:[#allocation10 + $0x10] sm:$0xff] %v8023_v16  ;;  %v9817_v46 = vand.u32 4294901760, %v7304_v25  ;;  %v10310_v16 = vld [vmem:[#allocation52_spill] sm:$0xff] }
 0x4fd   :  { %6973 = vmatpush.msra.mxu3 %v10287_v28 }
 0x4fe   :  { %6681 = vmatmul.f32.vlgmr.msra.gmra.mxu0 %v6680_v15  ;;  %6813 = vmatmul.f32.vlgmr.msrb.gmra.mxu1 %v6676_v7  ;;  %v10313_v15 = vld [vmem:[#allocation46_spill] sm:$0xff]  ;;  %v7325_v29 = vsub.f32 %v7304_v25, %v9817_v46 }
 0x4ff   :  { %6894 = vmatpush.msra.mxu0 %v10290_v20  ;;  %7028 = vmatpush.msrb.mxu1 %v10291_v32 }
 0x500   :  { %6843 = vmatmul.f32.vlgmr.msrb.gmra.mxu2 %v6842_v53  ;;  %v10312_v53 = vld [vmem:[#allocation49_spill] sm:$0xff]  ;;  %v7326_v32 = vand.u32 4294901760, %v7325_v29 }
 0x501   :  { %6897 = vmatpush.msra.mxu0 %v10292_v9  ;;  %7056 = vmatpush.msrb.mxu2 %v10293_v54 }
 0x502   :  { %6874 = vmatmul.f32.vlgmr.msrb.gmra.mxu3 %v6838_v24  ;;  %v6510_v34 = vpop.trf.xlu0  ;;  %7034 = vmatpush.msrb.mxu1 %v10294_v60  ;;  %v7327_v54 = vsub.f32 %v7325_v29, %v7326_v32 }
 0x503   :  { %v7142_v37 = vsel %vm6654_vm1, %v6510_v34, 0  ;;  %7059 = vmatpush.msrb.mxu2 %v10295_v11  ;;  %7081 = vmatpush.msrb.mxu3 %v10296_v57  ;;  %v10314_v34 = vld [vmem:[#allocation53_spill] sm:$0xff]  ;;  %v10315_v11 = vld [vmem:[#allocation48_spill] sm:$0xff] }
 0x504   :  { %v7162_v28 = vand.u32 4294901760, %v7142_v37 }
 0x505   :  { %7083 = vmatpush.msrb.mxu3 %v10297_v13 }
 0x506   :  { %6790 = vmatmul.f32.vlgmr.msrb.gmra.mxu0 %v6676_v7  ;;  %6925 = vmatmul.f32.vlgmr.msra.gmra.mxu1 %v6840_v30  ;;  %v7163_v4 = vsub.f32 %v7142_v37, %v7162_v28  ;;  %v10304_v30 = vld [vmem:[#allocation44_spill] sm:$0xff]  ;;  %v7004_v7 = vand.u32 4294901760, %v7003_v33 }
 0x507   :  { %6997 = vmatpush.msrb.mxu0 %v10296_v57  ;;  %7133 = vmatpush.msra.mxu1 %v10296_v57  ;;  %v10316_v57 = vld [vmem:[#allocation95_spill] sm:$0xff]  ;;  %v10322_v33 = vld [vmem:[#allocation68_spill] sm:$0xff] }
 0x508   :  { %6952 = vmatmul.f32.vlgmr.msra.gmra.mxu2 %v6838_v24  ;;  %v7164_v45 = vand.u32 4294901760, %v7163_v4 }
 0x509   :  { %6999 = vmatpush.msrb.mxu0 %v10297_v13  ;;  %7159 = vmatpush.msra.mxu2 %v10298_v61 }
 0x50a   :  { %6975 = vmatmul.f32.vlgmr.msra.gmra.mxu3 %v6838_v24  ;;  %7135 = vmatpush.msra.mxu1 %v10297_v13  ;;  %v7165_v56 = vsub.f32 %v7163_v4, %v7164_v45  ;;  %v10303_v24 = vld [vmem:[#allocation32_spill] sm:$0xff]  ;;  %v10317_v13 = vld [vmem:[#allocation55_spill] sm:$0xff] }
 0x50b   :  { %7161 = vmatpush.msra.mxu2 %v10299_v62  ;;  %7190 = vmatpush.msra.mxu3 %v10300_v26  ;;  %v10320_v26 = vld [vmem:[#allocation54_spill] sm:$0xff] }
 0x50d   :  { %7196 = vmatpush.msra.mxu3 %v10301_v1 }
 0x50e   :  { %6900 = vmatmul.f32.vlgmr.msra.gmra.mxu0 %v9766_v27  ;;  %7036 = vmatmul.f32.vlgmr.msrb.gmra.mxu1 %v7000_v12  ;;  %v7166_v27 = vand.u32 4294901760, %v7165_v56 }
 0x50f   :  { %7108 = vmatpush.msra.mxu0 %v10302_v2  ;;  %7243 = vmatpush.msrb.mxu1 %v10298_v61 }
 0x510   :  { %7062 = vmatmul.f32.vlgmr.msrb.gmra.mxu2 %v7001_v3  ;;  %v4690_v37 = vpop.xlane.xlu1 %4689 }
 0x511   :  { %7112 = vmatpush.msra.mxu0 %v10303_v24  ;;  %7270 = vmatpush.msrb.mxu2 %v10304_v30  ;;  %8224 = vrcp.f32 %v4690_v37  ;;  %v10324_v24 = vld [vmem:[#allocation65_spill] sm:$0xff] }
 0x512   :  { %7087 = vmatmul.f32.vlgmr.msrb.gmra.mxu3 %v7002_v23  ;;  %7245 = vmatpush.msrb.mxu1 %v10299_v62  ;;  %v6574_v44 = vpop.trf.xlu0 }
 0x513   :  { %7274 = vmatpush.msrb.mxu2 %v10305_v51  ;;  %7295 = vmatpush.msrb.mxu3 %v10298_v61  ;;  %v7466_v14 = vsel %vm6654_vm1, %v6574_v44, 0  ;;  %v10319_v61 = vld [vmem:[#allocation73_spill] sm:$0xff]  ;;  %v10325_v51 = vld [vmem:[#allocation62_spill] sm:$0xff] }
 0x514   :  { %v9822_v43 = vand.u32 4294901760, %v7466_v14 }
 0x515   :  { %7297 = vmatpush.msrb.mxu3 %v10299_v62 }
 0x516   :  { %7005 = vmatmul.f32.vlgmr.msrb.gmra.mxu0 %v7004_v7  ;;  %7137 = vmatmul.f32.vlgmr.msra.gmra.mxu1 %v7000_v12  ;;  %v9829_v20 = vsub.f32 %v7466_v14, %v9822_v43  ;;  %v10326_v14 = vld [vmem:[#allocation72_spill] sm:$0xff] }
 0x517   :  { %7218 = vmatpush.msrb.mxu0 %v10306_v50  ;;  %7352 = vmatpush.msra.mxu1 %v10307_v10 }
 0x518   :  { %7167 = vmatmul.f32.vlgmr.msra.gmra.mxu2 %v7166_v27  ;;  %v7488_v9 = vand.u32 4294901760, %v9829_v20  ;;  %v4693_v1 = vpop.xlane.xlu2 %4692 }
 0x519   :  { %7221 = vmatpush.msrb.mxu0 %v10308_v63  ;;  %7380 = vmatpush.msra.mxu2 %v10309_v19  ;;  %8226 = vrcp.f32 %v4693_v1 }
 0x51a   :  { %7198 = vmatmul.f32.vlgmr.msra.gmra.mxu3 %v7162_v28  ;;  %7358 = vmatpush.msra.mxu1 %v10310_v16  ;;  %v7489_v60 = vsub.f32 %v9829_v20, %v7488_v9 }
 0x51b   :  { %7383 = vmatpush.msra.mxu2 %v10311_v52  ;;  %7405 = vmatpush.msra.mxu3 %v10312_v53  ;;  %v10327_v52 = vld [vmem:[#allocation77_spill] sm:$0xff] }
 0x51c   :  { %v7490_v3 = vand.u32 4294901760, %v7489_v60 }
 0x51d   :  { %7407 = vmatpush.msra.mxu3 %v10313_v15 }
 0x51e   :  { %7114 = vmatmul.f32.vlgmr.msra.gmra.mxu0 %v7000_v12  ;;  %7249 = vmatmul.f32.vlgmr.msrb.gmra.mxu1 %v7164_v45  ;;  %v10321_v45 = vld [vmem:[#allocation66_spill] sm:$0xff]  ;;  %v6066_v2 = vpop.f32.mrf.mxu0 }
 0x51f   :  { %7321 = vmatpush.msra.mxu0 %v10312_v53  ;;  %7457 = vmatpush.msrb.mxu1 %v10312_v53 }
 0x520   :  { %7276 = vmatmul.f32.vlgmr.msrb.gmra.mxu2 %v7162_v28  ;;  %v6095_v44 = vpop.f32.mrf.mxu1 }
 0x521   :  { %7323 = vmatpush.msra.mxu0 %v10313_v15  ;;  %7483 = vmatpush.msrb.mxu2 %v10210_v40 }
 0x522   :  { %7299 = vmatmul.f32.vlgmr.msrb.gmra.mxu3 %v7162_v28  ;;  %7459 = vmatpush.msrb.mxu1 %v10313_v15  ;;  %v6038_v12 = vpop.f32.mrf.mxu3  ;;  %v10328_v15 = vld [vmem:[#allocation67_spill] sm:$0xff] }
 0x523   :  { %7485 = vmatpush.msrb.mxu2 %v10205_v48  ;;  %7514 = vmatpush.msrb.mxu3 %v10206_v22  ;;  %v7328_v22 = vand.u32 4294901760, %v7327_v54  ;;  %v10329_v54 = vld [vmem:[#allocation75_spill] sm:$0xff] }
 0x525   :  { %7520 = vmatpush.msrb.mxu3 %v10202_v55  ;;  %v4655_v55 = vsel %vm4549_vm0, %v10316_v57, 0.0 }
 0x526   :  { %7224 = vmatmul.f32.vlgmr.msrb.gmra.mxu0 %v7163_v4  ;;  %7360 = vmatmul.f32.vlgmr.msra.gmra.mxu1 %v9817_v46  ;;  %v7628_v4 = vsel %vm6654_vm1, %v9760_v58, 0 }
 0x527   :  { %7432 = vmatpush.msrb.mxu0 %v10314_v34  ;;  %7567 = vmatpush.msra.mxu1 %v10210_v40  ;;  %v9855_v23 = vand.u32 4294901760, %v7628_v4 }
 0x528   :  { %7386 = vmatmul.f32.vlgmr.msra.gmra.mxu2 %v7325_v29 }
 0x529   :  { %7436 = vmatpush.msrb.mxu0 %v10315_v11  ;;  %7594 = vmatpush.msra.mxu2 %v10207_v47  ;;  %v10318_v47 = vld [vmem:[#allocation58_spill] sm:$0xff]  ;;  %v7649_v30 = vsub.f32 %v7628_v4, %v9855_v23  ;;  %v6101_v11 = vpop.f32.mrf.mxu1 }
 0x52a   :  { %7411 = vmatmul.f32.vlgmr.msra.gmra.mxu3 %v7326_v32  ;;  %7569 = vmatpush.msra.mxu1 %v10205_v48 }
 0x52b   :  { %v6004_v28 = vpop.f32.mrf.mxu2  ;;  %4656 = vadd.xlane.f32.xlu0 %v4655_v55  ;;  %7598 = vmatpush.msra.mxu2 %v10317_v13  ;;  %v6042_v62 = vpop.f32.mrf.mxu3  ;;  %v7650_v25 = vand.u32 4294901760, %v7649_v30 }
 0x52c   :  { %7619 = vmatpush.msra.mxu3 %v10210_v40  ;;  %v8225_v40 = vpop.eup %8224  ;;  %v6039_v58 = vadd.f32 %v6038_v12, %v6004_v28  ;;  %v9882_v28 = vld [vmem:[#allocation10 + $0x1c0] sm:$0xff] }
 0x52d   :  { %v6188_v7 = vmul.f32 %v8225_v40, %v4690_v37  ;;  %v8227_v19 = vpop.eup %8226  ;;  %v7651_v29 = vsub.f32 %v7649_v30, %v7650_v25 }
 0x52e   :  { %7329 = vmatmul.f32.vlgmr.msra.gmra.mxu0 %v7328_v22  ;;  %7461 = vmatmul.f32.vlgmr.msrb.gmra.mxu1 %v9817_v46  ;;  %v6067_v27 = vadd.f32 %v6066_v2, %v6039_v58  ;;  %v6189_v12 = vmul.f32 %v8227_v19, %v4693_v1  ;;  %v10331_v22 = vld [vmem:[#allocation64_spill] sm:$0xff]  ;;  %v10335_v58 = vld [vmem:[#allocation70_spill] sm:$0xff] }
 0x52f   :  { %7542 = vmatpush.msra.mxu0 %v10318_v47  ;;  %7621 = vmatpush.msra.mxu3 %v10205_v48  ;;  %v10323_v48 = vld [vmem:[#allocation63_spill] sm:$0xff]  ;;  %v6204_v50 = vsub.f32 2.0, %v6188_v7  ;;  %v7652_v57 = vand.u32 4294901760, %v7651_v29 }
 0x530   :  { %7491 = vmatmul.f32.vlgmr.msrb.gmra.mxu2 %v7490_v3  ;;  %7676 = vmatpush.msrb.mxu1 %v10319_v61  ;;  %v6096_v63 = vadd.f32 %v6095_v44, %v6067_v27  ;;  %v6205_v55 = vsub.f32 2.0, %v6189_v12  ;;  %v10332_v3 = vld [vmem:[#allocation76_spill] sm:$0xff]  ;;  %v10333_v61 = vld [vmem:[#allocation71_spill] sm:$0xff] }
 0x531   :  { %7545 = vmatpush.msra.mxu0 %v10320_v26  ;;  %7704 = vmatpush.msrb.mxu2 %v10321_v45  ;;  %v6220_v32 = vmul.f32 %v8225_v40, %v6204_v50  ;;  %v10334_v40 = vld [vmem:[#allocation74_spill] sm:$0xff] }
 0x532   :  { %7522 = vmatmul.f32.vlgmr.msrb.gmra.mxu3 %v9822_v43  ;;  %7682 = vmatpush.msrb.mxu1 %v10322_v33  ;;  %v6221_v26 = vmul.f32 %v8227_v19, %v6205_v55  ;;  %v9892_v33 = vld [vmem:[#allocation10 + $0x1e0] sm:$0xff] }
 0x533   :  { %v6012_v56 = vpop.f32.mrf.mxu2  ;;  %7707 = vmatpush.msrb.mxu2 %v10323_v48  ;;  %7729 = vmatpush.msrb.mxu3 %v10324_v24 }
 0x534   :  { %v6043_v10 = vadd.f32 %v6042_v62, %v6012_v56 }
 0x535   :  { %7731 = vmatpush.msrb.mxu3 %v10325_v51 }
 0x536   :  { %7438 = vmatmul.f32.vlgmr.msrb.gmra.mxu0 %v9817_v46  ;;  %7573 = vmatmul.f32.vlgmr.msra.gmra.mxu1 %v7488_v9  ;;  %v6151_v46 = vpop.f32.mrf.mxu3  ;;  %v6071_v9 = vpop.f32.mrf.mxu0 }
 0x537   :  { %7645 = vmatpush.msrb.mxu0 %v10324_v24  ;;  %7781 = vmatpush.msra.mxu1 %v10324_v24  ;;  %v6072_v34 = vadd.f32 %v6071_v9, %v6043_v10  ;;  %v10336_v10 = vld [vmem:[#allocation59_spill] sm:$0xff] }
 0x538   :  { %7600 = vmatmul.f32.vlgmr.msra.gmra.mxu2 %v9822_v43 }
 0x539   :  { %7647 = vmatpush.msrb.mxu0 %v10325_v51  ;;  %7783 = vmatpush.msra.mxu1 %v10325_v51  ;;  %v6102_v13 = vadd.f32 %v6101_v11, %v6072_v34  ;;  %v6363_v11 = vadd.f32 %v9702_v39, %v9696_v6 }
 0x53a   :  { %7623 = vmatmul.f32.vlgmr.msra.gmra.mxu3 %v9822_v43  ;;  %7807 = vmatpush.msra.mxu2 %v10326_v14  ;;  %v10330_v43 = vld [vmem:[#allocation69_spill] sm:$0xff] }
 0x53b   :  { %v6125_v16 = vpop.f32.mrf.mxu2  ;;  %7838 = vmatpush.msra.mxu3 %v10327_v52 }
 0x53c   :  { %v6126_v53 = vadd.f32 %v6125_v16, %v6096_v63  ;;  %7809 = vmatpush.msra.mxu2 %v10328_v15 }
 0x53d   :  { %7844 = vmatpush.msra.mxu3 %v10329_v54 }
 0x53e   :  { %v6152_v60 = vadd.f32 %v6151_v46, %v6126_v53  ;;  %7548 = vmatmul.f32.vlgmr.msra.gmra.mxu0 %v9829_v20  ;;  %7684 = vmatmul.f32.vlgmr.msrb.gmra.mxu1 %v9855_v23  ;;  %v6155_v62 = vpop.f32.mrf.mxu3 }
 0x53f   :  { %7756 = vmatpush.msra.mxu0 %v10330_v43  ;;  %7891 = vmatpush.msrb.mxu1 %v10326_v14 }
 0x540   :  { %v6236_v37 = vmul.f32 %v6220_v32, %v6152_v60  ;;  %7710 = vmatmul.f32.vlgmr.msrb.gmra.mxu2 %v7649_v30  ;;  %v6342_v30 = vadd.f32 %v9692_v38, %v9688_v17 }
 0x541   :  { %7760 = vmatpush.msra.mxu0 %v10331_v22  ;;  %7893 = vmatpush.msrb.mxu1 %v10328_v15 }
 0x542   :  { %8021 = vst [vmem:[#allocation10 + $0x1c8] sm:$0xff] %v6236_v37  ;;  %v8037_v20 = vmul.f32 %v9882_v28, %v6236_v37  ;;  %7735 = vmatmul.f32.vlgmr.msrb.gmra.mxu3 %v7650_v25  ;;  %7918 = vmatpush.msrb.mxu2 %v10332_v3  ;;  %v6343_v27 = vrot.slane %v6342_v30, 4 }
 0x543   :  { %v6129_v4 = vpop.f32.mrf.mxu2  ;;  %7943 = vmatpush.msrb.mxu3 %v10326_v14 }
 0x544   :  { %8053 = vst [vmem:[#allocation10 + $0x1d0] sm:$0xff] %v8037_v20  ;;  %v6130_v47 = vadd.f32 %v6129_v4, %v6102_v13  ;;  %7922 = vmatpush.msrb.mxu2 %v10333_v61  ;;  %v6344_v50 = vadd.f32 %v6343_v27, %v6342_v30  ;;  %v6364_v4 = vrot.slane %v6363_v11, 4  ;;  %v10339_v30 = vld [vmem:[#allocation60_spill] sm:$0xff] }
 0x545   :  { %7945 = vmatpush.msrb.mxu3 %v10328_v15  ;;  %v10338_v15 = vld [vmem:[#allocation61_spill] sm:$0xff] }
 0x546   :  { %v6156_v45 = vadd.f32 %v6155_v62, %v6130_v47  ;;  %7653 = vmatmul.f32.vlgmr.msrb.gmra.mxu0 %v7652_v57  ;;  %7785 = vmatmul.f32.vlgmr.msra.gmra.mxu1 %v9855_v23  ;;  %v6345_v14 = vrot.slane %v6344_v50, 2  ;;  %v6357_v29 = vrot.slane %v10338_v15, 4 }
 0x547   :  { %7866 = vmatpush.msrb.mxu0 %v10334_v40 }
 0x548   :  { %v6237_v1 = vmul.f32 %v6221_v26, %v6156_v45  ;;  %v6346_v46 = vadd.f32 %v6345_v14, %v6344_v50  ;;  %v6358_v54 = vadd.f32 %v6357_v29, %v10338_v15  ;;  %v8262_v14 = vld [vmem:[#allocation10 + $0x20] sm:$0xff] }
 0x549   :  { %7869 = vmatpush.msrb.mxu0 %v10335_v58 }
 0x54a   :  { %8022 = vst [vmem:[#allocation10 + $0x1e8] sm:$0xff] %v6237_v1  ;;  %v8038_v2 = vmul.f32 %v9892_v33, %v6237_v1  ;;  %v6347_v16 = vrot.slane %v6346_v46, 1  ;;  %v6359_v55 = vrot.slane %v6358_v54, 2 }
 0x54c   :  { %8054 = vst [vmem:[#allocation10 + $0x1f0] sm:$0xff] %v8038_v2  ;;  %v6348_v38 = vadd.f32 %v6347_v16, %v6346_v46  ;;  %v6360_v47 = vadd.f32 %v6359_v55, %v6358_v54  ;;  %v6365_v2 = vadd.f32 %v6364_v4, %v6363_v11 }
 0x54e   :  { %7762 = vmatmul.f32.vlgmr.msra.gmra.mxu0 %v9855_v23  ;;  %v10337_v23 = vld [vmem:[#allocation51_spill] sm:$0xff]  ;;  %8228 = vrcp.f32 %v6348_v38  ;;  %v6361_v58 = vrot.slane %v6360_v47, 1 }
 0x54f   :  { %v6349_v63 = vadd.f32 %v10337_v23, %v10336_v10 }
 0x550   :  { %v6362_v27 = vadd.f32 %v6361_v58, %v6360_v47  ;;  %v8263_v47 = vld [vmem:[#allocation10 + $0x40] sm:$0xff] }
 0x551   :  { %v6350_v19 = vrot.slane %v6349_v63, 4 }
 0x553   :  { %v6351_v17 = vadd.f32 %v6350_v19, %v6349_v63 }
 0x554   :  { %v8229_v12 = vpop.eup %8228 }
 0x555   :  { %v6352_v52 = vrot.slane %v6351_v17, 2  ;;  %v7959_v13 = vmul.f32 %v8229_v12, %v6348_v38 }
 0x556   :  { %v6638_v56 = vpop.trf.xlu0 }
 0x557   :  { %v7790_v48 = vsel %vm6654_vm1, %v6638_v56, 0  ;;  %v6353_v32 = vadd.f32 %v6352_v52, %v6351_v17  ;;  %v7967_v61 = vsub.f32 2.0, %v7959_v13 }
 0x558   :  { %v7810_v24 = vand.u32 4294901760, %v7790_v48 }
 0x559   :  { %v6354_v9 = vrot.slane %v6353_v32, 1 }
 0x55a   :  { %v7811_v7 = vsub.f32 %v7790_v48, %v7810_v24  ;;  %7846 = vmatmul.f32.vlgmr.msra.gmra.mxu3 %v7810_v24  ;;  %v7975_v48 = vmul.f32 %v8229_v12, %v7967_v61 }
 0x55b   :  { %v6355_v57 = vadd.f32 %v6354_v9, %v6353_v32 }
 0x55c   :  { %v7812_v51 = vand.u32 4294901760, %v7811_v7  ;;  %7872 = vmatmul.f32.vlgmr.msrb.gmra.mxu0 %v7811_v7 }
 0x55d   :  { %8230 = vrcp.f32 %v6355_v57 }
 0x55e   :  { %v7813_v44 = vsub.f32 %v7811_v7, %v7812_v51  ;;  %7897 = vmatmul.f32.vlgmr.msrb.gmra.mxu1 %v7812_v51  ;;  %v10340_v7 = vld [vmem:[#allocation103_spill] sm:$0xff]  ;;  %8232 = vrcp.f32 %v6362_v27 }
 0x55f   :  { %v6370_v51 = vadd.f32 %v10340_v7, %v10339_v30 }
 0x560   :  { %v7814_v25 = vand.u32 4294901760, %v7813_v44  ;;  %v6366_v44 = vrot.slane %v6365_v2, 2 }
 0x561   :  { %v6371_v17 = vrot.slane %v6370_v51, 4 }
 0x562   :  { %7815 = vmatmul.f32.vlgmr.msra.gmra.mxu2 %v7814_v25  ;;  %7947 = vmatmul.f32.vlgmr.msrb.gmra.mxu3 %v7810_v24  ;;  %v6367_v52 = vadd.f32 %v6366_v44, %v6365_v2 }
 0x563   :  { %v8231_v6 = vpop.eup %8230  ;;  %v6372_v9 = vadd.f32 %v6371_v17, %v6370_v51 }
 0x564   :  { %v7960_v50 = vmul.f32 %v8231_v6, %v6355_v57  ;;  %v6368_v32 = vrot.slane %v6367_v52, 1 }
 0x566   :  { %v7968_v15 = vsub.f32 2.0, %v7960_v50  ;;  %v6369_v55 = vadd.f32 %v6368_v32, %v6367_v52 }
 0x568   :  { %v7976_v12 = vmul.f32 %v8231_v6, %v7968_v15  ;;  %8234 = vrcp.f32 %v6369_v55 }
 0x56a   :  { %7924 = vmatmul.f32.vlgmr.msrb.gmra.mxu2 %v7810_v24 }
 0x573   :  { %v6713_v53 = vpop.f32.mrf.mxu1 }
 0x57b   :  { %v6682_v34 = vpop.f32.mrf.mxu0  ;;  %v6739_v60 = vpop.f32.mrf.mxu2 }
 0x57c   :  { %v6714_v43 = vadd.f32 %v6713_v53, %v6682_v34  ;;  %v6814_v37 = vpop.f32.mrf.mxu1  ;;  %v8233_v34 = vpop.eup %8232 }
 0x57d   :  { %v6764_v22 = vpop.f32.mrf.mxu3  ;;  %v7961_v4 = vmul.f32 %v8233_v34, %v6362_v27  ;;  %v8235_v44 = vpop.eup %8234 }
 0x57e   :  { %v6740_v20 = vadd.f32 %v6739_v60, %v6714_v43 }
 0x57f   :  { %v7969_v58 = vsub.f32 2.0, %v7961_v4 }
 0x580   :  { %v6765_v3 = vadd.f32 %v6764_v22, %v6740_v20  ;;  %v6377_v22 = vadd.f32 %v9711_v49, %v9708_v41  ;;  %v6373_v20 = vrot.slane %v6372_v9, 2 }
 0x581   :  { %v7977_v51 = vmul.f32 %v8233_v34, %v7969_v58 }
 0x583   :  { %v6791_v62 = vpop.f32.mrf.mxu0  ;;  %v6844_v26 = vpop.f32.mrf.mxu2 }
 0x584   :  { %v6792_v45 = vadd.f32 %v6791_v62, %v6765_v3  ;;  %v6926_v40 = vpop.f32.mrf.mxu1  ;;  %v9910_v62 = vld [vmem:[#allocation10 + $0x60] sm:$0xff] }
 0x585   :  { %v6875_v1 = vpop.f32.mrf.mxu3 }
 0x586   :  { %v6815_v56 = vadd.f32 %v6814_v37, %v6792_v45  ;;  %v6876_v24 = vadd.f32 %v6875_v1, %v6844_v26  ;;  %v6374_v1 = vadd.f32 %v6373_v20, %v6372_v9  ;;  %v6385_v9 = vrot.slane %v9647_v31, 4 }
 0x588   :  { %v7983_v39 = vmul.f32 %v7975_v48, %v6815_v56  ;;  %v6375_v6 = vrot.slane %v6374_v1, 1 }
 0x58a   :  { %v8055_v25 = vperm.slane %v7983_v39, 0 }
 0x58b   :  { %v6901_v10 = vpop.f32.mrf.mxu0  ;;  %v6953_v23 = vpop.f32.mrf.mxu2 }
 0x58c   :  { %v8063_v63 = vmul.f32 %v9777_v21, %v8055_v25  ;;  %v8064_v19 = vmul.f32 %v8262_v14, %v8055_v25  ;;  %v6902_v46 = vadd.f32 %v6901_v10, %v6876_v24  ;;  %v7037_v16 = vpop.f32.mrf.mxu1  ;;  %v10341_v24 = vld [vmem:[#allocation56_spill] sm:$0xff] }
 0x58d   :  { %v6976_v38 = vpop.f32.mrf.mxu3  ;;  %v4945_v30 = vadd.f32 %v9619_v5, %v10341_v24  ;;  %v8266_v5 = vld [vmem:[#allocation10 + $0xa0] sm:$0xff] }
 0x58e   :  { %8079 = vst [vmem:[#allocation10 + $0x18] sm:$0xff] %v8063_v63  ;;  %v6927_v53 = vadd.f32 %v6926_v40, %v6902_v46  ;;  %v6378_v40 = vrot.slane %v6377_v22, 4 }
 0x58f   :  { %8080 = vst [vmem:[#allocation10 + $0x38] sm:$0xff] %v8064_v19  ;;  %v4974_v25 = vadd.f32 %v9654_v35, %v4945_v30  ;;  %v7962_v19 = vmul.f32 %v8235_v44, %v6369_v55 }
 0x590   :  { %v6954_v29 = vadd.f32 %v6953_v23, %v6927_v53  ;;  %v6379_v39 = vadd.f32 %v6378_v40, %v6377_v22  ;;  %v6376_v23 = vadd.f32 %v6375_v6, %v6374_v1 }
 0x591   :  { %v5004_v17 = vadd.f32 %v9643_v8, %v4974_v25 }
 0x592   :  { %v6977_v54 = vadd.f32 %v6976_v38, %v6954_v29  ;;  %v6380_v63 = vrot.slane %v6379_v39, 2  ;;  %v8265_v38 = vld [vmem:[#allocation10 + $0x80] sm:$0xff] }
 0x593   :  { %v7006_v60 = vpop.f32.mrf.mxu0  ;;  %v7063_v21 = vpop.f32.mrf.mxu2 }
 0x594   :  { %v7984_v43 = vmul.f32 %v7976_v12, %v6977_v54  ;;  %v7038_v37 = vadd.f32 %v7037_v16, %v7006_v60  ;;  %v7138_v11 = vpop.f32.mrf.mxu1  ;;  %v6381_v54 = vadd.f32 %v6380_v63, %v6379_v39  ;;  %v5032_v12 = vadd.f32 %v9657_v18, %v5004_v17 }
 0x595   :  { %v7088_v57 = vpop.f32.mrf.mxu3 }
 0x596   :  { %v8056_v13 = vperm.slane %v7984_v43, 0  ;;  %v7064_v3 = vadd.f32 %v7063_v21, %v7038_v37  ;;  %v7970_v21 = vsub.f32 2.0, %v7962_v19  ;;  %v6382_v37 = vrot.slane %v6381_v54, 1 }
 0x597   :  { %v5058_v22 = vadd.f32 %v9663_v36, %v5032_v12  ;;  %v8267_v36 = vld [vmem:[#allocation10 + $0xc0] sm:$0xff] }
 0x598   :  { %v8065_v61 = vmul.f32 %v8263_v47, %v8056_v13  ;;  %v8066_v26 = vmul.f32 %v9910_v62, %v8056_v13  ;;  %v7089_v45 = vadd.f32 %v7088_v57, %v7064_v3  ;;  %v7978_v20 = vmul.f32 %v8235_v44, %v7970_v21 }
 0x599   :  { %v6383_v40 = vadd.f32 %v6382_v37, %v6381_v54 }
 0x59a   :  { %8081 = vst [vmem:[#allocation10 + $0x58] sm:$0xff] %v8065_v61 }
 0x59b   :  { %8082 = vst [vmem:[#allocation10 + $0x78] sm:$0xff] %v8066_v26  ;;  %v7115_v41 = vpop.f32.mrf.mxu0  ;;  %v7168_v49 = vpop.f32.mrf.mxu2 }
 0x59c   :  { %v7116_v2 = vadd.f32 %v7115_v41, %v7089_v45  ;;  %v7250_v56 = vpop.f32.mrf.mxu1 }
 0x59d   :  { %v7199_v48 = vpop.f32.mrf.mxu3 }
 0x59e   :  { %v7139_v7 = vadd.f32 %v7138_v11, %v7116_v2  ;;  %v4657_v27 = vpop.xlane.xlu0 %4656  ;;  %v7200_v10 = vadd.f32 %v7199_v48, %v7168_v49  ;;  %v6386_v11 = vadd.f32 %v6385_v9, %v9647_v31 }
 0x59f   :  { %8236 = vrcp.f32 %v4657_v27 }
 0x5a0   :  { %v7985_v50 = vmul.f32 %v7977_v51, %v7139_v7  ;;  %8238 = vrcp.f32 %v6376_v23  ;;  %v6387_v1 = vrot.slane %v6386_v11, 2 }
 0x5a1   :  { %8240 = vrcp.f32 %v6383_v40 }
 0x5a2   :  { %v8057_v14 = vperm.slane %v7985_v50, 0  ;;  %v6388_v39 = vadd.f32 %v6387_v1, %v6386_v11 }
 0x5a3   :  { %v7225_v46 = vpop.f32.mrf.mxu0  ;;  %v7277_v16 = vpop.f32.mrf.mxu2 }
 0x5a4   :  { %v8067_v52 = vmul.f32 %v8265_v38, %v8057_v14  ;;  %v8068_v53 = vmul.f32 %v8266_v5, %v8057_v14  ;;  %v7226_v15 = vadd.f32 %v7225_v46, %v7200_v10  ;;  %v7361_v29 = vpop.f32.mrf.mxu1  ;;  %v6389_v44 = vrot.slane %v6388_v39, 1  ;;  %v8269_v38 = vld [vmem:[#allocation10 + $0x100] sm:$0xff] }
 0x5a5   :  { %v8237_v32 = vpop.eup %8236  ;;  %v7300_v35 = vpop.f32.mrf.mxu3  ;;  %v8270_v5 = vld [vmem:[#allocation10 + $0x120] sm:$0xff] }
 0x5a6   :  { %8083 = vst [vmem:[#allocation10 + $0x98] sm:$0xff] %v8067_v52  ;;  %v6177_v34 = vmul.f32 %v8237_v32, %v4657_v27  ;;  %v7251_v60 = vadd.f32 %v7250_v56, %v7226_v15  ;;  %v8239_v13 = vpop.eup %8238  ;;  %v8268_v56 = vld [vmem:[#allocation10 + $0xe0] sm:$0xff]  ;;  %v6390_v14 = vadd.f32 %v6389_v44, %v6388_v39 }
 0x5a7   :  { %8084 = vst [vmem:[#allocation10 + $0xb8] sm:$0xff] %v8068_v53  ;;  %v7963_v49 = vmul.f32 %v8239_v13, %v6376_v23  ;;  %v8241_v50 = vpop.eup %8240 }
 0x5a8   :  { %v6193_v8 = vsub.f32 2.0, %v6177_v34  ;;  %v7278_v43 = vadd.f32 %v7277_v16, %v7251_v60  ;;  %v7964_v46 = vmul.f32 %v8241_v50, %v6383_v40  ;;  %8242 = vrcp.f32 %v6390_v14 }
 0x5a9   :  { %v7971_v24 = vsub.f32 2.0, %v7963_v49 }
 0x5aa   :  { %v6209_v57 = vmul.f32 %v8237_v32, %v6193_v8  ;;  %v7301_v55 = vadd.f32 %v7300_v35, %v7278_v43  ;;  %v7972_v9 = vsub.f32 2.0, %v7964_v46 }
 0x5ab   :  { %v7330_v3 = vpop.f32.mrf.mxu0  ;;  %v7387_v4 = vpop.f32.mrf.mxu2  ;;  %v7979_v25 = vmul.f32 %v8239_v13, %v7971_v24  ;;  %v8271_v13 = vld [vmem:[#allocation10 + $0x140] sm:$0xff] }
 0x5ac   :  { %v6225_v47 = vmul.f32 %v6209_v57, %v5058_v22  ;;  %v7986_v18 = vmul.f32 %v7978_v20, %v7301_v55  ;;  %v7362_v61 = vadd.f32 %v7361_v29, %v7330_v3  ;;  %v7462_v45 = vpop.f32.mrf.mxu1  ;;  %v7980_v34 = vmul.f32 %v8241_v50, %v7972_v9 }
 0x5ad   :  { %v7412_v26 = vpop.f32.mrf.mxu3  ;;  %v6392_v20 = vrot.slane %v9752_v59, 4 }
 0x5ae   :  { %8010 = vst [vmem:[#allocation10 + $0x68] sm:$0xff] %v6225_v47  ;;  %v8026_v58 = vmul.f32 %v9910_v62, %v6225_v47  ;;  %v8058_v41 = vperm.slane %v7986_v18, 0  ;;  %v7388_v31 = vadd.f32 %v7387_v4, %v7362_v61  ;;  %v8243_v60 = vpop.eup %8242  ;;  %v8272_v4 = vld [vmem:[#allocation10 + $0x160] sm:$0xff] }
 0x5af   :  { %v7965_v55 = vmul.f32 %v8243_v60, %v6390_v14 }
 0x5b0   :  { %8042 = vst [vmem:[#allocation10 + $0x70] sm:$0xff] %v8026_v58  ;;  %v8069_v2 = vmul.f32 %v8267_v36, %v8058_v41  ;;  %v8070_v48 = vmul.f32 %v8268_v56, %v8058_v41  ;;  %v7413_v6 = vadd.f32 %v7412_v26, %v7388_v31  ;;  %v6393_v26 = vadd.f32 %v6392_v20, %v9752_v59 }
 0x5b1   :  { %v7973_v61 = vsub.f32 2.0, %v7965_v55 }
 0x5b2   :  { %8085 = vst [vmem:[#allocation10 + $0xd8] sm:$0xff] %v8069_v2  ;;  %v6394_v31 = vrot.slane %v6393_v26, 2 }
 0x5b3   :  { %8086 = vst [vmem:[#allocation10 + $0xf8] sm:$0xff] %v8070_v48  ;;  %v7439_v30 = vpop.f32.mrf.mxu0  ;;  %v7492_v7 = vpop.f32.mrf.mxu2  ;;  %v7981_v41 = vmul.f32 %v8243_v60, %v7973_v61 }
 0x5b4   :  { %v7440_v51 = vadd.f32 %v7439_v30, %v7413_v6  ;;  %v7574_v10 = vpop.f32.mrf.mxu1  ;;  %v6395_v2 = vadd.f32 %v6394_v31, %v6393_v26 }
 0x5b5   :  { %v7523_v27 = vpop.f32.mrf.mxu3 }
 0x5b6   :  { %v7463_v62 = vadd.f32 %v7462_v45, %v7440_v51  ;;  %v7524_v63 = vadd.f32 %v7523_v27, %v7492_v7  ;;  %v6396_v6 = vrot.slane %v6395_v2, 1 }
 0x5b8   :  { %v7987_v23 = vmul.f32 %v7979_v25, %v7463_v62  ;;  %v6397_v39 = vadd.f32 %v6396_v6, %v6395_v2 }
 0x5ba   :  { %v8059_v19 = vperm.slane %v7987_v23, 0  ;;  %8244 = vrcp.f32 %v6397_v39 }
 0x5bb   :  { %v7549_v16 = vpop.f32.mrf.mxu0  ;;  %v7601_v17 = vpop.f32.mrf.mxu2 }
 0x5bc   :  { %v8071_v52 = vmul.f32 %v8269_v38, %v8059_v19  ;;  %v8072_v53 = vmul.f32 %v8270_v5, %v8059_v19  ;;  %v7550_v15 = vadd.f32 %v7549_v16, %v7524_v63  ;;  %v7685_v54 = vpop.f32.mrf.mxu1 }
 0x5bd   :  { %v7624_v29 = vpop.f32.mrf.mxu3 }
 0x5be   :  { %8087 = vst [vmem:[#allocation10 + $0x118] sm:$0xff] %v8071_v52  ;;  %v7575_v32 = vadd.f32 %v7574_v10, %v7550_v15 }
 0x5bf   :  { %8088 = vst [vmem:[#allocation10 + $0x138] sm:$0xff] %v8072_v53 }
 0x5c0   :  { %v7602_v35 = vadd.f32 %v7601_v17, %v7575_v32  ;;  %v8245_v59 = vpop.eup %8244 }
 0x5c1   :  { %v7966_v44 = vmul.f32 %v8245_v59, %v6397_v39 }
 0x5c2   :  { %v7625_v12 = vadd.f32 %v7624_v29, %v7602_v35 }
 0x5c3   :  { %v7654_v21 = vpop.f32.mrf.mxu0  ;;  %v7711_v8 = vpop.f32.mrf.mxu2  ;;  %v7974_v50 = vsub.f32 2.0, %v7966_v44 }
 0x5c4   :  { %v7988_v43 = vmul.f32 %v7980_v34, %v7625_v12  ;;  %v7686_v37 = vadd.f32 %v7685_v54, %v7654_v21  ;;  %v7786_v40 = vpop.f32.mrf.mxu1 }
 0x5c5   :  { %v7736_v11 = vpop.f32.mrf.mxu3 }
 0x5c6   :  { %v8060_v22 = vperm.slane %v7988_v43, 0  ;;  %v7712_v57 = vadd.f32 %v7711_v8, %v7686_v37 }
 0x5c8   :  { %v8073_v3 = vmul.f32 %v8271_v13, %v8060_v22  ;;  %v8074_v47 = vmul.f32 %v8272_v4, %v8060_v22  ;;  %v7737_v18 = vadd.f32 %v7736_v11, %v7712_v57 }
 0x5ca   :  { %8089 = vst [vmem:[#allocation10 + $0x158] sm:$0xff] %v8073_v3 }
 0x5cb   :  { %8090 = vst [vmem:[#allocation10 + $0x178] sm:$0xff] %v8074_v47  ;;  %v7763_v45 = vpop.f32.mrf.mxu0 }
 0x5cc   :  { %v7764_v1 = vadd.f32 %v7763_v45, %v7737_v18 }
 0x5ce   :  { %v7787_v58 = vadd.f32 %v7786_v40, %v7764_v1 }
 0x5d0   :  { %v7989_v49 = vmul.f32 %v7981_v41, %v7787_v58 }
 0x5d2   :  { %v8061_v36 = vperm.slane %v7989_v49, 0 }
 0x5d4   :  { %v8075_v56 = vmul.f32 %v9742_v42, %v8061_v36  ;;  %v8076_v48 = vmul.f32 %v9747_v0, %v8061_v36  ;;  %v7982_v0 = vmul.f32 %v8245_v59, %v7974_v50 }
 0x5d6   :  { %8091 = vst [vmem:[#allocation10 + $0x198] sm:$0xff] %v8075_v56 }
 0x5d7   :  { %8092 = vst [vmem:[#allocation10 + $0x1b8] sm:$0xff] %v8076_v48 }
 0x5d9   :  { %v7873_v51 = vpop.f32.mrf.mxu0 }
 0x5db   :  { %v7898_v62 = vpop.f32.mrf.mxu1 }
 0x5dd   :  { %v7847_v24 = vpop.f32.mrf.mxu3 }
 0x5e5   :  { %v7816_v30 = vpop.f32.mrf.mxu2  ;;  %v7948_v42 = vpop.f32.mrf.mxu3 }
 0x5e6   :  { %v7848_v7 = vadd.f32 %v7847_v24, %v7816_v30 }
 0x5e8   :  { %v7874_v27 = vadd.f32 %v7873_v51, %v7848_v7 }
 0x5ea   :  { %v7899_v25 = vadd.f32 %v7898_v62, %v7874_v27 }
 0x5ed   :  { %v7925_v10 = vpop.f32.mrf.mxu2 }
 0x5ee   :  { %v7926_v23 = vadd.f32 %v7925_v10, %v7899_v25 }
 0x5f0   :  { %v7949_v63 = vadd.f32 %v7948_v42, %v7926_v23 }
 0x5f2   :  { %v7990_v14 = vmul.f32 %v7982_v0, %v7949_v63 }
 0x5f4   :  { %v8062_v19 = vperm.slane %v7990_v14, 0 }
 0x5f6   :  { %v8077_v46 = vmul.f32 %v9882_v28, %v8062_v19  ;;  %v8078_v16 = vmul.f32 %v9892_v33, %v8062_v19 }
 0x5f8   :  { %8093 = vst [vmem:[#allocation10 + $0x1d8] sm:$0xff] %v8077_v46 }
 0x5f9   :  { %8094 = vst [vmem:[#allocation10 + $0x1f8] sm:$0xff] %v8078_v16 }
 0x5fa   :  { %8107 = dma.vmem_to_hbm [thread:$0]  %s8100_s11, 8192, %s8102_s14, [#allocation4], %s8398_s15, %s8398_s15, %s8399_s16  }
 0x5fb   :  { %8387 = dma.done.wait [#allocation4], 8192  }
 0x5fc   :  { %8388 = vsyncadd [#allocation4], 4294959104 }
 0x5fd   :  { %8112 = vsyncpa [#allocation3], 1 }
 0x5fe   :  { %8113 = vsyncpa [#allocation7], 1 }
 0x5ff   :  { %8114 = vsyncpa [#allocation4], 1 }
 0x600   :  { %8115 = vsyncpa [#allocation5], 1 }

</bundles_post_ra>
